<compile_context>
chip_gen: v5e
topology: v5e:2x2
jax: 0.10.0
libtpu: 0.0.40
codegen_flags: <defaults>
</compile_context>

<pallas_src>
import math

import jax
import jax.numpy as jnp
from jax.experimental import pallas as pl
from jax.experimental.pallas import tpu as pltpu

TIME_LENGTH = 11
FEATURE_DIM = 4
D_MODEL = 2 * FEATURE_DIM          # 8
NHEAD = 4
HEAD_DIM = D_MODEL // NHEAD        # 2
FFN_DIM = 2048                     # PyTorch TransformerEncoderLayer default
NUM_LAYERS = 2
HIDDEN_DIM = 32
LN_EPS = 1e-5
NEG_INF = -1e30


def _layer_norm(x, w, b):
    mu = jnp.mean(x, axis=-1, keepdims=True)
    var = jnp.mean(jnp.square(x - mu), axis=-1, keepdims=True)
    return (x - mu) * jax.lax.rsqrt(var + LN_EPS) * w + b


def ps_estimation_kernel(x_ref, pe_ref, bias_ref, sel_ref,
                         wfe_ref, bfe_ref,
                         inw_ref, inb_ref, outw_ref, outb_ref,
                         ln1w_ref, ln1b_ref, l1w_ref, l1b_ref,
                         l2w_ref, l2b_ref, ln2w_ref, ln2b_ref,
                         f1w_ref, f1b_ref, f2w_ref, f2b_ref, f3w_ref, f3b_ref,
                         o_ref):
    # All B*T rows are processed together; attention is kept per-batch via the
    # precomputed block-diagonal additive bias (0 on-batch, -1e30 cross-batch).
    scale = 1.0 / math.sqrt(HEAD_DIM)

    # feature_expand: (N, F) @ (F, D) + b, then positional encoding.
    h = jnp.dot(x_ref[...], wfe_ref[...],
                preferred_element_type=jnp.float32) + bfe_ref[...]
    h = h + pe_ref[...]                                            # (N, D)
    bias = bias_ref[...]                                           # (N, N)

    for l in range(NUM_LAYERS):                                    # static unroll (2)
        inw, inb = inw_ref[l], inb_ref[l]
        outw, outb = outw_ref[l], outb_ref[l]

        # QKV projection: (N, D) @ (D, 3D) + (1, 3D)
        qkv = jnp.dot(h, inw, preferred_element_type=jnp.float32) + inb
        q = qkv[:, 0:D_MODEL] * scale
        k = qkv[:, D_MODEL:2 * D_MODEL]
        v = qkv[:, 2 * D_MODEL:3 * D_MODEL]

        attn = None
        for hh in range(NHEAD):                                    # static unroll (4)
            lo = hh * HEAD_DIM
            hi = lo + HEAD_DIM
            # scores = q_h @ k_h^T (+ block-diagonal batch bias)
            s = jax.lax.dot_general(q[:, lo:hi], k[:, lo:hi],
                                    (((1,), (1,)), ((), ())),
                                    preferred_element_type=jnp.float32) + bias
            s = s - jnp.max(s, axis=-1, keepdims=True)
            e = jnp.exp(s)
            p = e / jnp.sum(e, axis=-1, keepdims=True)             # (N, N)
            # Fold this head's output-projection rows into V with VPU outer
            # products (no per-head concat, no (N,2)x(2,D) matmul):
            vw = (v[:, lo:lo + 1] * outw[lo:lo + 1, :] +
                  v[:, lo + 1:hi] * outw[lo + 1:hi, :])             # (N, D)
            contrib = jnp.dot(p, vw, preferred_element_type=jnp.float32)
            attn = contrib if attn is None else attn + contrib
        attn = attn + outb

        h = _layer_norm(h + attn, ln1w_ref[l], ln1b_ref[l])

        # FFN in bf16 weights with f32 accumulation; l2w is stored lane-dense
        # (D, FFN) and contracted with an rhs-transposed dot_general.
        ff = jnp.dot(h.astype(jnp.bfloat16), l1w_ref[l],
                     preferred_element_type=jnp.float32) + l1b_ref[l]
        ff = jnp.maximum(ff, 0.0)                                   # (N, FFN)
        ff2 = jax.lax.dot_general(ff.astype(jnp.bfloat16), l2w_ref[l],
                                  (((1,), (1,)), ((), ())),
                                  preferred_element_type=jnp.float32) + l2b_ref[l]
        h = _layer_norm(h + ff2, ln2w_ref[l], ln2b_ref[l])

    # AttentionLayer: softmax over a size-1 axis is exactly 1.0, so the
    # weighted feature is just the per-row feature sum (bit-identical).
    feat = jnp.sum(h, axis=-1, keepdims=True)                       # (N, 1)

    # MLP head in batched row form, no in-kernel reshape/transpose:
    #   y1[b, :] = sum_n sel[b, n] * feat[n] * f1w_tiled[n, :]  ==  fc1(feat_b)
    y = jnp.dot(sel_ref[...], feat * f1w_ref[...],
                preferred_element_type=jnp.float32) + f1b_ref[...]  # (B, HIDDEN)
    y = jnp.maximum(y, 0.0)
    y = jnp.maximum(jnp.dot(y, f2w_ref[...],
                            preferred_element_type=jnp.float32) + f2b_ref[...], 0.0)
    y = jnp.dot(y, f3w_ref[...], preferred_element_type=jnp.float32) + f3b_ref[...]
    o_ref[...] = 1.0 / (1.0 + jnp.exp(-y))                          # sigmoid, (B, 1)


def init_params(key):
    ks = jax.random.split(key, 17)

    def nrm(k, shape, s=0.1):
        return s * jax.random.normal(k, shape, dtype=jnp.float32)

    # Positional-encoding buffer, identical construction to PyTorch.
    position = jnp.arange(TIME_LENGTH, dtype=jnp.float32)[:, None]
    div_term = jnp.exp(jnp.arange(0, D_MODEL, 2, dtype=jnp.float32) *
                       (-math.log(10000.0) / D_MODEL))
    pe = jnp.zeros((TIME_LENGTH, D_MODEL), jnp.float32)
    pe = pe.at[:, 0::2].set(jnp.sin(position * div_term))
    pe = pe.at[:, 1::2].set(jnp.cos(position * div_term))

    return dict(
        wfe=nrm(ks[0], (FEATURE_DIM, D_MODEL)),                # (in, out)
        bfe=nrm(ks[1], (1, D_MODEL)),
        pe=pe,
        inw=nrm(ks[2], (NUM_LAYERS, D_MODEL, 3 * D_MODEL)),    # in_proj, pre-transposed
        inb=nrm(ks[3], (NUM_LAYERS, 1, 3 * D_MODEL)),
        outw=nrm(ks[4], (NUM_LAYERS, D_MODEL, D_MODEL)),
        outb=nrm(ks[5], (NUM_LAYERS, 1, D_MODEL)),
        ln1w=jnp.ones((NUM_LAYERS, 1, D_MODEL), jnp.float32),
        ln1b=jnp.zeros((NUM_LAYERS, 1, D_MODEL), jnp.float32),
        l1w=nrm(ks[6], (NUM_LAYERS, D_MODEL, FFN_DIM)),        # linear1, pre-transposed
        l1b=nrm(ks[7], (NUM_LAYERS, 1, FFN_DIM)),
        l2w=nrm(ks[8], (NUM_LAYERS, D_MODEL, FFN_DIM), s=0.02),  # linear2, torch (out, in) layout — lane-dense
        l2b=nrm(ks[9], (NUM_LAYERS, 1, D_MODEL)),
        ln2w=jnp.ones((NUM_LAYERS, 1, D_MODEL), jnp.float32),
        ln2b=jnp.zeros((NUM_LAYERS, 1, D_MODEL), jnp.float32),
        # attention_weights is mathematically inert in the forward (softmax over
        # a size-1 axis == 1), so it is not passed to the kernel.
        attw=nrm(ks[10], (D_MODEL, 1)),
        f1w=nrm(ks[11], (TIME_LENGTH, HIDDEN_DIM)),            # fc1, pre-transposed (in, out)
        f1b=nrm(ks[12], (1, HIDDEN_DIM)),
        f2w=nrm(ks[13], (HIDDEN_DIM, HIDDEN_DIM)),
        f2b=nrm(ks[14], (1, HIDDEN_DIM)),
        f3w=nrm(ks[15], (HIDDEN_DIM, 1)),
        f3b=nrm(ks[16], (1, 1)),
    )


def ps_estimation_forward(x, params):
    x = x.astype(jnp.float32)
    batch, tlen, fdim = x.shape
    n = batch * tlen

    # Fuse batch into the row axis; everything below is tiny wrapper-side prep.
    x2d = x.reshape(n, fdim)
    pe_rows = jnp.tile(params["pe"], (batch, 1))                       # (N, D)
    batch_id = jnp.repeat(jnp.arange(batch, dtype=jnp.int32), tlen)    # (N,)
    attn_bias = jnp.where(batch_id[:, None] == batch_id[None, :],
                          0.0, NEG_INF).astype(jnp.float32)            # (N, N)
    sel = (batch_id[None, :] ==
           jnp.arange(batch, dtype=jnp.int32)[:, None]).astype(jnp.float32)  # (B, N)
    f1w_rows = jnp.tile(params["f1w"], (batch, 1))                     # (N, HIDDEN)

    # bf16 FFN weights (f32 accumulation inside the kernel).
    l1w_bf16 = params["l1w"].astype(jnp.bfloat16)
    l2w_bf16 = params["l2w"].astype(jnp.bfloat16)

    operands = (
        x2d, pe_rows, attn_bias, sel,
        params["wfe"], params["bfe"],
        params["inw"], params["inb"], params["outw"], params["outb"],
        params["ln1w"], params["ln1b"],
        l1w_bf16, params["l1b"], l2w_bf16, params["l2b"],
        params["ln2w"], params["ln2b"],
        f1w_rows, params["f1b"], params["f2w"], params["f2b"],
        params["f3w"], params["f3b"],
    )
    vmem_spec = pl.BlockSpec(memory_space=pltpu.MemorySpace.VMEM)
    return pl.pallas_call(
        ps_estimation_kernel,
        out_shape=jax.ShapeDtypeStruct((batch, 1), jnp.float32),
        in_specs=[vmem_spec] * len(operands),
        out_specs=vmem_spec,
    )(*operands)


if __name__ == "__main__":
    key = jax.random.PRNGKey(0)
    k_param, k_x = jax.random.split(key)
    params = init_params(k_param)
    # batch=2, time_length=11, feature_dim=4 — matches the module defaults.
    x = jax.random.normal(k_x, (2, TIME_LENGTH, FEATURE_DIM), dtype=jnp.float32)
    fwd = jax.jit(ps_estimation_forward)
    out = jax.block_until_ready(fwd(x, params))
    assert out.shape == (2, 1)
    assert bool(jnp.all(jnp.isfinite(out)))
    print("KERNEL_OK")
</pallas_src>

<mosaic_0001>
module attributes {stable_mosaic.version = 11 : i64} {
  func.func @ps_estimation_kernel(%arg0: memref<22x4xf32, #tpu.memory_space<vmem>>, %arg1: memref<22x8xf32, #tpu.memory_space<vmem>>, %arg2: memref<22x22xf32, #tpu.memory_space<vmem>>, %arg3: memref<2x22xf32, #tpu.memory_space<vmem>>, %arg4: memref<4x8xf32, #tpu.memory_space<vmem>>, %arg5: memref<1x8xf32, #tpu.memory_space<vmem>>, %arg6: memref<2x8x24xf32, #tpu.memory_space<vmem>>, %arg7: memref<2x1x24xf32, #tpu.memory_space<vmem>>, %arg8: memref<2x8x8xf32, #tpu.memory_space<vmem>>, %arg9: memref<2x1x8xf32, #tpu.memory_space<vmem>>, %arg10: memref<2x1x8xf32, #tpu.memory_space<vmem>>, %arg11: memref<2x1x8xf32, #tpu.memory_space<vmem>>, %arg12: memref<2x8x2048xbf16, #tpu.memory_space<vmem>>, %arg13: memref<2x1x2048xf32, #tpu.memory_space<vmem>>, %arg14: memref<2x8x2048xbf16, #tpu.memory_space<vmem>>, %arg15: memref<2x1x8xf32, #tpu.memory_space<vmem>>, %arg16: memref<2x1x8xf32, #tpu.memory_space<vmem>>, %arg17: memref<2x1x8xf32, #tpu.memory_space<vmem>>, %arg18: memref<22x32xf32, #tpu.memory_space<vmem>>, %arg19: memref<1x32xf32, #tpu.memory_space<vmem>>, %arg20: memref<32x32xf32, #tpu.memory_space<vmem>>, %arg21: memref<1x32xf32, #tpu.memory_space<vmem>>, %arg22: memref<32x1xf32, #tpu.memory_space<vmem>>, %arg23: memref<1x1xf32, #tpu.memory_space<vmem>>, %arg24: memref<2x1xf32, #tpu.memory_space<vmem>>) attributes {dimension_semantics = [], scalar_prefetch = 0 : i64, scratch_operands = 0 : i64, tpu.core_type = #tpu.core_type<tc>} {
    %c0 = arith.constant 0 : index
    %c0_0 = arith.constant 0 : index
    %0 = vector.load %arg0[%c0, %c0_0] : memref<22x4xf32, #tpu.memory_space<vmem>>, vector<22x4xf32>
    %c0_1 = arith.constant 0 : index
    %c0_2 = arith.constant 0 : index
    %1 = vector.load %arg4[%c0_1, %c0_2] : memref<4x8xf32, #tpu.memory_space<vmem>>, vector<4x8xf32>
    %cst = arith.constant dense<0.000000e+00> : vector<22x8xf32>
    %2 = tpu.matmul %0, %1, %cst {dimension_numbers = #tpu.dot_dimension_numbers<[1], [0], [0], [1], [0, 0, 1, 1], [], []>} : vector<22x4xf32>, vector<4x8xf32>, vector<22x8xf32> -> vector<22x8xf32>
    %c0_3 = arith.constant 0 : index
    %c0_4 = arith.constant 0 : index
    %3 = vector.load %arg5[%c0_3, %c0_4] : memref<1x8xf32, #tpu.memory_space<vmem>>, vector<1x8xf32>
    %4 = vector.broadcast %3 : vector<1x8xf32> to vector<22x8xf32>
    %5 = arith.addf %2, %4 : vector<22x8xf32>
    %c0_5 = arith.constant 0 : index
    %c0_6 = arith.constant 0 : index
    %6 = vector.load %arg1[%c0_5, %c0_6] : memref<22x8xf32, #tpu.memory_space<vmem>>, vector<22x8xf32>
    %7 = arith.addf %5, %6 : vector<22x8xf32>
    %c0_7 = arith.constant 0 : index
    %c0_8 = arith.constant 0 : index
    %8 = vector.load %arg2[%c0_7, %c0_8] : memref<22x22xf32, #tpu.memory_space<vmem>>, vector<22x22xf32>
    %c0_9 = arith.constant 0 : index
    %c0_10 = arith.constant 0 : index
    %c0_11 = arith.constant 0 : index
    %9 = vector.load %arg6[%c0_9, %c0_10, %c0_11] : memref<2x8x24xf32, #tpu.memory_space<vmem>>, vector<1x8x24xf32>
    %10 = vector.shape_cast %9 : vector<1x8x24xf32> to vector<8x24xf32>
    %c0_12 = arith.constant 0 : index
    %c0_13 = arith.constant 0 : index
    %c0_14 = arith.constant 0 : index
    %11 = vector.load %arg7[%c0_12, %c0_13, %c0_14] : memref<2x1x24xf32, #tpu.memory_space<vmem>>, vector<1x1x24xf32>
    %12 = vector.shape_cast %11 : vector<1x1x24xf32> to vector<1x24xf32>
    %c0_15 = arith.constant 0 : index
    %c0_16 = arith.constant 0 : index
    %c0_17 = arith.constant 0 : index
    %13 = vector.load %arg8[%c0_15, %c0_16, %c0_17] : memref<2x8x8xf32, #tpu.memory_space<vmem>>, vector<1x8x8xf32>
    %14 = vector.shape_cast %13 : vector<1x8x8xf32> to vector<8x8xf32>
    %c0_18 = arith.constant 0 : index
    %c0_19 = arith.constant 0 : index
    %c0_20 = arith.constant 0 : index
    %15 = vector.load %arg9[%c0_18, %c0_19, %c0_20] : memref<2x1x8xf32, #tpu.memory_space<vmem>>, vector<1x1x8xf32>
    %16 = vector.shape_cast %15 : vector<1x1x8xf32> to vector<1x8xf32>
    %cst_21 = arith.constant dense<0.000000e+00> : vector<22x24xf32>
    %17 = tpu.matmul %7, %10, %cst_21 {dimension_numbers = #tpu.dot_dimension_numbers<[1], [0], [0], [1], [0, 0, 1, 1], [], []>} : vector<22x8xf32>, vector<8x24xf32>, vector<22x24xf32> -> vector<22x24xf32>
    %18 = vector.broadcast %12 : vector<1x24xf32> to vector<22x24xf32>
    %19 = arith.addf %17, %18 : vector<22x24xf32>
    %20 = vector.extract_strided_slice %19 {offsets = [0, 0], sizes = [22, 8], strides = [1, 1]} : vector<22x24xf32> to vector<22x8xf32>
    %cst_22 = arith.constant 0.707106769 : f32
    %21 = vector.broadcast %cst_22 : f32 to vector<22x8xf32>
    %22 = arith.mulf %20, %21 : vector<22x8xf32>
    %23 = vector.extract_strided_slice %19 {offsets = [0, 8], sizes = [22, 8], strides = [1, 1]} : vector<22x24xf32> to vector<22x8xf32>
    %24 = vector.extract_strided_slice %19 {offsets = [0, 16], sizes = [22, 8], strides = [1, 1]} : vector<22x24xf32> to vector<22x8xf32>
    %25 = vector.extract_strided_slice %22 {offsets = [0, 0], sizes = [22, 2], strides = [1, 1]} : vector<22x8xf32> to vector<22x2xf32>
    %26 = vector.extract_strided_slice %23 {offsets = [0, 0], sizes = [22, 2], strides = [1, 1]} : vector<22x8xf32> to vector<22x2xf32>
    %cst_23 = arith.constant dense<0.000000e+00> : vector<22x22xf32>
    %27 = tpu.matmul %25, %26, %cst_23 {dimension_numbers = #tpu.dot_dimension_numbers<[1], [1], [0], [0], [0, 0, 1, 0], [], []>} : vector<22x2xf32>, vector<22x2xf32>, vector<22x22xf32> -> vector<22x22xf32>
    %28 = arith.addf %27, %8 : vector<22x22xf32>
    %cst_24 = arith.constant dense<0xFF800000> : vector<22xf32>
    %29 = vector.multi_reduction <maximumf>, %28, %cst_24 [1] : vector<22x22xf32> to vector<22xf32>
    %30 = vector.shape_cast %29 : vector<22xf32> to vector<22x1xf32>
    %31 = vector.broadcast %30 : vector<22x1xf32> to vector<22x22xf32>
    %32 = arith.subf %28, %31 : vector<22x22xf32>
    %33 = math.exp %32 : vector<22x22xf32>
    %cst_25 = arith.constant dense<0.000000e+00> : vector<22xf32>
    %34 = vector.multi_reduction <add>, %33, %cst_25 [1] : vector<22x22xf32> to vector<22xf32>
    %35 = vector.shape_cast %34 : vector<22xf32> to vector<22x1xf32>
    %36 = vector.broadcast %35 : vector<22x1xf32> to vector<22x22xf32>
    %37 = arith.divf %33, %36 : vector<22x22xf32>
    %38 = vector.extract_strided_slice %24 {offsets = [0, 0], sizes = [22, 1], strides = [1, 1]} : vector<22x8xf32> to vector<22x1xf32>
    %39 = vector.extract_strided_slice %14 {offsets = [0, 0], sizes = [1, 8], strides = [1, 1]} : vector<8x8xf32> to vector<1x8xf32>
    %40 = vector.broadcast %38 : vector<22x1xf32> to vector<22x8xf32>
    %41 = vector.broadcast %39 : vector<1x8xf32> to vector<22x8xf32>
    %42 = arith.mulf %40, %41 : vector<22x8xf32>
    %43 = vector.extract_strided_slice %24 {offsets = [0, 1], sizes = [22, 1], strides = [1, 1]} : vector<22x8xf32> to vector<22x1xf32>
    %44 = vector.extract_strided_slice %14 {offsets = [1, 0], sizes = [1, 8], strides = [1, 1]} : vector<8x8xf32> to vector<1x8xf32>
    %45 = vector.broadcast %43 : vector<22x1xf32> to vector<22x8xf32>
    %46 = vector.broadcast %44 : vector<1x8xf32> to vector<22x8xf32>
    %47 = arith.mulf %45, %46 : vector<22x8xf32>
    %48 = arith.addf %42, %47 : vector<22x8xf32>
    %cst_26 = arith.constant dense<0.000000e+00> : vector<22x8xf32>
    %49 = tpu.matmul %37, %48, %cst_26 {dimension_numbers = #tpu.dot_dimension_numbers<[1], [0], [0], [1], [0, 0, 1, 1], [], []>} : vector<22x22xf32>, vector<22x8xf32>, vector<22x8xf32> -> vector<22x8xf32>
    %50 = vector.extract_strided_slice %22 {offsets = [0, 2], sizes = [22, 2], strides = [1, 1]} : vector<22x8xf32> to vector<22x2xf32>
    %51 = vector.extract_strided_slice %23 {offsets = [0, 2], sizes = [22, 2], strides = [1, 1]} : vector<22x8xf32> to vector<22x2xf32>
    %cst_27 = arith.constant dense<0.000000e+00> : vector<22x22xf32>
    %52 = tpu.matmul %50, %51, %cst_27 {dimension_numbers = #tpu.dot_dimension_numbers<[1], [1], [0], [0], [0, 0, 1, 0], [], []>} : vector<22x2xf32>, vector<22x2xf32>, vector<22x22xf32> -> vector<22x22xf32>
    %53 = arith.addf %52, %8 : vector<22x22xf32>
    %cst_28 = arith.constant dense<0xFF800000> : vector<22xf32>
    %54 = vector.multi_reduction <maximumf>, %53, %cst_28 [1] : vector<22x22xf32> to vector<22xf32>
    %55 = vector.shape_cast %54 : vector<22xf32> to vector<22x1xf32>
    %56 = vector.broadcast %55 : vector<22x1xf32> to vector<22x22xf32>
    %57 = arith.subf %53, %56 : vector<22x22xf32>
    %58 = math.exp %57 : vector<22x22xf32>
    %cst_29 = arith.constant dense<0.000000e+00> : vector<22xf32>
    %59 = vector.multi_reduction <add>, %58, %cst_29 [1] : vector<22x22xf32> to vector<22xf32>
    %60 = vector.shape_cast %59 : vector<22xf32> to vector<22x1xf32>
    %61 = vector.broadcast %60 : vector<22x1xf32> to vector<22x22xf32>
    %62 = arith.divf %58, %61 : vector<22x22xf32>
    %63 = vector.extract_strided_slice %24 {offsets = [0, 2], sizes = [22, 1], strides = [1, 1]} : vector<22x8xf32> to vector<22x1xf32>
    %64 = vector.extract_strided_slice %14 {offsets = [2, 0], sizes = [1, 8], strides = [1, 1]} : vector<8x8xf32> to vector<1x8xf32>
    %65 = vector.broadcast %63 : vector<22x1xf32> to vector<22x8xf32>
    %66 = vector.broadcast %64 : vector<1x8xf32> to vector<22x8xf32>
    %67 = arith.mulf %65, %66 : vector<22x8xf32>
    %68 = vector.extract_strided_slice %24 {offsets = [0, 3], sizes = [22, 1], strides = [1, 1]} : vector<22x8xf32> to vector<22x1xf32>
    %69 = vector.extract_strided_slice %14 {offsets = [3, 0], sizes = [1, 8], strides = [1, 1]} : vector<8x8xf32> to vector<1x8xf32>
    %70 = vector.broadcast %68 : vector<22x1xf32> to vector<22x8xf32>
    %71 = vector.broadcast %69 : vector<1x8xf32> to vector<22x8xf32>
    %72 = arith.mulf %70, %71 : vector<22x8xf32>
    %73 = arith.addf %67, %72 : vector<22x8xf32>
    %cst_30 = arith.constant dense<0.000000e+00> : vector<22x8xf32>
    %74 = tpu.matmul %62, %73, %cst_30 {dimension_numbers = #tpu.dot_dimension_numbers<[1], [0], [0], [1], [0, 0, 1, 1], [], []>} : vector<22x22xf32>, vector<22x8xf32>, vector<22x8xf32> -> vector<22x8xf32>
    %75 = arith.addf %49, %74 : vector<22x8xf32>
    %76 = vector.extract_strided_slice %22 {offsets = [0, 4], sizes = [22, 2], strides = [1, 1]} : vector<22x8xf32> to vector<22x2xf32>
    %77 = vector.extract_strided_slice %23 {offsets = [0, 4], sizes = [22, 2], strides = [1, 1]} : vector<22x8xf32> to vector<22x2xf32>
    %cst_31 = arith.constant dense<0.000000e+00> : vector<22x22xf32>
    %78 = tpu.matmul %76, %77, %cst_31 {dimension_numbers = #tpu.dot_dimension_numbers<[1], [1], [0], [0], [0, 0, 1, 0], [], []>} : vector<22x2xf32>, vector<22x2xf32>, vector<22x22xf32> -> vector<22x22xf32>
    %79 = arith.addf %78, %8 : vector<22x22xf32>
    %cst_32 = arith.constant dense<0xFF800000> : vector<22xf32>
    %80 = vector.multi_reduction <maximumf>, %79, %cst_32 [1] : vector<22x22xf32> to vector<22xf32>
    %81 = vector.shape_cast %80 : vector<22xf32> to vector<22x1xf32>
    %82 = vector.broadcast %81 : vector<22x1xf32> to vector<22x22xf32>
    %83 = arith.subf %79, %82 : vector<22x22xf32>
    %84 = math.exp %83 : vector<22x22xf32>
    %cst_33 = arith.constant dense<0.000000e+00> : vector<22xf32>
    %85 = vector.multi_reduction <add>, %84, %cst_33 [1] : vector<22x22xf32> to vector<22xf32>
    %86 = vector.shape_cast %85 : vector<22xf32> to vector<22x1xf32>
    %87 = vector.broadcast %86 : vector<22x1xf32> to vector<22x22xf32>
    %88 = arith.divf %84, %87 : vector<22x22xf32>
    %89 = vector.extract_strided_slice %24 {offsets = [0, 4], sizes = [22, 1], strides = [1, 1]} : vector<22x8xf32> to vector<22x1xf32>
    %90 = vector.extract_strided_slice %14 {offsets = [4, 0], sizes = [1, 8], strides = [1, 1]} : vector<8x8xf32> to vector<1x8xf32>
    %91 = vector.broadcast %89 : vector<22x1xf32> to vector<22x8xf32>
    %92 = vector.broadcast %90 : vector<1x8xf32> to vector<22x8xf32>
    %93 = arith.mulf %91, %92 : vector<22x8xf32>
    %94 = vector.extract_strided_slice %24 {offsets = [0, 5], sizes = [22, 1], strides = [1, 1]} : vector<22x8xf32> to vector<22x1xf32>
    %95 = vector.extract_strided_slice %14 {offsets = [5, 0], sizes = [1, 8], strides = [1, 1]} : vector<8x8xf32> to vector<1x8xf32>
    %96 = vector.broadcast %94 : vector<22x1xf32> to vector<22x8xf32>
    %97 = vector.broadcast %95 : vector<1x8xf32> to vector<22x8xf32>
    %98 = arith.mulf %96, %97 : vector<22x8xf32>
    %99 = arith.addf %93, %98 : vector<22x8xf32>
    %cst_34 = arith.constant dense<0.000000e+00> : vector<22x8xf32>
    %100 = tpu.matmul %88, %99, %cst_34 {dimension_numbers = #tpu.dot_dimension_numbers<[1], [0], [0], [1], [0, 0, 1, 1], [], []>} : vector<22x22xf32>, vector<22x8xf32>, vector<22x8xf32> -> vector<22x8xf32>
    %101 = arith.addf %75, %100 : vector<22x8xf32>
    %102 = vector.extract_strided_slice %22 {offsets = [0, 6], sizes = [22, 2], strides = [1, 1]} : vector<22x8xf32> to vector<22x2xf32>
    %103 = vector.extract_strided_slice %23 {offsets = [0, 6], sizes = [22, 2], strides = [1, 1]} : vector<22x8xf32> to vector<22x2xf32>
    %cst_35 = arith.constant dense<0.000000e+00> : vector<22x22xf32>
    %104 = tpu.matmul %102, %103, %cst_35 {dimension_numbers = #tpu.dot_dimension_numbers<[1], [1], [0], [0], [0, 0, 1, 0], [], []>} : vector<22x2xf32>, vector<22x2xf32>, vector<22x22xf32> -> vector<22x22xf32>
    %105 = arith.addf %104, %8 : vector<22x22xf32>
    %cst_36 = arith.constant dense<0xFF800000> : vector<22xf32>
    %106 = vector.multi_reduction <maximumf>, %105, %cst_36 [1] : vector<22x22xf32> to vector<22xf32>
    %107 = vector.shape_cast %106 : vector<22xf32> to vector<22x1xf32>
    %108 = vector.broadcast %107 : vector<22x1xf32> to vector<22x22xf32>
    %109 = arith.subf %105, %108 : vector<22x22xf32>
    %110 = math.exp %109 : vector<22x22xf32>
    %cst_37 = arith.constant dense<0.000000e+00> : vector<22xf32>
    %111 = vector.multi_reduction <add>, %110, %cst_37 [1] : vector<22x22xf32> to vector<22xf32>
    %112 = vector.shape_cast %111 : vector<22xf32> to vector<22x1xf32>
    %113 = vector.broadcast %112 : vector<22x1xf32> to vector<22x22xf32>
    %114 = arith.divf %110, %113 : vector<22x22xf32>
    %115 = vector.extract_strided_slice %24 {offsets = [0, 6], sizes = [22, 1], strides = [1, 1]} : vector<22x8xf32> to vector<22x1xf32>
    %116 = vector.extract_strided_slice %14 {offsets = [6, 0], sizes = [1, 8], strides = [1, 1]} : vector<8x8xf32> to vector<1x8xf32>
    %117 = vector.broadcast %115 : vector<22x1xf32> to vector<22x8xf32>
    %118 = vector.broadcast %116 : vector<1x8xf32> to vector<22x8xf32>
    %119 = arith.mulf %117, %118 : vector<22x8xf32>
    %120 = vector.extract_strided_slice %24 {offsets = [0, 7], sizes = [22, 1], strides = [1, 1]} : vector<22x8xf32> to vector<22x1xf32>
    %121 = vector.extract_strided_slice %14 {offsets = [7, 0], sizes = [1, 8], strides = [1, 1]} : vector<8x8xf32> to vector<1x8xf32>
    %122 = vector.broadcast %120 : vector<22x1xf32> to vector<22x8xf32>
    %123 = vector.broadcast %121 : vector<1x8xf32> to vector<22x8xf32>
    %124 = arith.mulf %122, %123 : vector<22x8xf32>
    %125 = arith.addf %119, %124 : vector<22x8xf32>
    %cst_38 = arith.constant dense<0.000000e+00> : vector<22x8xf32>
    %126 = tpu.matmul %114, %125, %cst_38 {dimension_numbers = #tpu.dot_dimension_numbers<[1], [0], [0], [1], [0, 0, 1, 1], [], []>} : vector<22x22xf32>, vector<22x8xf32>, vector<22x8xf32> -> vector<22x8xf32>
    %127 = arith.addf %101, %126 : vector<22x8xf32>
    %128 = vector.broadcast %16 : vector<1x8xf32> to vector<22x8xf32>
    %129 = arith.addf %127, %128 : vector<22x8xf32>
    %130 = arith.addf %7, %129 : vector<22x8xf32>
    %c0_39 = arith.constant 0 : index
    %c0_40 = arith.constant 0 : index
    %c0_41 = arith.constant 0 : index
    %131 = vector.load %arg10[%c0_39, %c0_40, %c0_41] : memref<2x1x8xf32, #tpu.memory_space<vmem>>, vector<1x1x8xf32>
    %132 = vector.shape_cast %131 : vector<1x1x8xf32> to vector<1x8xf32>
    %c0_42 = arith.constant 0 : index
    %c0_43 = arith.constant 0 : index
    %c0_44 = arith.constant 0 : index
    %133 = vector.load %arg11[%c0_42, %c0_43, %c0_44] : memref<2x1x8xf32, #tpu.memory_space<vmem>>, vector<1x1x8xf32>
    %134 = vector.shape_cast %133 : vector<1x1x8xf32> to vector<1x8xf32>
    %cst_45 = arith.constant dense<0.000000e+00> : vector<22xf32>
    %135 = vector.multi_reduction <add>, %130, %cst_45 [1] : vector<22x8xf32> to vector<22xf32>
    %136 = vector.shape_cast %135 : vector<22xf32> to vector<22x1xf32>
    %cst_46 = arith.constant 8.000000e+00 : f32
    %137 = vector.broadcast %cst_46 : f32 to vector<22x1xf32>
    %138 = arith.divf %136, %137 : vector<22x1xf32>
    %139 = vector.broadcast %138 : vector<22x1xf32> to vector<22x8xf32>
    %140 = arith.subf %130, %139 : vector<22x8xf32>
    %141 = arith.mulf %140, %140 : vector<22x8xf32>
    %cst_47 = arith.constant dense<0.000000e+00> : vector<22xf32>
    %142 = vector.multi_reduction <add>, %141, %cst_47 [1] : vector<22x8xf32> to vector<22xf32>
    %143 = vector.shape_cast %142 : vector<22xf32> to vector<22x1xf32>
    %cst_48 = arith.constant 8.000000e+00 : f32
    %144 = vector.broadcast %cst_48 : f32 to vector<22x1xf32>
    %145 = arith.divf %143, %144 : vector<22x1xf32>
    %146 = vector.broadcast %138 : vector<22x1xf32> to vector<22x8xf32>
    %147 = arith.subf %130, %146 : vector<22x8xf32>
    %cst_49 = arith.constant 9.99999974E-6 : f32
    %148 = vector.broadcast %cst_49 : f32 to vector<22x1xf32>
    %149 = arith.addf %145, %148 : vector<22x1xf32>
    %150 = math.rsqrt %149 : vector<22x1xf32>
    %151 = vector.broadcast %150 : vector<22x1xf32> to vector<22x8xf32>
    %152 = arith.mulf %147, %151 : vector<22x8xf32>
    %153 = vector.broadcast %132 : vector<1x8xf32> to vector<22x8xf32>
    %154 = arith.mulf %152, %153 : vector<22x8xf32>
    %155 = vector.broadcast %134 : vector<1x8xf32> to vector<22x8xf32>
    %156 = arith.addf %154, %155 : vector<22x8xf32>
    %157 = arith.truncf %156 : vector<22x8xf32> to vector<22x8xbf16>
    %c0_50 = arith.constant 0 : index
    %c0_51 = arith.constant 0 : index
    %c0_52 = arith.constant 0 : index
    %158 = vector.load %arg12[%c0_50, %c0_51, %c0_52] : memref<2x8x2048xbf16, #tpu.memory_space<vmem>>, vector<1x8x2048xbf16>
    %159 = vector.shape_cast %158 : vector<1x8x2048xbf16> to vector<8x2048xbf16>
    %cst_53 = arith.constant dense<0.000000e+00> : vector<22x2048xf32>
    %160 = tpu.matmul %157, %159, %cst_53 {dimension_numbers = #tpu.dot_dimension_numbers<[1], [0], [0], [1], [0, 0, 1, 1], [], []>} : vector<22x8xbf16>, vector<8x2048xbf16>, vector<22x2048xf32> -> vector<22x2048xf32>
    %c0_54 = arith.constant 0 : index
    %c0_55 = arith.constant 0 : index
    %c0_56 = arith.constant 0 : index
    %161 = vector.load %arg13[%c0_54, %c0_55, %c0_56] : memref<2x1x2048xf32, #tpu.memory_space<vmem>>, vector<1x1x2048xf32>
    %162 = vector.shape_cast %161 : vector<1x1x2048xf32> to vector<1x2048xf32>
    %163 = vector.broadcast %162 : vector<1x2048xf32> to vector<22x2048xf32>
    %164 = arith.addf %160, %163 : vector<22x2048xf32>
    %cst_57 = arith.constant 0.000000e+00 : f32
    %165 = vector.broadcast %cst_57 : f32 to vector<22x2048xf32>
    %166 = arith.maximumf %164, %165 : vector<22x2048xf32>
    %167 = arith.truncf %166 : vector<22x2048xf32> to vector<22x2048xbf16>
    %c0_58 = arith.constant 0 : index
    %c0_59 = arith.constant 0 : index
    %c0_60 = arith.constant 0 : index
    %168 = vector.load %arg14[%c0_58, %c0_59, %c0_60] : memref<2x8x2048xbf16, #tpu.memory_space<vmem>>, vector<1x8x2048xbf16>
    %169 = vector.shape_cast %168 : vector<1x8x2048xbf16> to vector<8x2048xbf16>
    %cst_61 = arith.constant dense<0.000000e+00> : vector<22x8xf32>
    %170 = tpu.matmul %167, %169, %cst_61 {dimension_numbers = #tpu.dot_dimension_numbers<[1], [1], [0], [0], [0, 0, 1, 0], [], []>} : vector<22x2048xbf16>, vector<8x2048xbf16>, vector<22x8xf32> -> vector<22x8xf32>
    %c0_62 = arith.constant 0 : index
    %c0_63 = arith.constant 0 : index
    %c0_64 = arith.constant 0 : index
    %171 = vector.load %arg15[%c0_62, %c0_63, %c0_64] : memref<2x1x8xf32, #tpu.memory_space<vmem>>, vector<1x1x8xf32>
    %172 = vector.shape_cast %171 : vector<1x1x8xf32> to vector<1x8xf32>
    %173 = vector.broadcast %172 : vector<1x8xf32> to vector<22x8xf32>
    %174 = arith.addf %170, %173 : vector<22x8xf32>
    %175 = arith.addf %156, %174 : vector<22x8xf32>
    %c0_65 = arith.constant 0 : index
    %c0_66 = arith.constant 0 : index
    %c0_67 = arith.constant 0 : index
    %176 = vector.load %arg16[%c0_65, %c0_66, %c0_67] : memref<2x1x8xf32, #tpu.memory_space<vmem>>, vector<1x1x8xf32>
    %177 = vector.shape_cast %176 : vector<1x1x8xf32> to vector<1x8xf32>
    %c0_68 = arith.constant 0 : index
    %c0_69 = arith.constant 0 : index
    %c0_70 = arith.constant 0 : index
    %178 = vector.load %arg17[%c0_68, %c0_69, %c0_70] : memref<2x1x8xf32, #tpu.memory_space<vmem>>, vector<1x1x8xf32>
    %179 = vector.shape_cast %178 : vector<1x1x8xf32> to vector<1x8xf32>
    %cst_71 = arith.constant dense<0.000000e+00> : vector<22xf32>
    %180 = vector.multi_reduction <add>, %175, %cst_71 [1] : vector<22x8xf32> to vector<22xf32>
    %181 = vector.shape_cast %180 : vector<22xf32> to vector<22x1xf32>
    %cst_72 = arith.constant 8.000000e+00 : f32
    %182 = vector.broadcast %cst_72 : f32 to vector<22x1xf32>
    %183 = arith.divf %181, %182 : vector<22x1xf32>
    %184 = vector.broadcast %183 : vector<22x1xf32> to vector<22x8xf32>
    %185 = arith.subf %175, %184 : vector<22x8xf32>
    %186 = arith.mulf %185, %185 : vector<22x8xf32>
    %cst_73 = arith.constant dense<0.000000e+00> : vector<22xf32>
    %187 = vector.multi_reduction <add>, %186, %cst_73 [1] : vector<22x8xf32> to vector<22xf32>
    %188 = vector.shape_cast %187 : vector<22xf32> to vector<22x1xf32>
    %cst_74 = arith.constant 8.000000e+00 : f32
    %189 = vector.broadcast %cst_74 : f32 to vector<22x1xf32>
    %190 = arith.divf %188, %189 : vector<22x1xf32>
    %191 = vector.broadcast %183 : vector<22x1xf32> to vector<22x8xf32>
    %192 = arith.subf %175, %191 : vector<22x8xf32>
    %cst_75 = arith.constant 9.99999974E-6 : f32
    %193 = vector.broadcast %cst_75 : f32 to vector<22x1xf32>
    %194 = arith.addf %190, %193 : vector<22x1xf32>
    %195 = math.rsqrt %194 : vector<22x1xf32>
    %196 = vector.broadcast %195 : vector<22x1xf32> to vector<22x8xf32>
    %197 = arith.mulf %192, %196 : vector<22x8xf32>
    %198 = vector.broadcast %177 : vector<1x8xf32> to vector<22x8xf32>
    %199 = arith.mulf %197, %198 : vector<22x8xf32>
    %200 = vector.broadcast %179 : vector<1x8xf32> to vector<22x8xf32>
    %201 = arith.addf %199, %200 : vector<22x8xf32>
    %c1 = arith.constant 1 : index
    %c0_76 = arith.constant 0 : index
    %c0_77 = arith.constant 0 : index
    %202 = vector.load %arg6[%c1, %c0_76, %c0_77] : memref<2x8x24xf32, #tpu.memory_space<vmem>>, vector<1x8x24xf32>
    %203 = vector.shape_cast %202 : vector<1x8x24xf32> to vector<8x24xf32>
    %c1_78 = arith.constant 1 : index
    %c0_79 = arith.constant 0 : index
    %c0_80 = arith.constant 0 : index
    %204 = vector.load %arg7[%c1_78, %c0_79, %c0_80] : memref<2x1x24xf32, #tpu.memory_space<vmem>>, vector<1x1x24xf32>
    %205 = vector.shape_cast %204 : vector<1x1x24xf32> to vector<1x24xf32>
    %c1_81 = arith.constant 1 : index
    %c0_82 = arith.constant 0 : index
    %c0_83 = arith.constant 0 : index
    %206 = vector.load %arg8[%c1_81, %c0_82, %c0_83] : memref<2x8x8xf32, #tpu.memory_space<vmem>>, vector<1x8x8xf32>
    %207 = vector.shape_cast %206 : vector<1x8x8xf32> to vector<8x8xf32>
    %c1_84 = arith.constant 1 : index
    %c0_85 = arith.constant 0 : index
    %c0_86 = arith.constant 0 : index
    %208 = vector.load %arg9[%c1_84, %c0_85, %c0_86] : memref<2x1x8xf32, #tpu.memory_space<vmem>>, vector<1x1x8xf32>
    %209 = vector.shape_cast %208 : vector<1x1x8xf32> to vector<1x8xf32>
    %cst_87 = arith.constant dense<0.000000e+00> : vector<22x24xf32>
    %210 = tpu.matmul %201, %203, %cst_87 {dimension_numbers = #tpu.dot_dimension_numbers<[1], [0], [0], [1], [0, 0, 1, 1], [], []>} : vector<22x8xf32>, vector<8x24xf32>, vector<22x24xf32> -> vector<22x24xf32>
    %211 = vector.broadcast %205 : vector<1x24xf32> to vector<22x24xf32>
    %212 = arith.addf %210, %211 : vector<22x24xf32>
    %213 = vector.extract_strided_slice %212 {offsets = [0, 0], sizes = [22, 8], strides = [1, 1]} : vector<22x24xf32> to vector<22x8xf32>
    %cst_88 = arith.constant 0.707106769 : f32
    %214 = vector.broadcast %cst_88 : f32 to vector<22x8xf32>
    %215 = arith.mulf %213, %214 : vector<22x8xf32>
    %216 = vector.extract_strided_slice %212 {offsets = [0, 8], sizes = [22, 8], strides = [1, 1]} : vector<22x24xf32> to vector<22x8xf32>
    %217 = vector.extract_strided_slice %212 {offsets = [0, 16], sizes = [22, 8], strides = [1, 1]} : vector<22x24xf32> to vector<22x8xf32>
    %218 = vector.extract_strided_slice %215 {offsets = [0, 0], sizes = [22, 2], strides = [1, 1]} : vector<22x8xf32> to vector<22x2xf32>
    %219 = vector.extract_strided_slice %216 {offsets = [0, 0], sizes = [22, 2], strides = [1, 1]} : vector<22x8xf32> to vector<22x2xf32>
    %cst_89 = arith.constant dense<0.000000e+00> : vector<22x22xf32>
    %220 = tpu.matmul %218, %219, %cst_89 {dimension_numbers = #tpu.dot_dimension_numbers<[1], [1], [0], [0], [0, 0, 1, 0], [], []>} : vector<22x2xf32>, vector<22x2xf32>, vector<22x22xf32> -> vector<22x22xf32>
    %221 = arith.addf %220, %8 : vector<22x22xf32>
    %cst_90 = arith.constant dense<0xFF800000> : vector<22xf32>
    %222 = vector.multi_reduction <maximumf>, %221, %cst_90 [1] : vector<22x22xf32> to vector<22xf32>
    %223 = vector.shape_cast %222 : vector<22xf32> to vector<22x1xf32>
    %224 = vector.broadcast %223 : vector<22x1xf32> to vector<22x22xf32>
    %225 = arith.subf %221, %224 : vector<22x22xf32>
    %226 = math.exp %225 : vector<22x22xf32>
    %cst_91 = arith.constant dense<0.000000e+00> : vector<22xf32>
    %227 = vector.multi_reduction <add>, %226, %cst_91 [1] : vector<22x22xf32> to vector<22xf32>
    %228 = vector.shape_cast %227 : vector<22xf32> to vector<22x1xf32>
    %229 = vector.broadcast %228 : vector<22x1xf32> to vector<22x22xf32>
    %230 = arith.divf %226, %229 : vector<22x22xf32>
    %231 = vector.extract_strided_slice %217 {offsets = [0, 0], sizes = [22, 1], strides = [1, 1]} : vector<22x8xf32> to vector<22x1xf32>
    %232 = vector.extract_strided_slice %207 {offsets = [0, 0], sizes = [1, 8], strides = [1, 1]} : vector<8x8xf32> to vector<1x8xf32>
    %233 = vector.broadcast %231 : vector<22x1xf32> to vector<22x8xf32>
    %234 = vector.broadcast %232 : vector<1x8xf32> to vector<22x8xf32>
    %235 = arith.mulf %233, %234 : vector<22x8xf32>
    %236 = vector.extract_strided_slice %217 {offsets = [0, 1], sizes = [22, 1], strides = [1, 1]} : vector<22x8xf32> to vector<22x1xf32>
    %237 = vector.extract_strided_slice %207 {offsets = [1, 0], sizes = [1, 8], strides = [1, 1]} : vector<8x8xf32> to vector<1x8xf32>
    %238 = vector.broadcast %236 : vector<22x1xf32> to vector<22x8xf32>
    %239 = vector.broadcast %237 : vector<1x8xf32> to vector<22x8xf32>
    %240 = arith.mulf %238, %239 : vector<22x8xf32>
    %241 = arith.addf %235, %240 : vector<22x8xf32>
    %cst_92 = arith.constant dense<0.000000e+00> : vector<22x8xf32>
    %242 = tpu.matmul %230, %241, %cst_92 {dimension_numbers = #tpu.dot_dimension_numbers<[1], [0], [0], [1], [0, 0, 1, 1], [], []>} : vector<22x22xf32>, vector<22x8xf32>, vector<22x8xf32> -> vector<22x8xf32>
    %243 = vector.extract_strided_slice %215 {offsets = [0, 2], sizes = [22, 2], strides = [1, 1]} : vector<22x8xf32> to vector<22x2xf32>
    %244 = vector.extract_strided_slice %216 {offsets = [0, 2], sizes = [22, 2], strides = [1, 1]} : vector<22x8xf32> to vector<22x2xf32>
    %cst_93 = arith.constant dense<0.000000e+00> : vector<22x22xf32>
    %245 = tpu.matmul %243, %244, %cst_93 {dimension_numbers = #tpu.dot_dimension_numbers<[1], [1], [0], [0], [0, 0, 1, 0], [], []>} : vector<22x2xf32>, vector<22x2xf32>, vector<22x22xf32> -> vector<22x22xf32>
    %246 = arith.addf %245, %8 : vector<22x22xf32>
    %cst_94 = arith.constant dense<0xFF800000> : vector<22xf32>
    %247 = vector.multi_reduction <maximumf>, %246, %cst_94 [1] : vector<22x22xf32> to vector<22xf32>
    %248 = vector.shape_cast %247 : vector<22xf32> to vector<22x1xf32>
    %249 = vector.broadcast %248 : vector<22x1xf32> to vector<22x22xf32>
    %250 = arith.subf %246, %249 : vector<22x22xf32>
    %251 = math.exp %250 : vector<22x22xf32>
    %cst_95 = arith.constant dense<0.000000e+00> : vector<22xf32>
    %252 = vector.multi_reduction <add>, %251, %cst_95 [1] : vector<22x22xf32> to vector<22xf32>
    %253 = vector.shape_cast %252 : vector<22xf32> to vector<22x1xf32>
    %254 = vector.broadcast %253 : vector<22x1xf32> to vector<22x22xf32>
    %255 = arith.divf %251, %254 : vector<22x22xf32>
    %256 = vector.extract_strided_slice %217 {offsets = [0, 2], sizes = [22, 1], strides = [1, 1]} : vector<22x8xf32> to vector<22x1xf32>
    %257 = vector.extract_strided_slice %207 {offsets = [2, 0], sizes = [1, 8], strides = [1, 1]} : vector<8x8xf32> to vector<1x8xf32>
    %258 = vector.broadcast %256 : vector<22x1xf32> to vector<22x8xf32>
    %259 = vector.broadcast %257 : vector<1x8xf32> to vector<22x8xf32>
    %260 = arith.mulf %258, %259 : vector<22x8xf32>
    %261 = vector.extract_strided_slice %217 {offsets = [0, 3], sizes = [22, 1], strides = [1, 1]} : vector<22x8xf32> to vector<22x1xf32>
    %262 = vector.extract_strided_slice %207 {offsets = [3, 0], sizes = [1, 8], strides = [1, 1]} : vector<8x8xf32> to vector<1x8xf32>
    %263 = vector.broadcast %261 : vector<22x1xf32> to vector<22x8xf32>
    %264 = vector.broadcast %262 : vector<1x8xf32> to vector<22x8xf32>
    %265 = arith.mulf %263, %264 : vector<22x8xf32>
    %266 = arith.addf %260, %265 : vector<22x8xf32>
    %cst_96 = arith.constant dense<0.000000e+00> : vector<22x8xf32>
    %267 = tpu.matmul %255, %266, %cst_96 {dimension_numbers = #tpu.dot_dimension_numbers<[1], [0], [0], [1], [0, 0, 1, 1], [], []>} : vector<22x22xf32>, vector<22x8xf32>, vector<22x8xf32> -> vector<22x8xf32>
    %268 = arith.addf %242, %267 : vector<22x8xf32>
    %269 = vector.extract_strided_slice %215 {offsets = [0, 4], sizes = [22, 2], strides = [1, 1]} : vector<22x8xf32> to vector<22x2xf32>
    %270 = vector.extract_strided_slice %216 {offsets = [0, 4], sizes = [22, 2], strides = [1, 1]} : vector<22x8xf32> to vector<22x2xf32>
    %cst_97 = arith.constant dense<0.000000e+00> : vector<22x22xf32>
    %271 = tpu.matmul %269, %270, %cst_97 {dimension_numbers = #tpu.dot_dimension_numbers<[1], [1], [0], [0], [0, 0, 1, 0], [], []>} : vector<22x2xf32>, vector<22x2xf32>, vector<22x22xf32> -> vector<22x22xf32>
    %272 = arith.addf %271, %8 : vector<22x22xf32>
    %cst_98 = arith.constant dense<0xFF800000> : vector<22xf32>
    %273 = vector.multi_reduction <maximumf>, %272, %cst_98 [1] : vector<22x22xf32> to vector<22xf32>
    %274 = vector.shape_cast %273 : vector<22xf32> to vector<22x1xf32>
    %275 = vector.broadcast %274 : vector<22x1xf32> to vector<22x22xf32>
    %276 = arith.subf %272, %275 : vector<22x22xf32>
    %277 = math.exp %276 : vector<22x22xf32>
    %cst_99 = arith.constant dense<0.000000e+00> : vector<22xf32>
    %278 = vector.multi_reduction <add>, %277, %cst_99 [1] : vector<22x22xf32> to vector<22xf32>
    %279 = vector.shape_cast %278 : vector<22xf32> to vector<22x1xf32>
    %280 = vector.broadcast %279 : vector<22x1xf32> to vector<22x22xf32>
    %281 = arith.divf %277, %280 : vector<22x22xf32>
    %282 = vector.extract_strided_slice %217 {offsets = [0, 4], sizes = [22, 1], strides = [1, 1]} : vector<22x8xf32> to vector<22x1xf32>
    %283 = vector.extract_strided_slice %207 {offsets = [4, 0], sizes = [1, 8], strides = [1, 1]} : vector<8x8xf32> to vector<1x8xf32>
    %284 = vector.broadcast %282 : vector<22x1xf32> to vector<22x8xf32>
    %285 = vector.broadcast %283 : vector<1x8xf32> to vector<22x8xf32>
    %286 = arith.mulf %284, %285 : vector<22x8xf32>
    %287 = vector.extract_strided_slice %217 {offsets = [0, 5], sizes = [22, 1], strides = [1, 1]} : vector<22x8xf32> to vector<22x1xf32>
    %288 = vector.extract_strided_slice %207 {offsets = [5, 0], sizes = [1, 8], strides = [1, 1]} : vector<8x8xf32> to vector<1x8xf32>
    %289 = vector.broadcast %287 : vector<22x1xf32> to vector<22x8xf32>
    %290 = vector.broadcast %288 : vector<1x8xf32> to vector<22x8xf32>
    %291 = arith.mulf %289, %290 : vector<22x8xf32>
    %292 = arith.addf %286, %291 : vector<22x8xf32>
    %cst_100 = arith.constant dense<0.000000e+00> : vector<22x8xf32>
    %293 = tpu.matmul %281, %292, %cst_100 {dimension_numbers = #tpu.dot_dimension_numbers<[1], [0], [0], [1], [0, 0, 1, 1], [], []>} : vector<22x22xf32>, vector<22x8xf32>, vector<22x8xf32> -> vector<22x8xf32>
    %294 = arith.addf %268, %293 : vector<22x8xf32>
    %295 = vector.extract_strided_slice %215 {offsets = [0, 6], sizes = [22, 2], strides = [1, 1]} : vector<22x8xf32> to vector<22x2xf32>
    %296 = vector.extract_strided_slice %216 {offsets = [0, 6], sizes = [22, 2], strides = [1, 1]} : vector<22x8xf32> to vector<22x2xf32>
    %cst_101 = arith.constant dense<0.000000e+00> : vector<22x22xf32>
    %297 = tpu.matmul %295, %296, %cst_101 {dimension_numbers = #tpu.dot_dimension_numbers<[1], [1], [0], [0], [0, 0, 1, 0], [], []>} : vector<22x2xf32>, vector<22x2xf32>, vector<22x22xf32> -> vector<22x22xf32>
    %298 = arith.addf %297, %8 : vector<22x22xf32>
    %cst_102 = arith.constant dense<0xFF800000> : vector<22xf32>
    %299 = vector.multi_reduction <maximumf>, %298, %cst_102 [1] : vector<22x22xf32> to vector<22xf32>
    %300 = vector.shape_cast %299 : vector<22xf32> to vector<22x1xf32>
    %301 = vector.broadcast %300 : vector<22x1xf32> to vector<22x22xf32>
    %302 = arith.subf %298, %301 : vector<22x22xf32>
    %303 = math.exp %302 : vector<22x22xf32>
    %cst_103 = arith.constant dense<0.000000e+00> : vector<22xf32>
    %304 = vector.multi_reduction <add>, %303, %cst_103 [1] : vector<22x22xf32> to vector<22xf32>
    %305 = vector.shape_cast %304 : vector<22xf32> to vector<22x1xf32>
    %306 = vector.broadcast %305 : vector<22x1xf32> to vector<22x22xf32>
    %307 = arith.divf %303, %306 : vector<22x22xf32>
    %308 = vector.extract_strided_slice %217 {offsets = [0, 6], sizes = [22, 1], strides = [1, 1]} : vector<22x8xf32> to vector<22x1xf32>
    %309 = vector.extract_strided_slice %207 {offsets = [6, 0], sizes = [1, 8], strides = [1, 1]} : vector<8x8xf32> to vector<1x8xf32>
    %310 = vector.broadcast %308 : vector<22x1xf32> to vector<22x8xf32>
    %311 = vector.broadcast %309 : vector<1x8xf32> to vector<22x8xf32>
    %312 = arith.mulf %310, %311 : vector<22x8xf32>
    %313 = vector.extract_strided_slice %217 {offsets = [0, 7], sizes = [22, 1], strides = [1, 1]} : vector<22x8xf32> to vector<22x1xf32>
    %314 = vector.extract_strided_slice %207 {offsets = [7, 0], sizes = [1, 8], strides = [1, 1]} : vector<8x8xf32> to vector<1x8xf32>
    %315 = vector.broadcast %313 : vector<22x1xf32> to vector<22x8xf32>
    %316 = vector.broadcast %314 : vector<1x8xf32> to vector<22x8xf32>
    %317 = arith.mulf %315, %316 : vector<22x8xf32>
    %318 = arith.addf %312, %317 : vector<22x8xf32>
    %cst_104 = arith.constant dense<0.000000e+00> : vector<22x8xf32>
    %319 = tpu.matmul %307, %318, %cst_104 {dimension_numbers = #tpu.dot_dimension_numbers<[1], [0], [0], [1], [0, 0, 1, 1], [], []>} : vector<22x22xf32>, vector<22x8xf32>, vector<22x8xf32> -> vector<22x8xf32>
    %320 = arith.addf %294, %319 : vector<22x8xf32>
    %321 = vector.broadcast %209 : vector<1x8xf32> to vector<22x8xf32>
    %322 = arith.addf %320, %321 : vector<22x8xf32>
    %323 = arith.addf %201, %322 : vector<22x8xf32>
    %c1_105 = arith.constant 1 : index
    %c0_106 = arith.constant 0 : index
    %c0_107 = arith.constant 0 : index
    %324 = vector.load %arg10[%c1_105, %c0_106, %c0_107] : memref<2x1x8xf32, #tpu.memory_space<vmem>>, vector<1x1x8xf32>
    %325 = vector.shape_cast %324 : vector<1x1x8xf32> to vector<1x8xf32>
    %c1_108 = arith.constant 1 : index
    %c0_109 = arith.constant 0 : index
    %c0_110 = arith.constant 0 : index
    %326 = vector.load %arg11[%c1_108, %c0_109, %c0_110] : memref<2x1x8xf32, #tpu.memory_space<vmem>>, vector<1x1x8xf32>
    %327 = vector.shape_cast %326 : vector<1x1x8xf32> to vector<1x8xf32>
    %cst_111 = arith.constant dense<0.000000e+00> : vector<22xf32>
    %328 = vector.multi_reduction <add>, %323, %cst_111 [1] : vector<22x8xf32> to vector<22xf32>
    %329 = vector.shape_cast %328 : vector<22xf32> to vector<22x1xf32>
    %cst_112 = arith.constant 8.000000e+00 : f32
    %330 = vector.broadcast %cst_112 : f32 to vector<22x1xf32>
    %331 = arith.divf %329, %330 : vector<22x1xf32>
    %332 = vector.broadcast %331 : vector<22x1xf32> to vector<22x8xf32>
    %333 = arith.subf %323, %332 : vector<22x8xf32>
    %334 = arith.mulf %333, %333 : vector<22x8xf32>
    %cst_113 = arith.constant dense<0.000000e+00> : vector<22xf32>
    %335 = vector.multi_reduction <add>, %334, %cst_113 [1] : vector<22x8xf32> to vector<22xf32>
    %336 = vector.shape_cast %335 : vector<22xf32> to vector<22x1xf32>
    %cst_114 = arith.constant 8.000000e+00 : f32
    %337 = vector.broadcast %cst_114 : f32 to vector<22x1xf32>
    %338 = arith.divf %336, %337 : vector<22x1xf32>
    %339 = vector.broadcast %331 : vector<22x1xf32> to vector<22x8xf32>
    %340 = arith.subf %323, %339 : vector<22x8xf32>
    %cst_115 = arith.constant 9.99999974E-6 : f32
    %341 = vector.broadcast %cst_115 : f32 to vector<22x1xf32>
    %342 = arith.addf %338, %341 : vector<22x1xf32>
    %343 = math.rsqrt %342 : vector<22x1xf32>
    %344 = vector.broadcast %343 : vector<22x1xf32> to vector<22x8xf32>
    %345 = arith.mulf %340, %344 : vector<22x8xf32>
    %346 = vector.broadcast %325 : vector<1x8xf32> to vector<22x8xf32>
    %347 = arith.mulf %345, %346 : vector<22x8xf32>
    %348 = vector.broadcast %327 : vector<1x8xf32> to vector<22x8xf32>
    %349 = arith.addf %347, %348 : vector<22x8xf32>
    %350 = arith.truncf %349 : vector<22x8xf32> to vector<22x8xbf16>
    %c1_116 = arith.constant 1 : index
    %c0_117 = arith.constant 0 : index
    %c0_118 = arith.constant 0 : index
    %351 = vector.load %arg12[%c1_116, %c0_117, %c0_118] : memref<2x8x2048xbf16, #tpu.memory_space<vmem>>, vector<1x8x2048xbf16>
    %352 = vector.shape_cast %351 : vector<1x8x2048xbf16> to vector<8x2048xbf16>
    %cst_119 = arith.constant dense<0.000000e+00> : vector<22x2048xf32>
    %353 = tpu.matmul %350, %352, %cst_119 {dimension_numbers = #tpu.dot_dimension_numbers<[1], [0], [0], [1], [0, 0, 1, 1], [], []>} : vector<22x8xbf16>, vector<8x2048xbf16>, vector<22x2048xf32> -> vector<22x2048xf32>
    %c1_120 = arith.constant 1 : index
    %c0_121 = arith.constant 0 : index
    %c0_122 = arith.constant 0 : index
    %354 = vector.load %arg13[%c1_120, %c0_121, %c0_122] : memref<2x1x2048xf32, #tpu.memory_space<vmem>>, vector<1x1x2048xf32>
    %355 = vector.shape_cast %354 : vector<1x1x2048xf32> to vector<1x2048xf32>
    %356 = vector.broadcast %355 : vector<1x2048xf32> to vector<22x2048xf32>
    %357 = arith.addf %353, %356 : vector<22x2048xf32>
    %cst_123 = arith.constant 0.000000e+00 : f32
    %358 = vector.broadcast %cst_123 : f32 to vector<22x2048xf32>
    %359 = arith.maximumf %357, %358 : vector<22x2048xf32>
    %360 = arith.truncf %359 : vector<22x2048xf32> to vector<22x2048xbf16>
    %c1_124 = arith.constant 1 : index
    %c0_125 = arith.constant 0 : index
    %c0_126 = arith.constant 0 : index
    %361 = vector.load %arg14[%c1_124, %c0_125, %c0_126] : memref<2x8x2048xbf16, #tpu.memory_space<vmem>>, vector<1x8x2048xbf16>
    %362 = vector.shape_cast %361 : vector<1x8x2048xbf16> to vector<8x2048xbf16>
    %cst_127 = arith.constant dense<0.000000e+00> : vector<22x8xf32>
    %363 = tpu.matmul %360, %362, %cst_127 {dimension_numbers = #tpu.dot_dimension_numbers<[1], [1], [0], [0], [0, 0, 1, 0], [], []>} : vector<22x2048xbf16>, vector<8x2048xbf16>, vector<22x8xf32> -> vector<22x8xf32>
    %c1_128 = arith.constant 1 : index
    %c0_129 = arith.constant 0 : index
    %c0_130 = arith.constant 0 : index
    %364 = vector.load %arg15[%c1_128, %c0_129, %c0_130] : memref<2x1x8xf32, #tpu.memory_space<vmem>>, vector<1x1x8xf32>
    %365 = vector.shape_cast %364 : vector<1x1x8xf32> to vector<1x8xf32>
    %366 = vector.broadcast %365 : vector<1x8xf32> to vector<22x8xf32>
    %367 = arith.addf %363, %366 : vector<22x8xf32>
    %368 = arith.addf %349, %367 : vector<22x8xf32>
    %c1_131 = arith.constant 1 : index
    %c0_132 = arith.constant 0 : index
    %c0_133 = arith.constant 0 : index
    %369 = vector.load %arg16[%c1_131, %c0_132, %c0_133] : memref<2x1x8xf32, #tpu.memory_space<vmem>>, vector<1x1x8xf32>
    %370 = vector.shape_cast %369 : vector<1x1x8xf32> to vector<1x8xf32>
    %c1_134 = arith.constant 1 : index
    %c0_135 = arith.constant 0 : index
    %c0_136 = arith.constant 0 : index
    %371 = vector.load %arg17[%c1_134, %c0_135, %c0_136] : memref<2x1x8xf32, #tpu.memory_space<vmem>>, vector<1x1x8xf32>
    %372 = vector.shape_cast %371 : vector<1x1x8xf32> to vector<1x8xf32>
    %cst_137 = arith.constant dense<0.000000e+00> : vector<22xf32>
    %373 = vector.multi_reduction <add>, %368, %cst_137 [1] : vector<22x8xf32> to vector<22xf32>
    %374 = vector.shape_cast %373 : vector<22xf32> to vector<22x1xf32>
    %cst_138 = arith.constant 8.000000e+00 : f32
    %375 = vector.broadcast %cst_138 : f32 to vector<22x1xf32>
    %376 = arith.divf %374, %375 : vector<22x1xf32>
    %377 = vector.broadcast %376 : vector<22x1xf32> to vector<22x8xf32>
    %378 = arith.subf %368, %377 : vector<22x8xf32>
    %379 = arith.mulf %378, %378 : vector<22x8xf32>
    %cst_139 = arith.constant dense<0.000000e+00> : vector<22xf32>
    %380 = vector.multi_reduction <add>, %379, %cst_139 [1] : vector<22x8xf32> to vector<22xf32>
    %381 = vector.shape_cast %380 : vector<22xf32> to vector<22x1xf32>
    %cst_140 = arith.constant 8.000000e+00 : f32
    %382 = vector.broadcast %cst_140 : f32 to vector<22x1xf32>
    %383 = arith.divf %381, %382 : vector<22x1xf32>
    %384 = vector.broadcast %376 : vector<22x1xf32> to vector<22x8xf32>
    %385 = arith.subf %368, %384 : vector<22x8xf32>
    %cst_141 = arith.constant 9.99999974E-6 : f32
    %386 = vector.broadcast %cst_141 : f32 to vector<22x1xf32>
    %387 = arith.addf %383, %386 : vector<22x1xf32>
    %388 = math.rsqrt %387 : vector<22x1xf32>
    %389 = vector.broadcast %388 : vector<22x1xf32> to vector<22x8xf32>
    %390 = arith.mulf %385, %389 : vector<22x8xf32>
    %391 = vector.broadcast %370 : vector<1x8xf32> to vector<22x8xf32>
    %392 = arith.mulf %390, %391 : vector<22x8xf32>
    %393 = vector.broadcast %372 : vector<1x8xf32> to vector<22x8xf32>
    %394 = arith.addf %392, %393 : vector<22x8xf32>
    %cst_142 = arith.constant dense<0.000000e+00> : vector<22xf32>
    %395 = vector.multi_reduction <add>, %394, %cst_142 [1] : vector<22x8xf32> to vector<22xf32>
    %396 = vector.shape_cast %395 : vector<22xf32> to vector<22x1xf32>
    %c0_143 = arith.constant 0 : index
    %c0_144 = arith.constant 0 : index
    %397 = vector.load %arg3[%c0_143, %c0_144] : memref<2x22xf32, #tpu.memory_space<vmem>>, vector<2x22xf32>
    %c0_145 = arith.constant 0 : index
    %c0_146 = arith.constant 0 : index
    %398 = vector.load %arg18[%c0_145, %c0_146] : memref<22x32xf32, #tpu.memory_space<vmem>>, vector<22x32xf32>
    %399 = vector.broadcast %396 : vector<22x1xf32> to vector<22x32xf32>
    %400 = arith.mulf %399, %398 : vector<22x32xf32>
    %cst_147 = arith.constant dense<0.000000e+00> : vector<2x32xf32>
    %401 = tpu.matmul %397, %400, %cst_147 {dimension_numbers = #tpu.dot_dimension_numbers<[1], [0], [0], [1], [0, 0, 1, 1], [], []>} : vector<2x22xf32>, vector<22x32xf32>, vector<2x32xf32> -> vector<2x32xf32>
    %c0_148 = arith.constant 0 : index
    %c0_149 = arith.constant 0 : index
    %402 = vector.load %arg19[%c0_148, %c0_149] : memref<1x32xf32, #tpu.memory_space<vmem>>, vector<1x32xf32>
    %403 = vector.broadcast %402 : vector<1x32xf32> to vector<2x32xf32>
    %404 = arith.addf %401, %403 : vector<2x32xf32>
    %cst_150 = arith.constant 0.000000e+00 : f32
    %405 = vector.broadcast %cst_150 : f32 to vector<2x32xf32>
    %406 = arith.maximumf %404, %405 : vector<2x32xf32>
    %c0_151 = arith.constant 0 : index
    %c0_152 = arith.constant 0 : index
    %407 = vector.load %arg20[%c0_151, %c0_152] : memref<32x32xf32, #tpu.memory_space<vmem>>, vector<32x32xf32>
    %cst_153 = arith.constant dense<0.000000e+00> : vector<2x32xf32>
    %408 = tpu.matmul %406, %407, %cst_153 {dimension_numbers = #tpu.dot_dimension_numbers<[1], [0], [0], [1], [0, 0, 1, 1], [], []>} : vector<2x32xf32>, vector<32x32xf32>, vector<2x32xf32> -> vector<2x32xf32>
    %c0_154 = arith.constant 0 : index
    %c0_155 = arith.constant 0 : index
    %409 = vector.load %arg21[%c0_154, %c0_155] : memref<1x32xf32, #tpu.memory_space<vmem>>, vector<1x32xf32>
    %410 = vector.broadcast %409 : vector<1x32xf32> to vector<2x32xf32>
    %411 = arith.addf %408, %410 : vector<2x32xf32>
    %cst_156 = arith.constant 0.000000e+00 : f32
    %412 = vector.broadcast %cst_156 : f32 to vector<2x32xf32>
    %413 = arith.maximumf %411, %412 : vector<2x32xf32>
    %c0_157 = arith.constant 0 : index
    %c0_158 = arith.constant 0 : index
    %414 = vector.load %arg22[%c0_157, %c0_158] : memref<32x1xf32, #tpu.memory_space<vmem>>, vector<32x1xf32>
    %cst_159 = arith.constant dense<0.000000e+00> : vector<2x1xf32>
    %415 = tpu.matmul %413, %414, %cst_159 {dimension_numbers = #tpu.dot_dimension_numbers<[1], [0], [0], [1], [0, 0, 1, 1], [], []>} : vector<2x32xf32>, vector<32x1xf32>, vector<2x1xf32> -> vector<2x1xf32>
    %c0_160 = arith.constant 0 : index
    %c0_161 = arith.constant 0 : index
    %416 = vector.load %arg23[%c0_160, %c0_161] : memref<1x1xf32, #tpu.memory_space<vmem>>, vector<1x1xf32>
    %417 = vector.broadcast %416 : vector<1x1xf32> to vector<2x1xf32>
    %418 = arith.addf %415, %417 : vector<2x1xf32>
    %cst_162 = arith.constant 0.000000e+00 : f32
    %419 = vector.broadcast %cst_162 : f32 to vector<2x1xf32>
    %420 = arith.subf %419, %418 : vector<2x1xf32>
    %421 = math.exp %420 : vector<2x1xf32>
    %cst_163 = arith.constant 1.000000e+00 : f32
    %422 = vector.broadcast %cst_163 : f32 to vector<2x1xf32>
    %423 = arith.addf %422, %421 : vector<2x1xf32>
    %cst_164 = arith.constant 1.000000e+00 : f32
    %424 = vector.broadcast %cst_164 : f32 to vector<2x1xf32>
    %425 = arith.divf %424, %423 : vector<2x1xf32>
    %c0_165 = arith.constant 0 : index
    %c0_166 = arith.constant 0 : index
    %426 = vector.load %arg24[%c0_165, %c0_166] : memref<2x1xf32, #tpu.memory_space<vmem>>, vector<2x1xf32>
    tpu.vector_store %arg24[%c0_165, %c0_166], %425 {strides = array<i32>} : memref<2x1xf32, #tpu.memory_space<vmem>>, vector<2x1xf32>,
    return
  }
}

</mosaic_0001>

<bundles_post_ra>
// kernel: eq.15
= control target key start
LH: loop header
LB: loop body
LE: loop exit
PB: predicated region body
PF: predicated region fallthrough
CT: control target
= control target key end

     0   :  { %vm7_vm0 = vcmask 89088   ;;  %vm13_vm1 = vcmask 179288   ;;  %s39_s0 = inlined_call_operand.vmem [shape: s32[2,11], index: 0, kind: input, shape index: {}]   ;;  %s40_s1 = inlined_call_operand.vmem [shape: s32[22], index: 1, kind: output, shape index: {}]  }
   0x1   :  { %v4_v0 = vld [vmem:[%s39_s0] sm:$0x3]  ;;  %s22_s0 = smov 11  }
   0x2   :  { %5 = vst [vmem:[#allocation1] sm:$0x3] %v4_v0 }
   0x9   :  { %v10_v1 = vld [vmem:[#allocation1 + $0x1] sm:$0x1]   ;;  %v6_v2 = vld [vmem:[#allocation1] sm:$0x1]  }
   0xa   :  { %11 = vrot.lane.b32.xlu0 %v10_v1, %s22_s0  ;;  %8 = vst.msk [vmem:[#allocation0] sm:$0x1] %vm7_vm0, %v6_v2  }
  0x7c   :  { %v12_v3 = vpop.permute.xlu0 %11  }
  0x7d   :  { %14 = vst.msk [vmem:[#allocation0] sm:$0x1] %vm13_vm1, %v12_v3  }
  0x84   :  { %v17_v4 = vld [vmem:[#allocation0] sm:$0x1] }
  0x85   :  { %20 = vst [vmem:[%s40_s1] sm:$0x1] %v17_v4 }

// kernel: tile.14
= control target key start
LH: loop header
LB: loop body
LE: loop exit
PB: predicated region body
PF: predicated region fallthrough
CT: control target
= control target key end

     0   :  { %vm36_vm0 = vcmask 1047556   ;;  %vm38_vm1 = vcmask 89088   ;;  %vm48_vm2 = vcmask 179288   ;;  %s99_s0 = inlined_call_operand.vmem [shape: f32[2,11,8], index: 0, kind: input, shape index: {}]   ;;  %s100_s1 = inlined_call_operand.vmem [shape: f32[22,8], index: 1, kind: output, shape index: {}]  }
   0x1   :  { %v50_v0 = vld [vmem:[%s99_s0 + $0xe] sm:$0x3]  ;;  %v51_v1 = vld [vmem:[%s99_s0 + $0xc] sm:$0x3]  ;;  %v52_v2 = vld [vmem:[%s99_s0 + $0xa] sm:$0x3] }
   0x2   :  { %7 = vst [vmem:[#allocation0 + $0x38] sm:$0x3] %v50_v0  ;;  %v53_v3 = vld [vmem:[%s99_s0 + $0x8] sm:$0x3]  ;;  %v54_v4 = vld [vmem:[%s99_s0 + $0x6] sm:$0x3] }
   0x3   :  { %11 = vst [vmem:[#allocation0 + $0x30] sm:$0x3] %v51_v1  ;;  %v55_v5 = vld [vmem:[%s99_s0 + $0x4] sm:$0x3]  ;;  %v56_v6 = vld [vmem:[%s99_s0 + $0x2] sm:$0x3] }
   0x4   :  { %15 = vst [vmem:[#allocation0 + $0x28] sm:$0x3] %v52_v2  ;;  %v32_v7 = vld [vmem:[%s99_s0] sm:$0x3]  ;;  %s58_s0 = smov 11  }
   0x5   :  { %19 = vst [vmem:[#allocation0 + $0x20] sm:$0x3] %v53_v3 }
   0x6   :  { %23 = vst [vmem:[#allocation0 + $0x18] sm:$0x3] %v54_v4 }
   0x7   :  { %27 = vst [vmem:[#allocation0 + $0x10] sm:$0x3] %v55_v5 }
   0x8   :  { %31 = vst [vmem:[#allocation0 + $0x8] sm:$0x3] %v56_v6 }
   0x9   :  { %33 = vst [vmem:[#allocation0] sm:$0x3] %v32_v7 }
   0xc   :  { %v35_v8 = vld [vmem:[#allocation0] ss:$8 sm:$0xf0]   ;;  %v43_v9 = vld [vmem:[#allocation0 + $0x1] ss:$8 sm:$0xf0]  }
  0x10   :  { %v34_v10 = vld [vmem:[#allocation0] ss:$8 sm:$0xf]   ;;  %v41_v11 = vld [vmem:[#allocation0 + $0x1] ss:$8 sm:$0xf]  }
  0x11   :  { %v37_v12 = vsel %vm36_vm0, %v35_v8, %v34_v10  ;;  %v45_v13 = vsel %vm36_vm0, %v43_v9, %v41_v11 }
  0x12   :  { %46 = vrot.lane.b32.xlu0 %v45_v13, %s58_s0  ;;  %39 = vst.msk [vmem:[%s100_s1] sm:$0xff] %vm38_vm1, %v37_v12  }
  0x84   :  { %v47_v14 = vpop.permute.xlu0 %46  }
  0x85   :  { %49 = vst.msk [vmem:[%s100_s1] sm:$0xff] %vm48_vm2, %v47_v14  }

// kernel: tile.19
= control target key start
LH: loop header
LB: loop body
LE: loop exit
PB: predicated region body
PF: predicated region fallthrough
CT: control target
= control target key end

     0   :  { %vm3_vm0 = vcmask 261120   ;;  %s60_s0 = inlined_call_operand.vmem [shape: f32[2,11,32], index: 0, kind: input, shape index: {}]   ;;  %s61_s1 = inlined_call_operand.vmem [shape: f32[22,32], index: 1, kind: output, shape index: {}]  }
   0x1   :  { %v2_v0 = vld [vmem:[%s60_s0] sm:$0xff]   ;;  %v20_v1 = vld [vmem:[%s60_s0 + $0x8] sm:$0x7]   ;;  %v22_v2 = vld [vmem:[%s60_s0 + $0x10] sm:$0xff]  }
   0x2   :  { %4 = vst.msk [vmem:[%s61_s1] sm:$0xff] %vm3_vm0, %v2_v0   ;;  %v24_v3 = vld [vmem:[%s60_s0 + $0x18] sm:$0x7]  }
   0x3   :  { %21 = vst.msk [vmem:[%s61_s1 + $0x8] sm:$0x7] %vm3_vm0, %v20_v1  }
   0x4   :  { %23 = vst.msk [vmem:[%s61_s1 + $0xb] sm:$0xff] %vm3_vm0, %v22_v2  }
   0x5   :  { %25 = vst.msk [vmem:[%s61_s1 + $0x13] sm:$0x7] %vm3_vm0, %v24_v3  }

// kernel: ps_estimation_forward.1
= control target key start
LH: loop header
LB: loop body
LE: loop exit
PB: predicated region body
PF: predicated region fallthrough
CT: control target
= control target key end

     0   :  { %vm98_vm0 = vcmask 1043456   ;;  %vm88_vm1 = vcmask 31744   ;;  %vm144_vm2 = vcmask 64512   ;;  %v4425_v18 = vmov 19   ;;  %s4426_s25 = smov 118   ;;  %s4431_s26 = smov 114   ;;  %s5834_s4 = inlined_call_operand.vmem [shape: f32[4,8], index: 4, kind: input, shape index: {}]   ;;  %s5835_s0 = inlined_call_operand.vmem [shape: f32[22,4], index: 0, kind: input, shape index: {}]   ;;  %s5836_s5 = inlined_call_operand.vmem [shape: f32[1,8], index: 5, kind: input, shape index: {}]   ;;  %s5837_s7 = inlined_call_operand.vmem [shape: f32[2,1,24], index: 7, kind: input, shape index: {}]   ;;  %s5838_s6 = inlined_call_operand.vmem [shape: f32[2,8,24], index: 6, kind: input, shape index: {}]   ;;  %s5839_s1 = inlined_call_operand.vmem [shape: f32[22,8], index: 1, kind: input, shape index: {}]   ;;  %s5840_s2 = inlined_call_operand.vmem [shape: f32[22,22], index: 2, kind: input, shape index: {}]   ;;  %s5841_s8 = inlined_call_operand.vmem [shape: f32[2,8,8], index: 8, kind: input, shape index: {}]   ;;  %s5842_s9 = inlined_call_operand.vmem [shape: f32[2,1,8], index: 9, kind: input, shape index: {}]   ;;  %s5843_s10 = inlined_call_operand.vmem [shape: f32[2,1,8], index: 10, kind: input, shape index: {}]   ;;  %s5844_s11 = inlined_call_operand.vmem [shape: f32[2,1,8], index: 11, kind: input, shape index: {}]   ;;  %s5845_s12 = inlined_call_operand.vmem [shape: bf16[2,8,2048], index: 12, kind: input, shape index: {}]   ;;  %s5846_s14 = inlined_call_operand.vmem [shape: bf16[2,8,2048], index: 14, kind: input, shape index: {}]   ;;  %s5847_s13 = inlined_call_operand.vmem [shape: f32[2,1,2048], index: 13, kind: input, shape index: {}]   ;;  %s5848_s15 = inlined_call_operand.vmem [shape: f32[2,1,8], index: 15, kind: input, shape index: {}]   ;;  %s5849_s16 = inlined_call_operand.vmem [shape: f32[2,1,8], index: 16, kind: input, shape index: {}]   ;;  %s5850_s17 = inlined_call_operand.vmem [shape: f32[2,1,8], index: 17, kind: input, shape index: {}]   ;;  %s5851_s19 = inlined_call_operand.vmem [shape: f32[1,32], index: 19, kind: input, shape index: {}]   ;;  %s5852_s18 = inlined_call_operand.vmem [shape: f32[22,32], index: 18, kind: input, shape index: {}]   ;;  %s5853_s3 = inlined_call_operand.vmem [shape: f32[2,22], index: 3, kind: input, shape index: {}]   ;;  %s5854_s20 = inlined_call_operand.vmem [shape: f32[32,32], index: 20, kind: input, shape index: {}]   ;;  %s5855_s21 = inlined_call_operand.vmem [shape: f32[1,32], index: 21, kind: input, shape index: {}]   ;;  %s5856_s22 = inlined_call_operand.vmem [shape: f32[32,1], index: 22, kind: input, shape index: {}]   ;;  %s5857_s23 = inlined_call_operand.<no memory space> [shape: f32[1,1], index: 23, kind: input, shape index: {}]   ;;  %s5858_s24 = inlined_call_operand.vmem [shape: f32[2,1], index: 24, kind: output, shape index: {}]  }
   0x1   :  { %5872 = sst [smem:[#allocation3_spill]] %s5834_s4  ;;  %4237 = vset.pattern.permute.xlu1 %v4425_v18  ;;  %v4427_v22 = vmov 18   ;;  %vm192_vm3 = vcmask 15360   ;;  %vm234_vm4 = vcmask 179200   ;;  %vm241_vm5 = vcmask 177152   ;;  %s5866_s30 = smov 124  }
   0x2   :  { %5873 = sst [smem:[#allocation4_spill]] %s5835_s0  ;;  %4240 = vset.pattern.permute.xlu2 %v4427_v22  ;;  %4236 = vset.pattern.permute.xlu0 %v4427_v22  ;;  %s4429_s0 = smov 120   ;;  %vm509_vm6 = vcmask 1045504  }
   0x3   :  { %5874 = sst [smem:[#allocation5_spill]] %s5836_s5 }
   0x4   :  { %5875 = sst [smem:[#allocation6_spill]] %s5837_s7 }
   0x5   :  { %5876 = sst [smem:[#allocation7_spill]] %s5838_s6  ;;  %s4428_s6 = smov 126  }
   0x6   :  { %5877 = sst [smem:[#allocation8_spill]] %s5839_s1 }
   0x7   :  { %5878 = sst [smem:[#allocation9_spill]] %s5840_s2 }
   0x8   :  { %5879 = sst [smem:[#allocation10_spill]] %s5841_s8  ;;  %s5892_s8 = smov 124  }
   0x9   :  { %5880 = sst [smem:[#allocation11_spill]] %s5842_s9 }
   0xa   :  { %s5881_s27 = sld [smem:[#allocation3_spill]] }
   0xb   :  { %s5882_s5 = sld [smem:[#allocation4_spill]] }
   0xc   :  { %s5883_s9 = sld [smem:[#allocation7_spill]] }
   0xd   :  { %s5884_s1 = sld [smem:[#allocation5_spill]] }
   0xe   :  { %s5885_s28 = sld [smem:[#allocation8_spill]] }
   0xf   :  { %s5886_s7 = sld [smem:[#allocation6_spill]] }
  0x10   :  { %v83_v0 = vld [vmem:[%s5881_s27] sm:$0xf]  ;;  %s5887_s2 = sld [smem:[#allocation9_spill]]  ;;  %s5870_s27 = smov 122  }
  0x11   :  { %v80_v1 = vld [vmem:[%s5882_s5] sm:$0xff]  ;;  %4032 = vmatpush.msk.msra.mxu0 %vm98_vm0, %v83_v0  ;;  %v81_v2 = vld [vmem:[%s5882_s5 + $0x8] sm:$0xff]  ;;  %v82_v3 = vld [vmem:[%s5882_s5 + $0x10] sm:$0x3f]  ;;  %s5888_s29 = sld [smem:[#allocation10_spill]] }
  0x12   :  { %4033 = vmatmul.msk.f32.vlgmr.msra.gmra.mxu0 %vm88_vm1, %v80_v1  ;;  %v137_v4 = vld [vmem:[%s5883_s9] sm:$0xff] }
  0x13   :  { %169 = vmatpush.msra.mxu1 %v137_v4  ;;  %v4278_v5 = vld [vmem:[%s5884_s1] ss:$0 sm:$0xff]  ;;  %s5868_s1 = smov 116  }
  0x14   :  { %v128_v7 = vld [vmem:[%s5885_s28] sm:$0xff]  ;;  %v129_v11 = vld [vmem:[%s5885_s28 + $0x8] sm:$0xff]  ;;  %v130_v15 = vld [vmem:[%s5885_s28 + $0x10] sm:$0x3f]  ;;  %s5889_s28 = sld [smem:[#allocation11_spill]] }
  0x15   :  { %v4279_v19 = vld [vmem:[%s5886_s7] ss:$0 sm:$0xff] }
  0x16   :  { %v4685_v43 = vld [vmem:[%s5887_s2] sm:$0xff]  ;;  %v4692_v47 = vld [vmem:[%s5887_s2 + $0x8] sm:$0xff]  ;;  %v4699_v51 = vld [vmem:[%s5887_s2 + $0x10] sm:$0x3f] }
  0x1a   :  { %4034 = vmatmul.msk.f32.gmra.mxu0 %vm88_vm1, %v81_v2 }
  0x22   :  { %4035 = vmatmul.msk.f32.gmra.mxu0 %vm88_vm1, %v82_v3 }
  0x8f   :  { %v119_v6 = vpop.f32.mrf.mxu0 }
  0x90   :  { %v120_v8 = vadd.f32 %v4278_v5, %v119_v6 }
  0x92   :  { %v4588_v9 = vadd.f32 %v128_v7, %v120_v8  ;;  %v4739_v8 = vld [vmem:[%s5888_s29] sm:$0xff] }
  0x94   :  { %4036 = vmatmul.msk.f32.vlgmr.msra.gmra.mxu1 %vm144_vm2, %v4588_v9 }
  0x97   :  { %v122_v10 = vpop.f32.mrf.mxu0 }
  0x98   :  { %v123_v12 = vadd.f32 %v4278_v5, %v122_v10  ;;  %v493_v10 = vperm.slane %v4739_v8, 3 }
  0x9a   :  { %v4595_v13 = vadd.f32 %v129_v11, %v123_v12 }
  0x9c   :  { %4037 = vmatmul.msk.f32.gmra.mxu1 %vm144_vm2, %v4595_v13 }
  0x9f   :  { %v125_v14 = vpop.f32.mrf.mxu0 }
  0xa0   :  { %v126_v16 = vadd.f32 %v4278_v5, %v125_v14  ;;  %v477_v14 = vperm.slane %v4739_v8, 2 }
  0xa2   :  { %v4602_v17 = vadd.f32 %v130_v15, %v126_v16 }
  0xa4   :  { %4038 = vmatmul.msk.f32.gmra.mxu1 %vm144_vm2, %v4602_v17 }
 0x111   :  { %v171_v20 = vpop.f32.mrf.mxu1 }
 0x112   :  { %v4610_v21 = vadd.f32 %v4279_v19, %v171_v20 }
 0x114   :  { %349 = vrot.lane.b32.xlu1 %v4610_v21, %s4426_s25  ;;  %v4619_v25 = vmul.f32 0.70710677, %v4610_v21 }
 0x119   :  { %v174_v23 = vpop.f32.mrf.mxu1 }
 0x11a   :  { %v4616_v24 = vadd.f32 %v4279_v19, %v174_v23 }
 0x11c   :  { %343 = vrot.lane.b32.xlu1 %v4619_v25, %s4428_s6  ;;  %v4624_v26 = vmul.f32 0.70710677, %v4616_v24 }
 0x11e   :  { %345 = vrot.lane.b32.xlu2 %v4624_v26, %s4428_s6 }
 0x121   :  { %v177_v27 = vpop.f32.mrf.mxu1 }
 0x122   :  { %v4628_v28 = vadd.f32 %v4279_v19, %v177_v27 }
 0x124   :  { %353 = vrot.lane.b32.xlu0 %v4628_v28, %s4426_s25  ;;  %188 = vrot.lane.b32.xlu1 %v4616_v24, %s4429_s0  ;;  %v4635_v29 = vmul.f32 0.70710677, %v4628_v28 }
 0x126   :  { %347 = vrot.lane.b32.xlu2 %v4635_v29, %s4428_s6 }
 0x12c   :  { %351 = vrot.lane.b32.xlu0 %v4616_v24, %s4426_s25  ;;  %490 = vperm.xlu1 %4237, %v4628_v28  }
 0x12e   :  { %186 = vrot.lane.b32.xlu2 %v4610_v21, %s4429_s0 }
 0x134   :  { %190 = vrot.lane.b32.xlu0 %v4628_v28, %s4429_s0  ;;  %4238 = vset.pattern.permute.xlu1 %v4427_v22 }
 0x135   :  { %470 = vperm.xlu1 %4238, %v4616_v24  }
 0x136   :  { %466 = vperm.xlu2 %4240, %v4610_v21  }
 0x13d   :  { %4241 = vset.pattern.permute.xlu1 %v4425_v18 }
 0x13e   :  { %482 = vperm.xlu1 %4241, %v4610_v21  }
 0x146   :  { %587 = vrot.lane.b32.xlu1 %v4628_v28, %s5868_s1 }
 0x14e   :  { %583 = vrot.lane.b32.xlu1 %v4610_v21, %s5868_s1 }
 0x156   :  { %785 = vrot.lane.b32.xlu1 %v4628_v28, %s4431_s26 }
 0x178   :  { %v346_v34 = vpop.permute.xlu2 %345 }
 0x180   :  { %v348_v37 = vpop.permute.xlu2 %347 }
 0x186   :  { %v350_v30 = vpop.permute.xlu1 %349 }
 0x188   :  { %v187_v40 = vpop.permute.xlu2 %186 }
 0x18e   :  { %v344_v31 = vpop.permute.xlu1 %343 }
 0x190   :  { %v467_v2 = vpop.permute.xlu2 %466 }
 0x196   :  { %v354_v32 = vpop.permute.xlu0 %353  ;;  %v189_v33 = vpop.permute.xlu1 %188 }
 0x197   :  { %4045 = vmatpush.xpose.msk.msra.mxu3 %vm192_vm3, %v354_v32 }
 0x19e   :  { %v352_v35 = vpop.permute.xlu0 %351  ;;  %v4658_v36 = vpop.permute.xlu1 %490 }
 0x19f   :  { %4046 = vmatpush.xpose.msk.msra.mxu3 %vm192_vm3, %v352_v35  ;;  %v496_v20 = vmul.f32 %v493_v10, %v4658_v36  ;;  %v478_v35 = vmul.f32 %v477_v14, %v467_v2 }
 0x1a3   :  { %4047 = vmatpush.xpose.msk.msra.mxu3 %vm192_vm3, %v350_v30 }
 0x1a6   :  { %v191_v38 = vpop.permute.xlu0 %190  ;;  %4048 = vmatmul.msk.f32.vlgmr.msra.gmra.mxu3 %vm192_vm3, %v344_v31 }
 0x1a7   :  { %4039 = vmatpush.xpose.msk.msrb.mxu1 %vm192_vm3, %v191_v38  ;;  %4217 = vmatpush.xpose.msk.msra.mxu2 %vm192_vm3, %v191_v38  ;;  %v4665_v39 = vpop.permute.xlu1 %470 }
 0x1a8   :  { %v479_v32 = vmul.f32 %v477_v14, %v4665_v39 }
 0x1ab   :  { %4040 = vmatpush.xpose.msk.msrb.mxu1 %vm192_vm3, %v189_v33  ;;  %4218 = vmatpush.xpose.msk.msra.mxu2 %vm192_vm3, %v189_v33 }
 0x1ae   :  { %4049 = vmatmul.msk.f32.gmra.mxu3 %vm192_vm3, %v346_v34 }
 0x1af   :  { %4041 = vmatpush.xpose.msk.msrb.mxu1 %vm192_vm3, %v187_v40  ;;  %4219 = vmatpush.xpose.msk.msra.mxu2 %vm192_vm3, %v187_v40 }
 0x1b0   :  { %v4672_v41 = vpop.permute.xlu1 %482 }
 0x1b1   :  { %v494_v33 = vmul.f32 %v493_v10, %v4672_v41 }
 0x1b2   :  { %4042 = vmatmul.msk.f32.vlgmr.msrb.gmra.mxu1 %vm192_vm3, %v4619_v25  ;;  %4043 = vmatmul.msk.f32.vlgmr.msra.gmra.mxu2 %vm192_vm3, %v4624_v26 }
 0x1b6   :  { %4050 = vmatmul.msk.f32.gmra.mxu3 %vm192_vm3, %v348_v37  ;;  %v497_v37 = vadd.f32 %v494_v33, %v478_v35 }
 0x1b8   :  { %v588_v42 = vpop.permute.xlu1 %587 }
 0x1b9   :  { %4059 = vmatpush.xpose.msk.msrb.mxu2 %vm192_vm3, %v588_v42 }
 0x1ba   :  { %4044 = vmatmul.msk.f32.gmra.mxu2 %vm192_vm3, %v4635_v29 }
 0x1c0   :  { %v584_v59 = vpop.permute.xlu1 %583 }
 0x1c8   :  { %v786_v62 = vpop.permute.xlu1 %785 }
 0x229   :  { %v384_v44 = vpop.f32.mrf.mxu3 }
 0x22a   :  { %v385_v45 = vadd.f32 %v384_v44, %v4685_v43  ;;  %v4434_v44 = vmov 16  }
 0x22b   :  { %4242 = vset.pattern.permute.xlu2 %v4434_v44 }
 0x22c   :  { %v393_v46 = vsel %vm234_vm4, %v385_v45, -inf }
 0x22d   :  { %394 = vmax.xlane.f32.xlu0 %v393_v46  ;;  %v4435_v46 = vmov 17  }
 0x22e   :  { %4243 = vset.pattern.permute.xlu1 %v4435_v46 }
 0x22f   :  { %v225_v58 = vpop.f32.mrf.mxu1 }
 0x230   :  { %v4728_v60 = vadd.f32 %v225_v58, %v4685_v43 }
 0x231   :  { %v387_v48 = vpop.f32.mrf.mxu3 }
 0x232   :  { %v388_v49 = vadd.f32 %v387_v48, %v4692_v47  ;;  %v235_v61 = vsel %vm234_vm4, %v4728_v60, -inf }
 0x234   :  { %v396_v50 = vsel %vm234_vm4, %v388_v49, -inf }
 0x235   :  { %397 = vmax.xlane.f32.xlu1 %v396_v50  ;;  %v228_v55 = vpop.f32.mrf.mxu2 }
 0x236   :  { %v4723_v56 = vadd.f32 %v228_v55, %v4692_v47 }
 0x238   :  { %v238_v57 = vsel %vm234_vm4, %v4723_v56, -inf }
 0x239   :  { %v390_v52 = vpop.f32.mrf.mxu3 }
 0x23a   :  { %v391_v53 = vadd.f32 %v390_v52, %v4699_v51 }
 0x23c   :  { %v399_v54 = vsel %vm241_vm5, %v391_v53, -inf }
 0x23d   :  { %400 = vmax.xlane.f32.xlu2 %v399_v54 }
 0x241   :  { %474 = vperm.xlu0 %4236, %v4628_v28  }
 0x249   :  { %4239 = vset.pattern.permute.xlu0 %v4425_v18 }
 0x24a   :  { %486 = vperm.xlu0 %4239, %v4616_v24  }
 0x24e   :  { %579 = vrot.lane.b32.xlu1 %v4624_v26, %s5866_s30 }
 0x252   :  { %585 = vrot.lane.b32.xlu0 %v4616_v24, %s5868_s1 }
 0x253   :  { %4244 = vset.pattern.permute.xlu0 %v4434_v44 }
 0x256   :  { %775 = vrot.lane.b32.xlu1 %v4619_v25, %s5870_s27 }
 0x25a   :  { %577 = vrot.lane.b32.xlu0 %v4619_v25, %s5866_s30 }
 0x25e   :  { %779 = vrot.lane.b32.xlu1 %v4635_v29, %s5870_s27 }
 0x262   :  { %783 = vrot.lane.b32.xlu0 %v4616_v24, %s4431_s26 }
 0x26a   :  { %781 = vrot.lane.b32.xlu0 %v4610_v21, %s4431_s26 }
 0x272   :  { %777 = vrot.lane.b32.xlu0 %v4624_v26, %s5870_s27 }
 0x288   :  { %239 = vmax.xlane.f32.xlu1 %v238_v57 }
 0x29c   :  { %236 = vmax.xlane.f32.xlu0 %v235_v61 }
 0x2a0   :  { %v395_v63 = vpop.xlane.xlu0 %394 }
 0x2a1   :  { %v402_v0 = vsub.f32 %v385_v45, %v395_v63  ;;  %v231_v45 = vpop.f32.mrf.mxu2  ;;  %v4436_v63 = vmov 20  }
 0x2a2   :  { %v4768_v48 = vadd.f32 %v231_v45, %v4699_v51 }
 0x2a3   :  { %v405_v1 = vmul.f32 1.442695, %v402_v0 }
 0x2a5   :  { %4296 = vpow2.f32 %v405_v1 }
 0x2a8   :  { %v398_v3 = vpop.xlane.xlu1 %397 }
 0x2a9   :  { %v403_v4 = vsub.f32 %v388_v49, %v398_v3 }
 0x2ab   :  { %v4732_v5 = vpop.eup %4296  ;;  %v407_v6 = vmul.f32 1.442695, %v403_v4 }
 0x2ac   :  { %v411_v7 = vsel %vm234_vm4, %v4732_v5, 0.0 }
 0x2ad   :  { %4298 = vpow2.f32 %v407_v6  ;;  %412 = vadd.xlane.f32.xlu2 %v411_v7 }
 0x2b0   :  { %v401_v11 = vpop.xlane.xlu2 %400 }
 0x2b1   :  { %v404_v12 = vsub.f32 %v391_v53, %v401_v11 }
 0x2b3   :  { %v4743_v15 = vpop.eup %4298  ;;  %v409_v16 = vmul.f32 1.442695, %v404_v12  ;;  %v475_v19 = vpop.permute.xlu0 %474 }
 0x2b4   :  { %v480_v23 = vmul.f32 %v477_v14, %v475_v19  ;;  %v414_v25 = vsel %vm234_vm4, %v4743_v15, 0.0 }
 0x2b5   :  { %4300 = vpow2.f32 %v409_v16  ;;  %415 = vadd.xlane.f32.xlu2 %v414_v25 }
 0x2b6   :  { %v499_v26 = vadd.f32 %v496_v20, %v480_v23  ;;  %v4437_v20 = vmov 21  }
 0x2b8   :  { %4051 = vmatpush.msk.msrb.mxu0 %vm509_vm6, %v499_v26 }
 0x2bb   :  { %v4749_v27 = vpop.eup %4300 }
 0x2bc   :  { %v487_v30 = vpop.permute.xlu0 %486  ;;  %v417_v31 = vsel %vm241_vm5, %v4749_v27, 0.0 }
 0x2bd   :  { %v495_v34 = vmul.f32 %v493_v10, %v487_v30  ;;  %418 = vadd.xlane.f32.xlu2 %v417_v31 }
 0x2bf   :  { %v498_v36 = vadd.f32 %v495_v34, %v479_v32 }
 0x2c0   :  { %v580_v42 = vpop.permute.xlu1 %579 }
 0x2c1   :  { %527 = vmatpush.msrb.mxu0 %v498_v36 }
 0x2c3   :  { %528 = vmatpush.msrb.mxu0 %v497_v37 }
 0x2c4   :  { %v586_v38 = vpop.permute.xlu0 %585 }
 0x2c5   :  { %4069 = vmatpush.xpose.msk.msra.mxu0 %vm192_vm3, %v786_v62  ;;  %4060 = vmatpush.xpose.msk.msrb.mxu2 %vm192_vm3, %v586_v38 }
 0x2c9   :  { %4061 = vmatpush.xpose.msk.msrb.mxu2 %vm192_vm3, %v584_v59 }
 0x2cc   :  { %v578_v40 = vpop.permute.xlu0 %577 }
 0x2cd   :  { %4062 = vmatmul.msk.f32.vlgmr.msrb.gmra.mxu2 %vm192_vm3, %v578_v40 }
 0x2d4   :  { %v784_v39 = vpop.permute.xlu0 %783 }
 0x2d5   :  { %4070 = vmatpush.xpose.msk.msra.mxu0 %vm192_vm3, %v784_v39  ;;  %581 = vrot.lane.b32.xlu2 %v4635_v29, %s5866_s30  ;;  %v242_v29 = vsel %vm241_vm5, %v4768_v48, -inf  ;;  %v776_v39 = vpop.permute.xlu1 %775 }
 0x2d6   :  { %4063 = vmatmul.msk.f32.gmra.mxu2 %vm192_vm3, %v580_v42 }
 0x2dc   :  { %v782_v41 = vpop.permute.xlu0 %781 }
 0x2dd   :  { %4071 = vmatpush.xpose.msk.msra.mxu0 %vm192_vm3, %v782_v41 }
 0x2e4   :  { %v778_v40 = vpop.permute.xlu0 %777 }
 0x2fe   :  { %243 = vmax.xlane.f32.xlu2 %v242_v29 }
 0x316   :  { %317 = vperm.xlu2 %4242, %v4628_v28  }
 0x31e   :  { %4245 = vset.pattern.permute.xlu2 %v4435_v46 }
 0x31f   :  { %329 = vperm.xlu2 %4245, %v4616_v24  }
 0x320   :  { %v413_v49 = vpop.xlane.xlu2 %412 }
 0x321   :  { %4302 = vrcp.f32 %v413_v49  ;;  %v431_v55 = vand.u32 2147483648, %v413_v49  ;;  %v429_v58 = vand.u32 2147483647, %v413_v49  ;;  %vm425_vm8 = vweird.f32 %v413_v49 }
 0x323   :  { %v432_v62 = vor.u32 1.1754944e-38, %v431_v55  ;;  %vm430_vm10 = vcmp.eq.f32.partialorder %v429_v58, 8.507059e+37 }
 0x327   :  { %v4303_v50 = vpop.eup %4302  ;;  %325 = vperm.xlu2 %4245, %v4610_v21  }
 0x328   :  { %v421_v52 = vmul.f32 %v4303_v50, %v413_v49  ;;  %v416_v53 = vpop.xlane.xlu2 %415  ;;  %vm426_vm7 = vweird.f32 %v4303_v50 }
 0x329   :  { %4304 = vrcp.f32 %v416_v53  ;;  %vm427_vm9 = vmor %vm425_vm8, %vm426_vm7  ;;  %v446_v7 = vand.u32 2147483648, %v416_v53  ;;  %v444_v11 = vand.u32 2147483647, %v416_v53  ;;  %vm440_vm12 = vweird.f32 %v416_v53 }
 0x32a   :  { %v422_v54 = vsub.f32 1.0, %v421_v52  ;;  %v780_v52 = vpop.permute.xlu1 %779 }
 0x32b   :  { %v447_v16 = vor.u32 1.1754944e-38, %v446_v7  ;;  %vm445_vm14 = vcmp.eq.f32.partialorder %v444_v11, 8.507059e+37 }
 0x32c   :  { %v423_v57 = vmul.f32 %v4303_v50, %v422_v54 }
 0x32e   :  { %v424_v59 = vadd.f32 %v4303_v50, %v423_v57 }
 0x32f   :  { %v4305_v61 = vpop.eup %4304  ;;  %4247 = vset.pattern.permute.xlu2 %v4436_v63 }
 0x330   :  { %v436_v0 = vmul.f32 %v4305_v61, %v416_v53  ;;  %708 = vperm.xlu2 %4247, %v4628_v28   ;;  %v419_v1 = vpop.xlane.xlu2 %418  ;;  %v428_v2 = vsel %vm427_vm9, %v4303_v50, %v424_v59  ;;  %vm441_vm11 = vweird.f32 %v4305_v61 }
 0x331   :  { %4306 = vrcp.f32 %v419_v1  ;;  %v433_v3 = vsel %vm430_vm10, %v432_v62, %v428_v2  ;;  %vm442_vm13 = vmor %vm440_vm12, %vm441_vm11  ;;  %v461_v31 = vand.u32 2147483648, %v419_v1  ;;  %v459_v33 = vand.u32 2147483647, %v419_v1 }
 0x332   :  { %v437_v4 = vsub.f32 1.0, %v436_v0  ;;  %v434_v6 = vmul.f32 %v4732_v5, %v433_v3  ;;  %vm455_vm1 = vweird.f32 %v419_v1  ;;  %v240_v62 = vpop.xlane.xlu1 %239 }
 0x333   :  { %v462_v35 = vor.u32 1.1754944e-38, %v461_v31  ;;  %vm460_vm8 = vcmp.eq.f32.partialorder %v459_v33, 8.507059e+37  ;;  %v246_v0 = vsub.f32 %v4723_v56, %v240_v62 }
 0x334   :  { %4052 = vmatmul.msk.f32.vlgmr.msrb.gmra.mxu0 %vm234_vm4, %v434_v6  ;;  %v438_v10 = vmul.f32 %v4305_v61, %v437_v4 }
 0x336   :  { %v439_v12 = vadd.f32 %v4305_v61, %v438_v10 }
 0x337   :  { %v4307_v14 = vpop.eup %4306 }
 0x338   :  { %v451_v19 = vmul.f32 %v4307_v14, %v419_v1  ;;  %4250 = vset.pattern.permute.xlu2 %v4437_v20  ;;  %v582_v23 = vpop.permute.xlu2 %581  ;;  %v443_v25 = vsel %vm442_vm13, %v4305_v61, %v439_v12  ;;  %vm456_vm15 = vweird.f32 %v4307_v14  ;;  %v250_v1 = vmul.f32 1.442695, %v246_v0 }
 0x339   :  { %720 = vperm.xlu2 %4250, %v4616_v24   ;;  %4064 = vmatmul.msk.f32.gmra.mxu2 %vm192_vm3, %v582_v23  ;;  %v448_v5 = vsel %vm445_vm14, %v447_v16, %v443_v25  ;;  %vm457_vm7 = vmor %vm455_vm1, %vm456_vm15 }
 0x33a   :  { %v452_v26 = vsub.f32 1.0, %v451_v19  ;;  %v449_v30 = vmul.f32 %v4743_v15, %v448_v5  ;;  %v237_v15 = vpop.xlane.xlu0 %236 }
 0x33b   :  { %v245_v45 = vsub.f32 %v4728_v60, %v237_v15 }
 0x33c   :  { %4053 = vmatmul.msk.f32.gmra.mxu0 %vm234_vm4, %v449_v30  ;;  %v453_v32 = vmul.f32 %v4307_v14, %v452_v26  ;;  %v4840_v30 = vperm.slane %v4739_v8, 0 }
 0x33d   :  { %v248_v49 = vmul.f32 1.442695, %v245_v45 }
 0x33e   :  { %v454_v34 = vadd.f32 %v4307_v14, %v453_v32  ;;  %v4843_v32 = vperm.slane %v4739_v8, 1 }
 0x33f   :  { %4308 = vpow2.f32 %v248_v49 }
 0x340   :  { %v458_v36 = vsel %vm457_vm7, %v4307_v14, %v454_v34 }
 0x341   :  { %v463_v37 = vsel %vm460_vm8, %v462_v35, %v458_v36 }
 0x342   :  { %v464_v38 = vmul.f32 %v4749_v27, %v463_v37 }
 0x344   :  { %4054 = vmatmul.msk.f32.gmra.mxu0 %vm234_vm4, %v464_v38 }
 0x345   :  { %v4798_v54 = vpop.eup %4308 }
 0x346   :  { %v254_v60 = vsel %vm234_vm4, %v4798_v54, 0.0 }
 0x34c   :  { %4072 = vmatmul.msk.f32.vlgmr.msra.gmra.mxu0 %vm192_vm3, %v776_v39 }
 0x350   :  { %v618_v42 = vpop.f32.mrf.mxu2 }
 0x351   :  { %v619_v41 = vadd.f32 %v618_v42, %v4685_v43 }
 0x353   :  { %v627_v29 = vsel %vm234_vm4, %v619_v41, -inf }
 0x354   :  { %628 = vmax.xlane.f32.xlu0 %v627_v29  ;;  %4073 = vmatmul.msk.f32.gmra.mxu0 %vm192_vm3, %v778_v40 }
 0x359   :  { %v621_v50 = vpop.f32.mrf.mxu2 }
 0x35a   :  { %v4793_v27 = vadd.f32 %v621_v50, %v4692_v47 }
 0x35c   :  { %v630_v53 = vsel %vm234_vm4, %v4793_v27, -inf  ;;  %4074 = vmatmul.msk.f32.gmra.mxu0 %vm192_vm3, %v780_v52 }
 0x35d   :  { %631 = vmax.xlane.f32.xlu1 %v630_v53 }
 0x365   :  { %255 = vadd.xlane.f32.xlu1 %v254_v60 }
 0x371   :  { %v244_v55 = vpop.xlane.xlu2 %243 }
 0x372   :  { %v247_v57 = vsub.f32 %v4768_v48, %v244_v55  ;;  %v4883_v55 = vperm.slane %v4739_v8, 4 }
 0x374   :  { %v252_v58 = vmul.f32 1.442695, %v247_v57 }
 0x376   :  { %4310 = vpow2.f32 %v252_v58 }
 0x377   :  { %4312 = vpow2.f32 %v250_v1 }
 0x379   :  { %v318_v31 = vpop.permute.xlu2 %317 }
 0x37a   :  { %v323_v35 = vmul.f32 %v4840_v30, %v318_v31 }
 0x37c   :  { %v4807_v59 = vpop.eup %4310 }
 0x37d   :  { %v260_v61 = vsel %vm241_vm5, %v4807_v59, 0.0  ;;  %v4817_v4 = vpop.eup %4312 }
 0x37e   :  { %333 = vperm.xlu1 %4243, %v4628_v28   ;;  %v257_v10 = vsel %vm234_vm4, %v4817_v4, 0.0 }
 0x381   :  { %v330_v52 = vpop.permute.xlu2 %329 }
 0x386   :  { %4246 = vset.pattern.permute.xlu1 %v4434_v44 }
 0x387   :  { %309 = vperm.xlu1 %4246, %v4610_v21  }
 0x38f   :  { %4248 = vset.pattern.permute.xlu1 %v4437_v20 }
 0x3b1   :  { %261 = vadd.xlane.f32.xlu1 %v260_v61  ;;  %v4819_v6 = vpop.f32.mrf.mxu0 }
 0x3b9   :  { %v4824_v12 = vpop.f32.mrf.mxu0 }
 0x3bc   :  { %v624_v2 = vpop.f32.mrf.mxu2 }
 0x3bd   :  { %v4813_v3 = vadd.f32 %v624_v2, %v4699_v51 }
 0x3bf   :  { %v633_v48 = vsel %vm241_vm5, %v4813_v3, -inf }
 0x3c0   :  { %634 = vmax.xlane.f32.xlu0 %v633_v48 }
 0x3c1   :  { %v4831_v19 = vpop.f32.mrf.mxu0 }
 0x3c7   :  { %v629_v7 = vpop.xlane.xlu0 %628 }
 0x3c8   :  { %v636_v11 = vsub.f32 %v619_v41, %v629_v7  ;;  %258 = vadd.xlane.f32.xlu0 %v257_v10  ;;  %v4439_v41 = vmov 22  }
 0x3c9   :  { %v816_v25 = vpop.f32.mrf.mxu0 }
 0x3ca   :  { %v639_v56 = vmul.f32 1.442695, %v636_v11  ;;  %724 = vperm.xlu1 %4248, %v4628_v28   ;;  %v4865_v49 = vadd.f32 %v816_v25, %v4685_v43 }
 0x3cc   :  { %4314 = vpow2.f32 %v639_v56 }
 0x3d0   :  { %v632_v23 = vpop.xlane.xlu1 %631 }
 0x3d1   :  { %v819_v26 = vpop.f32.mrf.mxu0  ;;  %v637_v40 = vsub.f32 %v4793_v27, %v632_v23  ;;  %v825_v27 = vsel %vm234_vm4, %v4865_v49, -inf }
 0x3d2   :  { %v4826_v14 = vpop.eup %4314  ;;  %4251 = vset.pattern.permute.xlu1 %v4436_v63  ;;  %v4846_v33 = vadd.f32 %v819_v26, %v4692_v47  ;;  %v4438_v47 = vmov 23  }
 0x3d3   :  { %v645_v16 = vsel %vm234_vm4, %v4826_v14, 0.0  ;;  %v641_v39 = vmul.f32 1.442695, %v637_v40 }
 0x3d4   :  { %646 = vadd.xlane.f32.xlu2 %v645_v16  ;;  %v828_v38 = vsel %vm234_vm4, %v4846_v33, -inf }
 0x3d5   :  { %4316 = vpow2.f32 %v641_v39 }
 0x3d8   :  { %v4836_v5 = vpop.xlane.xlu1 %255 }
 0x3d9   :  { %v822_v42 = vpop.f32.mrf.mxu0  ;;  %4318 = vrcp.f32 %v4836_v5  ;;  %v274_v26 = vand.u32 2147483648, %v4836_v5  ;;  %vm268_vm10 = vweird.f32 %v4836_v5 }
 0x3da   :  { %v4862_v29 = vadd.f32 %v822_v42, %v4699_v51  ;;  %v326_v51 = vpop.permute.xlu2 %325 }
 0x3db   :  { %v4854_v15 = vpop.eup %4316  ;;  %v337_v39 = vmul.f32 %v4843_v32, %v326_v51 }
 0x3dc   :  { %313 = vperm.xlu0 %4244, %v4616_v24   ;;  %v648_v45 = vsel %vm234_vm4, %v4854_v15, 0.0  ;;  %v831_v50 = vsel %vm241_vm5, %v4862_v29, -inf }
 0x3df   :  { %v4319_v58 = vpop.eup %4318 }
 0x3e0   :  { %v264_v2 = vmul.f32 %v4319_v58, %v4836_v5  ;;  %vm269_vm9 = vweird.f32 %v4319_v58 }
 0x3e1   :  { %vm270_vm11 = vmor %vm268_vm10, %vm269_vm9 }
 0x3e2   :  { %v709_v57 = vpop.permute.xlu2 %708  ;;  %v265_v7 = vsub.f32 1.0, %v264_v2 }
 0x3e3   :  { %v714_v0 = vmul.f32 %v4883_v55, %v709_v57 }
 0x3e4   :  { %4249 = vset.pattern.permute.xlu0 %v4436_v63  ;;  %v266_v11 = vmul.f32 %v4319_v58, %v265_v7 }
 0x3e5   :  { %704 = vperm.xlu0 %4249, %v4616_v24  }
 0x3e6   :  { %v267_v16 = vadd.f32 %v4319_v58, %v266_v11 }
 0x3e8   :  { %v271_v31 = vsel %vm270_vm11, %v4319_v58, %v267_v16 }
 0x3ec   :  { %716 = vperm.xlu2 %4250, %v4610_v21  }
 0x3ed   :  { %4253 = vset.pattern.permute.xlu0 %v4438_v47 }
 0x3f0   :  { %v334_v34 = vpop.permute.xlu1 %333 }
 0x3f1   :  { %v339_v36 = vmul.f32 %v4843_v32, %v334_v34 }
 0x3f3   :  { %v342_v37 = vadd.f32 %v339_v36, %v323_v35 }
 0x3f4   :  { %829 = vmax.xlane.f32.xlu1 %v828_v38  ;;  %4252 = vset.pattern.permute.xlu2 %v4439_v41 }
 0x3f5   :  { %4055 = vmatpush.msk.msra.mxu1 %vm509_vm6, %v342_v37  ;;  %v275_v37 = vor.u32 1.1754944e-38, %v274_v26 }
 0x3f9   :  { %v310_v53 = vpop.permute.xlu1 %309 }
 0x3fa   :  { %v321_v38 = vmul.f32 %v4840_v30, %v310_v53 }
 0x40d   :  { %700 = vperm.xlu1 %4251, %v4610_v21  }
 0x40f   :  { %649 = vadd.xlane.f32.xlu0 %v648_v45 }
 0x415   :  { %832 = vmax.xlane.f32.xlu2 %v831_v50  ;;  %4257 = vset.pattern.permute.xlu1 %v4425_v18 }
 0x417   :  { %826 = vmax.xlane.f32.xlu0 %v825_v27  ;;  %v340_v27 = vadd.f32 %v337_v39, %v321_v38 }
 0x424   :  { %v4877_v43 = vpop.xlane.xlu1 %261 }
 0x425   :  { %vm298_vm8 = vweird.f32 %v4877_v43 }
 0x42b   :  { %922 = vperm.xlu0 %4253, %v4628_v28  }
 0x42d   :  { %906 = vperm.xlu2 %4252, %v4628_v28   ;;  %v4886_v28 = vperm.slane %v4739_v8, 5 }
 0x433   :  { %v4874_v60 = vpop.xlane.xlu0 %634  ;;  %4255 = vset.pattern.permute.xlu0 %v4439_v41 }
 0x434   :  { %898 = vperm.xlu0 %4255, %v4610_v21   ;;  %v638_v11 = vsub.f32 %v4813_v3, %v4874_v60 }
 0x435   :  { %902 = vperm.xlu2 %4252, %v4616_v24  }
 0x43b   :  { %v259_v61 = vpop.xlane.xlu0 %258 }
 0x43c   :  { %v725_v62 = vpop.permute.xlu1 %724  ;;  %4258 = vset.pattern.permute.xlu0 %v4427_v22  ;;  %4320 = vrcp.f32 %v259_v61  ;;  %v289_v57 = vand.u32 2147483648, %v259_v61  ;;  %vm283_vm14 = vweird.f32 %v259_v61 }
 0x43d   :  { %v730_v1 = vmul.f32 %v4886_v28, %v725_v62  ;;  %4254 = vset.pattern.permute.xlu2 %v4438_v47  ;;  %4322 = vrcp.f32 %v4877_v43  ;;  %v721_v62 = vpop.permute.xlu2 %720 }
 0x43e   :  { %918 = vperm.xlu2 %4254, %v4616_v24   ;;  %v272_v24 = vand.u32 2147483647, %v4836_v5 }
 0x43f   :  { %v733_v48 = vadd.f32 %v730_v1, %v714_v0  ;;  %v729_v0 = vmul.f32 %v4886_v28, %v721_v62 }
 0x440   :  { %vm273_vm12 = vcmp.eq.f32.partialorder %v272_v24, 8.507059e+37 }
 0x441   :  { %4065 = vmatpush.msk.msrb.mxu3 %vm509_vm6, %v733_v48  ;;  %v276_v42 = vsel %vm273_vm12, %v275_v37, %v271_v31 }
 0x442   :  { %v4321_v10 = vpop.eup %4320  ;;  %v277_v58 = vmul.f32 %v4798_v54, %v276_v42  ;;  %v304_v54 = vand.u32 2147483648, %v4877_v43 }
 0x443   :  { %v279_v56 = vmul.f32 %v4321_v10, %v259_v61  ;;  %v4323_v25 = vpop.eup %4322  ;;  %vm284_vm13 = vweird.f32 %v4321_v10 }
 0x444   :  { %v294_v34 = vmul.f32 %v4323_v25, %v4877_v43  ;;  %vm285_vm15 = vmor %vm283_vm14, %vm284_vm13  ;;  %vm299_vm7 = vweird.f32 %v4323_v25  ;;  %v305_v16 = vor.u32 1.1754944e-38, %v304_v54 }
 0x445   :  { %v280_v23 = vsub.f32 1.0, %v279_v56  ;;  %vm300_vm9 = vmor %vm298_vm8, %vm299_vm7 }
 0x446   :  { %914 = vperm.xlu2 %4254, %v4610_v21   ;;  %v338_v21 = vmul.f32 %v4843_v32, %v330_v52  ;;  %v295_v45 = vsub.f32 1.0, %v294_v34  ;;  %v287_v52 = vand.u32 2147483647, %v259_v61  ;;  %v290_v32 = vor.u32 1.1754944e-38, %v289_v57 }
 0x447   :  { %v281_v35 = vmul.f32 %v4321_v10, %v280_v23  ;;  %v643_v23 = vmul.f32 1.442695, %v638_v11  ;;  %v647_v26 = vpop.xlane.xlu2 %646 }
 0x448   :  { %v296_v53 = vmul.f32 %v4323_v25, %v295_v45  ;;  %vm288_vm1 = vcmp.eq.f32.partialorder %v287_v52, 8.507059e+37  ;;  %4324 = vrcp.f32 %v647_v26  ;;  %vm659_vm12 = vweird.f32 %v647_v26 }
 0x449   :  { %v282_v50 = vadd.f32 %v4321_v10, %v281_v35  ;;  %4326 = vpow2.f32 %v643_v23  ;;  %v663_v37 = vand.u32 2147483647, %v647_v26 }
 0x44a   :  { %v297_v7 = vadd.f32 %v4323_v25, %v296_v53 }
 0x44b   :  { %vm664_vm14 = vcmp.eq.f32.partialorder %v663_v37, 8.507059e+37 }
 0x44c   :  { %v301_v56 = vsel %vm300_vm9, %v4323_v25, %v297_v7 }
 0x44e   :  { %v314_v36 = vpop.permute.xlu0 %313  ;;  %4256 = vset.pattern.permute.xlu2 %v4427_v22 }
 0x44f   :  { %v322_v40 = vmul.f32 %v4840_v30, %v314_v36  ;;  %v286_v30 = vsel %vm285_vm15, %v4321_v10, %v282_v50  ;;  %v302_v10 = vand.u32 2147483647, %v4877_v43 }
 0x450   :  { %v291_v2 = vsel %vm288_vm1, %v290_v32, %v286_v30 }
 0x451   :  { %v341_v5 = vadd.f32 %v338_v21, %v322_v40  ;;  %v292_v61 = vmul.f32 %v4817_v4, %v291_v2  ;;  %vm303_vm10 = vcmp.eq.f32.partialorder %v302_v10, 8.507059e+37  ;;  %v4325_v4 = vpop.eup %4324  ;;  %v665_v21 = vand.u32 2147483648, %v647_v26 }
 0x452   :  { %v306_v24 = vsel %vm303_vm10, %v305_v16, %v301_v56  ;;  %v4919_v43 = vpop.eup %4326  ;;  %v655_v34 = vmul.f32 %v4325_v4, %v647_v26  ;;  %vm660_vm11 = vweird.f32 %v4325_v4  ;;  %v909_v26 = vperm.slane %v4739_v8, 6 }
 0x453   :  { %565 = vmatpush.msra.mxu1 %v341_v5  ;;  %v307_v31 = vmul.f32 %v4807_v59, %v306_v24  ;;  %v651_v3 = vsel %vm241_vm5, %v4919_v43, 0.0  ;;  %vm661_vm13 = vmor %vm659_vm12, %vm660_vm11  ;;  %v717_v59 = vpop.permute.xlu2 %716  ;;  %v666_v40 = vor.u32 1.1754944e-38, %v665_v21  ;;  %v925_v24 = vperm.slane %v4739_v8, 7 }
 0x454   :  { %v656_v60 = vsub.f32 1.0, %v655_v34  ;;  %v728_v42 = vmul.f32 %v4886_v28, %v717_v59 }
 0x455   :  { %566 = vmatpush.msra.mxu1 %v340_v27 }
 0x456   :  { %4056 = vmatmul.msk.f32.vlgmr.msra.gmra.mxu1 %vm234_vm4, %v277_v58  ;;  %v657_v25 = vmul.f32 %v4325_v4, %v656_v60 }
 0x457   :  { %v705_v51 = vpop.permute.xlu0 %704 }
 0x458   :  { %v713_v1 = vmul.f32 %v4883_v55, %v705_v51  ;;  %v658_v36 = vadd.f32 %v4325_v4, %v657_v25 }
 0x45a   :  { %v732_v48 = vadd.f32 %v729_v0, %v713_v1  ;;  %v662_v38 = vsel %vm661_vm13, %v4325_v4, %v658_v36 }
 0x45b   :  { %v667_v45 = vsel %vm664_vm14, %v666_v40, %v662_v38 }
 0x45c   :  { %760 = vmatpush.msrb.mxu3 %v732_v48  ;;  %v668_v57 = vmul.f32 %v4826_v14, %v667_v45 }
 0x45e   :  { %4057 = vmatmul.msk.f32.gmra.mxu1 %vm234_vm4, %v292_v61 }
 0x466   :  { %4058 = vmatmul.msk.f32.gmra.mxu1 %vm234_vm4, %v307_v31 }
 0x467   :  { %v830_v35 = vpop.xlane.xlu1 %829 }
 0x46f   :  { %652 = vadd.xlane.f32.xlu2 %v651_v3 }
 0x47f   :  { %v701_v39 = vpop.permute.xlu1 %700 }
 0x480   :  { %v712_v5 = vmul.f32 %v4883_v55, %v701_v39  ;;  %v835_v55 = vsub.f32 %v4846_v33, %v830_v35 }
 0x482   :  { %v650_v50 = vpop.xlane.xlu0 %649  ;;  %v731_v27 = vadd.f32 %v728_v42, %v712_v5  ;;  %v839_v54 = vmul.f32 1.442695, %v835_v55 }
 0x483   :  { %4328 = vrcp.f32 %v650_v50  ;;  %v680_v0 = vand.u32 2147483648, %v650_v50  ;;  %v678_v14 = vand.u32 2147483647, %v650_v50  ;;  %vm674_vm1 = vweird.f32 %v650_v50 }
 0x484   :  { %761 = vmatpush.msrb.mxu3 %v731_v27 }
 0x485   :  { %4066 = vmatmul.msk.f32.vlgmr.msrb.gmra.mxu3 %vm234_vm4, %v668_v57  ;;  %vm679_vm8 = vcmp.eq.f32.partialorder %v678_v14, 8.507059e+37 }
 0x488   :  { %v833_v58 = vpop.xlane.xlu2 %832 }
 0x489   :  { %v4329_v52 = vpop.eup %4328  ;;  %v836_v62 = vsub.f32 %v4862_v29, %v833_v58  ;;  %v681_v29 = vor.u32 1.1754944e-38, %v680_v0 }
 0x48a   :  { %v670_v53 = vmul.f32 %v4329_v52, %v650_v50  ;;  %v827_v30 = vpop.xlane.xlu0 %826  ;;  %vm675_vm15 = vweird.f32 %v4329_v52 }
 0x48b   :  { %v841_v32 = vmul.f32 1.442695, %v836_v62  ;;  %v834_v28 = vsub.f32 %v4865_v49, %v827_v30  ;;  %vm676_vm7 = vmor %vm674_vm1, %vm675_vm15 }
 0x48c   :  { %v671_v51 = vsub.f32 1.0, %v670_v53 }
 0x48d   :  { %4330 = vpow2.f32 %v841_v32  ;;  %v837_v1 = vmul.f32 1.442695, %v834_v28 }
 0x48e   :  { %v672_v2 = vmul.f32 %v4329_v52, %v671_v51 }
 0x48f   :  { %4332 = vpow2.f32 %v837_v1 }
 0x490   :  { %v907_v48 = vpop.permute.xlu2 %906  ;;  %v673_v7 = vadd.f32 %v4329_v52, %v672_v2  ;;  %4334 = vpow2.f32 %v839_v54 }
 0x491   :  { %v912_v34 = vmul.f32 %v909_v26, %v907_v48 }
 0x492   :  { %v677_v61 = vsel %vm676_vm7, %v4329_v52, %v673_v7 }
 0x493   :  { %v4930_v10 = vpop.eup %4330  ;;  %v682_v49 = vsel %vm679_vm8, %v681_v29, %v677_v61 }
 0x494   :  { %v849_v33 = vsel %vm241_vm5, %v4930_v10, 0.0  ;;  %v683_v11 = vmul.f32 %v4854_v15, %v682_v49 }
 0x495   :  { %v4935_v56 = vpop.eup %4332  ;;  %850 = vadd.xlane.f32.xlu0 %v849_v33 }
 0x496   :  { %4067 = vmatmul.msk.f32.gmra.mxu3 %vm234_vm4, %v683_v11  ;;  %v843_v16 = vsel %vm234_vm4, %v4935_v56, 0.0  ;;  %v4942_v31 = vpop.eup %4334 }
 0x497   :  { %844 = vadd.xlane.f32.xlu1 %v843_v16  ;;  %v846_v3 = vsel %vm234_vm4, %v4942_v31, 0.0 }
 0x498   :  { %v903_v23 = vpop.permute.xlu2 %902 }
 0x499   :  { %v911_v35 = vmul.f32 %v909_v26, %v903_v23 }
 0x49d   :  { %v923_v4 = vpop.permute.xlu0 %922 }
 0x49e   :  { %v928_v15 = vmul.f32 %v925_v24, %v923_v4 }
 0x49f   :  { %847 = vadd.xlane.f32.xlu1 %v846_v3 }
 0x4a0   :  { %v931_v60 = vadd.f32 %v928_v15, %v912_v34  ;;  %v919_v25 = vpop.permute.xlu2 %918 }
 0x4a1   :  { %v927_v36 = vmul.f32 %v925_v24, %v919_v25 }
 0x4a2   :  { %4075 = vmatpush.msk.msrb.mxu1 %vm509_vm6, %v931_v60 }
 0x4a3   :  { %v930_v21 = vadd.f32 %v927_v36, %v911_v35 }
 0x4a5   :  { %958 = vmatpush.msrb.mxu1 %v930_v21 }
 0x4a6   :  { %v899_v37 = vpop.permute.xlu0 %898 }
 0x4a7   :  { %v910_v8 = vmul.f32 %v909_v26, %v899_v37 }
 0x4a8   :  { %v915_v59 = vpop.permute.xlu2 %914 }
 0x4a9   :  { %v926_v38 = vmul.f32 %v925_v24, %v915_v59 }
 0x4ab   :  { %v929_v40 = vadd.f32 %v926_v38, %v910_v8 }
 0x4ad   :  { %959 = vmatpush.msrb.mxu1 %v929_v40 }
 0x4e2   :  { %v653_v39 = vpop.xlane.xlu2 %652 }
 0x4e3   :  { %4336 = vrcp.f32 %v653_v39  ;;  %v695_v50 = vand.u32 2147483648, %v653_v39  ;;  %v693_v57 = vand.u32 2147483647, %v653_v39  ;;  %vm689_vm10 = vweird.f32 %v653_v39 }
 0x4e5   :  { %v696_v52 = vor.u32 1.1754944e-38, %v695_v50  ;;  %vm694_vm12 = vcmp.eq.f32.partialorder %v693_v57, 8.507059e+37 }
 0x4e9   :  { %v4337_v42 = vpop.eup %4336 }
 0x4ea   :  { %v685_v5 = vmul.f32 %v4337_v42, %v653_v39  ;;  %vm690_vm9 = vweird.f32 %v4337_v42  ;;  %v568_v39 = vpop.f32.mrf.mxu1 }
 0x4eb   :  { %vm691_vm11 = vmor %vm689_vm10, %vm690_vm9  ;;  %v569_v50 = vadd.f32 %v568_v39, %v4819_v6 }
 0x4ec   :  { %v686_v45 = vsub.f32 1.0, %v685_v5 }
 0x4ee   :  { %v687_v27 = vmul.f32 %v4337_v42, %v686_v45 }
 0x4f0   :  { %v688_v58 = vadd.f32 %v4337_v42, %v687_v27 }
 0x4f2   :  { %v692_v62 = vsel %vm691_vm11, %v4337_v42, %v688_v58  ;;  %v571_v42 = vpop.f32.mrf.mxu1 }
 0x4f3   :  { %v697_v53 = vsel %vm694_vm12, %v696_v52, %v692_v62 }
 0x4f4   :  { %v698_v30 = vmul.f32 %v4919_v43, %v697_v53  ;;  %v572_v53 = vadd.f32 %v571_v42, %v4824_v12 }
 0x4f6   :  { %4068 = vmatmul.msk.f32.gmra.mxu3 %vm234_vm4, %v698_v30 }
 0x4fa   :  { %v574_v5 = vpop.f32.mrf.mxu1 }
 0x508   :  { %v851_v32 = vpop.xlane.xlu0 %850  ;;  %v763_v45 = vpop.f32.mrf.mxu3 }
 0x509   :  { %v893_v36 = vand.u32 2147483648, %v851_v32  ;;  %vm887_vm12 = vweird.f32 %v851_v32  ;;  %v891_v37 = vand.u32 2147483647, %v851_v32  ;;  %v772_v27 = vadd.f32 %v763_v45, %v569_v50 }
 0x50a   :  { %v845_v28 = vpop.xlane.xlu1 %844 }
 0x50b   :  { %4338 = vrcp.f32 %v845_v28  ;;  %v863_v14 = vand.u32 2147483648, %v845_v28  ;;  %v861_v54 = vand.u32 2147483647, %v845_v28  ;;  %vm857_vm14 = vweird.f32 %v845_v28 }
 0x50c   :  { %4340 = vrcp.f32 %v851_v32  ;;  %v894_v8 = vor.u32 1.1754944e-38, %v893_v36 }
 0x50d   :  { %v864_v61 = vor.u32 1.1754944e-38, %v863_v14  ;;  %vm862_vm1 = vcmp.eq.f32.partialorder %v861_v54, 8.507059e+37 }
 0x511   :  { %v4339_v51 = vpop.eup %4338 }
 0x512   :  { %v853_v55 = vmul.f32 %v4339_v51, %v845_v28  ;;  %v848_v0 = vpop.xlane.xlu1 %847  ;;  %v4341_v1 = vpop.eup %4340  ;;  %vm858_vm13 = vweird.f32 %v4339_v51 }
 0x513   :  { %4342 = vrcp.f32 %v848_v0  ;;  %v883_v48 = vmul.f32 %v4341_v1, %v851_v32  ;;  %vm859_vm15 = vmor %vm857_vm14, %vm858_vm13  ;;  %v878_v24 = vand.u32 2147483648, %v848_v0  ;;  %v876_v15 = vand.u32 2147483647, %v848_v0 }
 0x514   :  { %v854_v2 = vsub.f32 1.0, %v853_v55  ;;  %vm872_vm8 = vweird.f32 %v848_v0  ;;  %vm888_vm11 = vweird.f32 %v4341_v1  ;;  %vm892_vm14 = vcmp.eq.f32.partialorder %v891_v37, 8.507059e+37  ;;  %v1073_v37 = vld [vmem:[%s5845_s12 + $0x8] sm:$0xff] }
 0x515   :  { %v884_v49 = vsub.f32 1.0, %v883_v48  ;;  %v879_v60 = vor.u32 1.1754944e-38, %v878_v24  ;;  %vm877_vm10 = vcmp.eq.f32.partialorder %v876_v15, 8.507059e+37  ;;  %vm889_vm13 = vmor %vm887_vm12, %vm888_vm11  ;;  %v1127_v39 = vunpack.c.h.b16 %v1073_v37 }
 0x516   :  { %v855_v7 = vmul.f32 %v4339_v51, %v854_v2 }
 0x517   :  { %v885_v4 = vmul.f32 %v4341_v1, %v884_v49 }
 0x518   :  { %v856_v29 = vadd.f32 %v4339_v51, %v855_v7 }
 0x519   :  { %v4343_v43 = vpop.eup %4342  ;;  %v886_v35 = vadd.f32 %v4341_v1, %v885_v4  ;;  %v766_v62 = vpop.f32.mrf.mxu3 }
 0x51a   :  { %v860_v33 = vsel %vm859_vm15, %v4339_v51, %v856_v29  ;;  %v868_v11 = vmul.f32 %v4343_v43, %v848_v0  ;;  %vm873_vm7 = vweird.f32 %v4343_v43  ;;  %v773_v30 = vadd.f32 %v766_v62, %v572_v53 }
 0x51b   :  { %v865_v16 = vsel %vm862_vm1, %v864_v61, %v860_v33  ;;  %vm874_vm9 = vmor %vm872_vm8, %vm873_vm7  ;;  %v890_v59 = vsel %vm889_vm13, %v4341_v1, %v886_v35  ;;  %v575_v0 = vadd.f32 %v574_v5, %v4831_v19  ;;  %vm990_vm15 = vcmask 62464  }
 0x51c   :  { %v869_v23 = vsub.f32 1.0, %v868_v11  ;;  %v866_v26 = vmul.f32 %v4935_v56, %v865_v16  ;;  %v895_v38 = vsel %vm892_vm14, %v894_v8, %v890_v59  ;;  %v4440_v29 = vmov 8.0  }
 0x51d   :  { %v896_v40 = vmul.f32 %v4930_v10, %v895_v38  ;;  %4344 = vrcp.f32 %v4440_v29  ;;  %v1074_v29 = vld [vmem:[%s5845_s12 + $0x10] sm:$0xff] }
 0x51e   :  { %v870_v34 = vmul.f32 %v4343_v43, %v869_v23  ;;  %4076 = vmatmul.msk.f32.vlgmr.msrb.gmra.mxu1 %vm234_vm4, %v866_v26 }
 0x520   :  { %v871_v3 = vadd.f32 %v4343_v43, %v870_v34 }
 0x522   :  { %v875_v25 = vsel %vm874_vm9, %v4343_v43, %v871_v3 }
 0x523   :  { %v880_v21 = vsel %vm877_vm10, %v879_v60, %v875_v25  ;;  %v4345_v43 = vpop.eup %4344 }
 0x524   :  { %v881_v56 = vmul.f32 %v4942_v31, %v880_v21  ;;  %v4280_v31 = vld [vmem:[%s5889_s28] ss:$0 sm:$0xff]  ;;  %v995_v61 = vmul.f32 8.0, %v4345_v43  ;;  %vm999_vm1 = vweird.f32 %v4345_v43 }
 0x526   :  { %4077 = vmatmul.msk.f32.gmra.mxu1 %vm234_vm4, %v881_v56  ;;  %v996_v19 = vsub.f32 1.0, %v995_v61  ;;  %v1072_v56 = vld [vmem:[%s5845_s12] sm:$0xff]  ;;  %v1128_v61 = vunpack.c.l.b16 %v1074_v29 }
 0x527   :  { %v1124_v8 = vunpack.c.l.b16 %v1072_v56  ;;  %v1125_v38 = vunpack.c.h.b16 %v1072_v56 }
 0x528   :  { %v997_v49 = vmul.f32 %v4345_v43, %v996_v19  ;;  %v1129_v19 = vunpack.c.h.b16 %v1074_v29 }
 0x529   :  { %v1140_v5 = vpack.c.b16 %v1124_v8, %v1124_v8  ;;  %v1141_v45 = vpack.c.b16 %v1125_v38, %v1125_v38  ;;  %v4282_v8 = vld [vmem:[%s5844_s11] ss:$0 sm:$0xff] }
 0x52e   :  { %4078 = vmatmul.msk.f32.gmra.mxu1 %vm234_vm4, %v896_v40  ;;  %v1126_v40 = vunpack.c.l.b16 %v1073_v37 }
 0x530   :  { %v1142_v50 = vpack.c.b16 %v1126_v40, %v1126_v40 }
 0x579   :  { %v769_v55 = vpop.f32.mrf.mxu3 }
 0x57a   :  { %v774_v2 = vadd.f32 %v769_v55, %v575_v0 }
 0x59b   :  { %v961_v57 = vpop.f32.mrf.mxu1 }
 0x59c   :  { %v970_v58 = vadd.f32 %v961_v57, %v772_v27  ;;  %v1143_v27 = vpack.c.b16 %v1127_v39, %v1127_v39  ;;  %v1163_v57 = vsel %vm98_vm0, %v1140_v5, 0 }
 0x59d   :  { %1217 = vmatpush.bf16.msra.mxu2 %v1163_v57 }
 0x59e   :  { %v976_v52 = vadd.f32 %v4280_v31, %v970_v58  ;;  %v1166_v58 = vsel %vm98_vm0, %v1141_v45, 0  ;;  %v1172_v62 = vsel %vm98_vm0, %v1143_v27, 0 }
 0x59f   :  { %1235 = vmatpush.bf16.msra.mxu3 %v1166_v58  ;;  %1271 = vmatpush.bf16.msra.mxu1 %v1172_v62 }
 0x5a0   :  { %v979_v10 = vadd.f32 %v976_v52, %v4588_v9  ;;  %v1169_v52 = vsel %vm98_vm0, %v1142_v50, 0 }
 0x5a1   :  { %1253 = vmatpush.bf16.msrb.mxu0 %v1169_v52 }
 0x5a2   :  { %v984_v32 = vsel %vm144_vm2, %v979_v10, 0.0 }
 0x5a3   :  { %985 = vadd.xlane.f32.xlu1 %v984_v32  ;;  %v964_v28 = vpop.f32.mrf.mxu1 }
 0x5a4   :  { %v971_v51 = vadd.f32 %v964_v28, %v773_v30 }
 0x5a6   :  { %v977_v6 = vadd.f32 %v4280_v31, %v971_v51 }
 0x5a8   :  { %v980_v1 = vadd.f32 %v977_v6, %v4595_v13  ;;  %v998_v13 = vadd.f32 %v4345_v43, %v997_v49 }
 0x5aa   :  { %v987_v14 = vsel %vm144_vm2, %v980_v1, 0.0  ;;  %v4967_v33 = vsel %vm999_vm1, %v4345_v43, %v998_v13  ;;  %v1075_v43 = vld [vmem:[%s5845_s12 + $0x18] sm:$0xff] }
 0x5ab   :  { %988 = vadd.xlane.f32.xlu1 %v987_v14  ;;  %v967_v48 = vpop.f32.mrf.mxu1  ;;  %v1130_v49 = vunpack.c.l.b16 %v1075_v43 }
 0x5ac   :  { %v972_v12 = vadd.f32 %v967_v48, %v774_v2 }
 0x5ae   :  { %v978_v7 = vadd.f32 %v4280_v31, %v972_v12 }
 0x5b0   :  { %v981_v9 = vadd.f32 %v978_v7, %v4602_v17 }
 0x5b2   :  { %v991_v54 = vsel %vm990_vm15, %v981_v9, 0.0 }
 0x5b3   :  { %992 = vadd.xlane.f32.xlu1 %v991_v54 }
 0x616   :  { %v986_v11 = vpop.xlane.xlu1 %985 }
 0x617   :  { %v1001_v16 = vmul.f32 %v4967_v33, %v986_v11  ;;  %v1131_v11 = vunpack.c.h.b16 %v1075_v43 }
 0x619   :  { %v4970_v23 = vsub.f32 %v979_v10, %v1001_v16 }
 0x61b   :  { %v1007_v17 = vmul.f32 %v4970_v23, %v4970_v23 }
 0x61d   :  { %v1010_v26 = vsel %vm144_vm2, %v1007_v17, 0.0  ;;  %v4281_v17 = vld [vmem:[%s5843_s10] ss:$0 sm:$0xff] }
 0x61e   :  { %1011 = vadd.xlane.f32.xlu1 %v1010_v26  ;;  %v989_v24 = vpop.xlane.xlu1 %988 }
 0x61f   :  { %v1002_v4 = vmul.f32 %v4967_v33, %v989_v24  ;;  %v1144_v24 = vpack.c.b16 %v1128_v61, %v1128_v61 }
 0x621   :  { %v4976_v34 = vsub.f32 %v980_v1, %v1002_v4  ;;  %v1145_v4 = vpack.c.b16 %v1129_v19, %v1129_v19 }
 0x623   :  { %v1008_v15 = vmul.f32 %v4976_v34, %v4976_v34 }
 0x625   :  { %v1013_v3 = vsel %vm144_vm2, %v1008_v15, 0.0  ;;  %v1146_v15 = vpack.c.b16 %v1130_v49, %v1130_v49 }
 0x626   :  { %1014 = vadd.xlane.f32.xlu1 %v1013_v3  ;;  %v993_v60 = vpop.xlane.xlu1 %992 }
 0x627   :  { %v1003_v25 = vmul.f32 %v4967_v33, %v993_v60  ;;  %v1181_v56 = vsel %vm98_vm0, %v1146_v15, 0 }
 0x628   :  { %1325 = vmatpush.bf16.msra.mxu0 %v1181_v56 }
 0x629   :  { %v4982_v35 = vsub.f32 %v981_v9, %v1003_v25  ;;  %v1147_v25 = vpack.c.b16 %v1131_v11, %v1131_v11 }
 0x62b   :  { %v1009_v36 = vmul.f32 %v4982_v35, %v4982_v35 }
 0x62d   :  { %v1016_v21 = vsel %vm990_vm15, %v1009_v36, 0.0  ;;  %v1175_v36 = vsel %vm98_vm0, %v1144_v24, 0  ;;  %v1579_v24 = vld [vmem:[%s5846_s14 + $0x8] sm:$0xff] }
 0x62e   :  { %1017 = vadd.xlane.f32.xlu2 %v1016_v21  ;;  %v1178_v21 = vsel %vm98_vm0, %v1145_v4, 0  ;;  %1289 = vmatpush.bf16.msrb.mxu2 %v1175_v36  ;;  %v1600_v4 = vunpack.c.l.b16 %v1579_v24  ;;  %v1601_v15 = vunpack.c.h.b16 %v1579_v24 }
 0x62f   :  { %1307 = vmatpush.bf16.msrb.mxu3 %v1178_v21 }
 0x691   :  { %v1012_v59 = vpop.xlane.xlu1 %1011 }
 0x692   :  { %v1019_v42 = vmul.f32 %v1012_v59, %v4967_v33 }
 0x694   :  { %v1022_v31 = vadd.f32 1e-05, %v1019_v42 }
 0x696   :  { %4346 = vrsqrt.f32 %v1022_v31  ;;  %vm1031_vm8 = vweird.f32 %v1022_v31 }
 0x699   :  { %v1015_v53 = vpop.xlane.xlu1 %1014 }
 0x69a   :  { %v1020_v10 = vmul.f32 %v1015_v53, %v4967_v33  ;;  %v1077_v53 = vld [vmem:[%s5845_s12 + $0x28] sm:$0xff] }
 0x69c   :  { %v4347_v30 = vpop.eup %4346  ;;  %v1023_v32 = vadd.f32 1e-05, %v1020_v10 }
 0x69d   :  { %v1026_v28 = vmul.f32 %v4347_v30, %v1022_v31  ;;  %vm1032_vm7 = vweird.f32 %v4347_v30 }
 0x69e   :  { %4348 = vrsqrt.f32 %v1023_v32  ;;  %vm1033_vm9 = vmor %vm1031_vm8, %vm1032_vm7  ;;  %vm1041_vm11 = vweird.f32 %v1023_v32 }
 0x69f   :  { %v1027_v51 = vmul.f32 %v4347_v30, %v1026_v28  ;;  %v1135_v28 = vunpack.c.h.b16 %v1077_v53 }
 0x6a1   :  { %v1028_v6 = vmul.f32 0.5, %v1027_v51  ;;  %v1018_v55 = vpop.xlane.xlu2 %1017 }
 0x6a2   :  { %v1021_v0 = vmul.f32 %v1018_v55, %v4967_v33 }
 0x6a3   :  { %v1029_v1 = vsub.f32 1.5, %v1028_v6 }
 0x6a4   :  { %v4349_v2 = vpop.eup %4348  ;;  %v1024_v14 = vadd.f32 1e-05, %v1021_v0  ;;  %v1151_v0 = vpack.c.b16 %v1135_v28, %v1135_v28 }
 0x6a5   :  { %v1030_v48 = vmul.f32 %v4347_v30, %v1029_v1  ;;  %v1036_v12 = vmul.f32 %v4349_v2, %v1023_v32  ;;  %vm1042_vm10 = vweird.f32 %v4349_v2  ;;  %v1134_v32 = vunpack.c.l.b16 %v1077_v53 }
 0x6a6   :  { %4350 = vrsqrt.f32 %v1024_v14  ;;  %vm1043_vm12 = vmor %vm1041_vm11, %vm1042_vm10  ;;  %vm1051_vm14 = vweird.f32 %v1024_v14 }
 0x6a7   :  { %v1037_v7 = vmul.f32 %v4349_v2, %v1036_v12  ;;  %v1034_v9 = vsel %vm1033_vm9, %v4347_v30, %v1030_v48  ;;  %v1150_v55 = vpack.c.b16 %v1134_v32, %v1134_v32  ;;  %v1196_v48 = vsel %vm98_vm0, %v1151_v0, 0  ;;  %v1078_v12 = vld [vmem:[%s5845_s12 + $0x30] sm:$0xff] }
 0x6a8   :  { %v1055_v26 = vmul.f32 %v1034_v9, %v4970_v23  ;;  %v1184_v23 = vsel %vm98_vm0, %v1147_v25, 0  ;;  %v1136_v9 = vunpack.c.l.b16 %v1078_v12  ;;  %v1578_v25 = vld [vmem:[%s5846_s14] sm:$0xff] }
 0x6a9   :  { %v1038_v54 = vmul.f32 0.5, %v1037_v7  ;;  %1343 = vmatpush.bf16.msrb.mxu1 %v1184_v23  ;;  %v1079_v7 = vld [vmem:[%s5845_s12 + $0x38] sm:$0xff]  ;;  %v1598_v36 = vunpack.c.l.b16 %v1578_v25  ;;  %v1599_v21 = vunpack.c.h.b16 %v1578_v25 }
 0x6aa   :  { %v1061_v38 = vmul.f32 %v4281_v17, %v1055_v26  ;;  %v1138_v29 = vunpack.c.l.b16 %v1079_v7  ;;  %v1139_v43 = vunpack.c.h.b16 %v1079_v7  ;;  %v1152_v61 = vpack.c.b16 %v1136_v9, %v1136_v9 }
 0x6ab   :  { %v1039_v13 = vsub.f32 1.5, %v1038_v54  ;;  %v1137_v54 = vunpack.c.h.b16 %v1078_v12  ;;  %v1614_v56 = vpack.c.b16 %v1598_v36, %v1598_v36 }
 0x6ac   :  { %v4351_v16 = vpop.eup %4350  ;;  %v5018_v45 = vadd.f32 %v4282_v8, %v1061_v38  ;;  %v1154_v49 = vpack.c.b16 %v1138_v29, %v1138_v29  ;;  %v1199_v11 = vsel %vm98_vm0, %v1152_v61, 0 }
 0x6ad   :  { %v1040_v3 = vmul.f32 %v4349_v2, %v1039_v13  ;;  %v1046_v60 = vmul.f32 %v4351_v16, %v1024_v14  ;;  %vm1052_vm13 = vweird.f32 %v4351_v16  ;;  %v1193_v14 = vsel %vm98_vm0, %v1150_v55, 0 }
 0x6ae   :  { %vm1053_vm1 = vmor %vm1051_vm14, %vm1052_vm13  ;;  %v1153_v19 = vpack.c.b16 %v1137_v54, %v1137_v54  ;;  %v1155_v13 = vpack.c.b16 %v1139_v43, %v1139_v43 }
 0x6af   :  { %v1044_v37 = vsel %vm1043_vm12, %v4349_v2, %v1040_v3  ;;  %v1047_v59 = vmul.f32 %v4351_v16, %v1046_v60  ;;  %v1616_v3 = vpack.c.b16 %v1600_v4, %v1600_v4  ;;  %v1617_v60 = vpack.c.b16 %v1601_v15, %v1601_v15 }
 0x6b0   :  { %v1056_v40 = vmul.f32 %v1044_v37, %v4976_v34  ;;  %v1208_v26 = vsel %vm98_vm0, %v1155_v13, 0  ;;  %v1615_v37 = vpack.c.b16 %v1599_v21, %v1599_v21 }
 0x6b1   :  { %v1048_v39 = vmul.f32 0.5, %v1047_v59  ;;  %v5126_v59 = vld [vmem:[%s5847_s13] sm:$0xff] }
 0x6b2   :  { %v1062_v42 = vmul.f32 %v4281_v17, %v1056_v40  ;;  %v1086_v38 = vperm.slane %v5126_v59, 2  ;;  %v1087_v40 = vperm.slane %v5126_v59, 3  ;;  %v1085_v53 = vperm.slane %v5126_v59, 1 }
 0x6b3   :  { %v1049_v5 = vsub.f32 1.5, %v1048_v39  ;;  %v1581_v39 = vld [vmem:[%s5846_s14 + $0x18] sm:$0xff] }
 0x6b4   :  { %v5020_v50 = vadd.f32 %v4282_v8, %v1062_v42  ;;  %v1604_v42 = vunpack.c.l.b16 %v1581_v39 }
 0x6b5   :  { %v1050_v27 = vmul.f32 %v4351_v16, %v1049_v5  ;;  %v1605_v5 = vunpack.c.h.b16 %v1581_v39 }
 0x6b6   :  { %v5024_v31 = vpack.c.bf16 %v5020_v50, %v5018_v45 }
 0x6b7   :  { %v1054_v57 = vsel %vm1053_vm1, %v4351_v16, %v1050_v27  ;;  %v1202_v16 = vsel %vm98_vm0, %v1153_v19, 0 }
 0x6b8   :  { %4079 = vmatmul.msk.bf16.vlgmr.msra.gmra.mxu2 %vm144_vm2, %v5024_v31  ;;  %4081 = vmatmul.msk.bf16.vlgmr.msra.gmra.mxu3 %vm144_vm2, %v5024_v31  ;;  %v1057_v34 = vmul.f32 %v1054_v57, %v4982_v35  ;;  %v1076_v35 = vld [vmem:[%s5845_s12 + $0x20] sm:$0xff]  ;;  %v1620_v57 = vpack.c.b16 %v1604_v42, %v1604_v42 }
 0x6b9   :  { %4083 = vmatmul.msk.bf16.vlgmr.msrb.gmra.mxu0 %vm144_vm2, %v5024_v31  ;;  %4085 = vmatmul.msk.bf16.vlgmr.msra.gmra.mxu1 %vm144_vm2, %v5024_v31  ;;  %v1132_v10 = vunpack.c.l.b16 %v1076_v35  ;;  %v1133_v30 = vunpack.c.h.b16 %v1076_v35  ;;  %v1084_v35 = vperm.slane %v5126_v59, 0 }
 0x6ba   :  { %v1063_v58 = vmul.f32 %v4281_v17, %v1057_v34  ;;  %1397 = vmatpush.bf16.msrb.mxu0 %v1193_v14  ;;  %1415 = vmatpush.bf16.msra.mxu1 %v1196_v48  ;;  %v1205_v17 = vsel %vm98_vm0, %v1154_v49, 0  ;;  %v1621_v34 = vpack.c.b16 %v1605_v5, %v1605_v5 }
 0x6bb   :  { %v1148_v51 = vpack.c.b16 %v1132_v10, %v1132_v10  ;;  %v1149_v6 = vpack.c.b16 %v1133_v30, %v1133_v30 }
 0x6bc   :  { %v5035_v52 = vadd.f32 %v4282_v8, %v1063_v58 }
 0x6bd   :  { %v1187_v1 = vsel %vm98_vm0, %v1148_v51, 0  ;;  %v1190_v2 = vsel %vm98_vm0, %v1149_v6, 0  ;;  %v1580_v51 = vld [vmem:[%s5846_s14 + $0x10] sm:$0xff] }
 0x6be   :  { %v5039_v62 = vpack.c.bf16 %v5035_v52, %v5035_v52  ;;  %1361 = vmatpush.bf16.msra.mxu2 %v1187_v1  ;;  %1379 = vmatpush.bf16.msra.mxu3 %v1190_v2  ;;  %v1602_v6 = vunpack.c.l.b16 %v1580_v51  ;;  %v1603_v55 = vunpack.c.h.b16 %v1580_v51 }
 0x6c0   :  { %v1618_v7 = vpack.c.b16 %v1602_v6, %v1602_v6  ;;  %v1619_v9 = vpack.c.b16 %v1603_v55, %v1603_v55 }
 0x6c8   :  { %4080 = vmatmul.msk.bf16.gmra.mxu2 %vm144_vm2, %v5039_v62  ;;  %4082 = vmatmul.msk.bf16.gmra.mxu3 %vm144_vm2, %v5039_v62 }
 0x6c9   :  { %4084 = vmatmul.msk.bf16.gmra.mxu0 %vm144_vm2, %v5039_v62  ;;  %4086 = vmatmul.msk.bf16.gmra.mxu1 %vm144_vm2, %v5039_v62 }
 0x6d8   :  { %4087 = vmatmul.msk.bf16.vlgmr.msrb.gmra.mxu2 %vm144_vm2, %v5024_v31  ;;  %4089 = vmatmul.msk.bf16.vlgmr.msrb.gmra.mxu3 %vm144_vm2, %v5024_v31 }
 0x6d9   :  { %4091 = vmatmul.msk.bf16.vlgmr.msra.gmra.mxu0 %vm144_vm2, %v5024_v31  ;;  %4093 = vmatmul.msk.bf16.vlgmr.msrb.gmra.mxu1 %vm144_vm2, %v5024_v31 }
 0x6da   :  { %1433 = vmatpush.bf16.msrb.mxu2 %v1199_v11  ;;  %1451 = vmatpush.bf16.msrb.mxu3 %v1202_v16 }
 0x6db   :  { %1469 = vmatpush.bf16.msra.mxu0 %v1205_v17  ;;  %1487 = vmatpush.bf16.msrb.mxu1 %v1208_v26 }
 0x6e8   :  { %4088 = vmatmul.msk.bf16.gmra.mxu2 %vm144_vm2, %v5039_v62  ;;  %4090 = vmatmul.msk.bf16.gmra.mxu3 %vm144_vm2, %v5039_v62 }
 0x6e9   :  { %4092 = vmatmul.msk.bf16.gmra.mxu0 %vm144_vm2, %v5039_v62  ;;  %4094 = vmatmul.msk.bf16.gmra.mxu1 %vm144_vm2, %v5039_v62 }
 0x6f8   :  { %4095 = vmatmul.msk.bf16.vlgmr.msra.gmra.mxu2 %vm144_vm2, %v5024_v31  ;;  %4097 = vmatmul.msk.bf16.vlgmr.msra.gmra.mxu3 %vm144_vm2, %v5024_v31 }
 0x6f9   :  { %4099 = vmatmul.msk.bf16.vlgmr.msrb.gmra.mxu0 %vm144_vm2, %v5024_v31  ;;  %4101 = vmatmul.msk.bf16.vlgmr.msra.gmra.mxu1 %vm144_vm2, %v5024_v31 }
 0x6fa   :  { %1689 = vmatpush.bf16.xpose.msrb.mxu0 %v1616_v3  ;;  %1707 = vmatpush.bf16.xpose.msra.mxu1 %v1617_v60 }
 0x6fb   :  { %1653 = vmatpush.bf16.xpose.msra.mxu2 %v1614_v56  ;;  %1671 = vmatpush.bf16.xpose.msra.mxu3 %v1615_v37 }
 0x708   :  { %4096 = vmatmul.msk.bf16.gmra.mxu2 %vm144_vm2, %v5039_v62  ;;  %4098 = vmatmul.msk.bf16.gmra.mxu3 %vm144_vm2, %v5039_v62 }
 0x709   :  { %4100 = vmatmul.msk.bf16.gmra.mxu0 %vm144_vm2, %v5039_v62  ;;  %4102 = vmatmul.msk.bf16.gmra.mxu1 %vm144_vm2, %v5039_v62 }
 0x718   :  { %4103 = vmatmul.msk.bf16.vlgmr.msrb.gmra.mxu2 %vm144_vm2, %v5024_v31  ;;  %4105 = vmatmul.msk.bf16.vlgmr.msrb.gmra.mxu3 %vm144_vm2, %v5024_v31 }
 0x719   :  { %4107 = vmatmul.msk.bf16.vlgmr.msra.gmra.mxu0 %vm144_vm2, %v5024_v31  ;;  %4109 = vmatmul.msk.bf16.vlgmr.msrb.gmra.mxu1 %vm144_vm2, %v5024_v31 }
 0x71a   :  { %1761 = vmatpush.bf16.xpose.msra.mxu0 %v1620_v57  ;;  %1779 = vmatpush.bf16.xpose.msrb.mxu1 %v1621_v34 }
 0x71b   :  { %1725 = vmatpush.bf16.xpose.msrb.mxu2 %v1618_v7  ;;  %1743 = vmatpush.bf16.xpose.msrb.mxu3 %v1619_v9 }
 0x728   :  { %4104 = vmatmul.msk.bf16.gmra.mxu2 %vm144_vm2, %v5039_v62  ;;  %4106 = vmatmul.msk.bf16.gmra.mxu3 %vm144_vm2, %v5039_v62 }
 0x729   :  { %4108 = vmatmul.msk.bf16.gmra.mxu0 %vm144_vm2, %v5039_v62  ;;  %4110 = vmatmul.msk.bf16.gmra.mxu1 %vm144_vm2, %v5039_v62 }
 0x736   :  { %v1255_v23 = vpop.f32.mrf.mxu0  ;;  %v1273_v8 = vpop.f32.mrf.mxu1 }
 0x737   :  { %v1256_v58 = vadd.f32 %v1255_v23, %v1086_v38  ;;  %v1274_v62 = vadd.f32 %v1273_v8, %v1087_v40 }
 0x739   :  { %v1500_v0 = vmax.f32 %v1256_v58, 0.0  ;;  %v1501_v1 = vmax.f32 %v1274_v62, 0.0 }
 0x73b   :  { %v1219_v27 = vpop.f32.mrf.mxu2  ;;  %v1237_v31 = vpop.f32.mrf.mxu3 }
 0x73c   :  { %v1220_v48 = vadd.f32 %v1219_v27, %v1084_v35  ;;  %v1238_v12 = vadd.f32 %v1237_v31, %v1085_v53 }
 0x73e   :  { %v1257_v10 = vpop.f32.mrf.mxu0  ;;  %v1275_v30 = vpop.f32.mrf.mxu1  ;;  %v1498_v13 = vmax.f32 %v1220_v48, 0.0  ;;  %v1499_v11 = vmax.f32 %v1238_v12, 0.0 }
 0x73f   :  { %v1258_v32 = vadd.f32 %v1257_v10, %v1086_v38  ;;  %v1276_v28 = vadd.f32 %v1275_v30, %v1087_v40  ;;  %v1090_v10 = vperm.slane %v5126_v59, 6  ;;  %v1091_v30 = vperm.slane %v5126_v59, 7 }
 0x741   :  { %v1516_v2 = vmax.f32 %v1258_v32, 0.0  ;;  %v1517_v14 = vmax.f32 %v1276_v28, 0.0 }
 0x743   :  { %v1548_v54 = vpack.c.bf16 %v1516_v2, %v1500_v0  ;;  %v1549_v29 = vpack.c.bf16 %v1517_v14, %v1501_v1  ;;  %v1221_v43 = vpop.f32.mrf.mxu2  ;;  %v1239_v61 = vpop.f32.mrf.mxu3  ;;  %v1088_v2 = vperm.slane %v5126_v59, 4  ;;  %v1089_v14 = vperm.slane %v5126_v59, 5 }
 0x744   :  { %v1222_v19 = vadd.f32 %v1221_v43, %v1084_v35  ;;  %v1240_v49 = vadd.f32 %v1239_v61, %v1085_v53 }
 0x745   :  { %1690 = vmatmul.bf16.vlgmr.msrb.gmra.mxu0 %v1548_v54  ;;  %1708 = vmatmul.bf16.vlgmr.msra.gmra.mxu1 %v1549_v29  ;;  %v1582_v54 = vld [vmem:[%s5846_s14 + $0x20] sm:$0xff] }
 0x746   :  { %v1514_v16 = vmax.f32 %v1222_v19, 0.0  ;;  %v1515_v17 = vmax.f32 %v1240_v49, 0.0  ;;  %v1260_v26 = vpop.f32.mrf.mxu0  ;;  %v1278_v24 = vpop.f32.mrf.mxu1  ;;  %v1606_v29 = vunpack.c.l.b16 %v1582_v54  ;;  %v1607_v43 = vunpack.c.h.b16 %v1582_v54 }
 0x747   :  { %v1261_v3 = vadd.f32 %v1260_v26, %v1086_v38  ;;  %v1279_v60 = vadd.f32 %v1278_v24, %v1087_v40 }
 0x748   :  { %v1546_v4 = vpack.c.bf16 %v1514_v16, %v1498_v13  ;;  %v1547_v15 = vpack.c.bf16 %v1515_v17, %v1499_v11  ;;  %v1622_v17 = vpack.c.b16 %v1606_v29, %v1606_v29  ;;  %v1623_v59 = vpack.c.b16 %v1607_v43, %v1607_v43 }
 0x749   :  { %v1532_v37 = vmax.f32 %v1261_v3, 0.0  ;;  %v1533_v23 = vmax.f32 %v1279_v60, 0.0 }
 0x74a   :  { %1654 = vmatmul.bf16.vlgmr.msra.gmra.mxu2 %v1546_v4  ;;  %1672 = vmatmul.bf16.vlgmr.msra.gmra.mxu3 %v1547_v15 }
 0x74b   :  { %v1224_v25 = vpop.f32.mrf.mxu2  ;;  %v1242_v36 = vpop.f32.mrf.mxu3  ;;  %v1564_v42 = vpack.c.bf16 %v1532_v37, %v1532_v37  ;;  %v1565_v5 = vpack.c.bf16 %v1533_v23, %v1533_v23  ;;  %1797 = vmatpush.bf16.xpose.msra.mxu2 %v1622_v17  ;;  %1815 = vmatpush.bf16.xpose.msra.mxu3 %v1623_v59 }
 0x74c   :  { %v1225_v8 = vadd.f32 %v1224_v25, %v1084_v35  ;;  %v1243_v39 = vadd.f32 %v1242_v36, %v1085_v53  ;;  %v1583_v35 = vld [vmem:[%s5846_s14 + $0x28] sm:$0xff] }
 0x74d   :  { %v1608_v53 = vunpack.c.l.b16 %v1583_v35  ;;  %v1609_v32 = vunpack.c.h.b16 %v1583_v35 }
 0x74e   :  { %v1262_v21 = vpop.f32.mrf.mxu0  ;;  %v1280_v56 = vpop.f32.mrf.mxu1  ;;  %v1530_v57 = vmax.f32 %v1225_v8, 0.0  ;;  %v1531_v34 = vmax.f32 %v1243_v39, 0.0 }
 0x74f   :  { %v1624_v6 = vpack.c.b16 %v1608_v53, %v1608_v53  ;;  %v1625_v55 = vpack.c.b16 %v1609_v32, %v1609_v32 }
 0x750   :  { %v1562_v38 = vpack.c.bf16 %v1530_v57, %v1530_v57  ;;  %v1563_v40 = vpack.c.bf16 %v1531_v34, %v1531_v34 }
 0x751   :  { %1833 = vmatpush.bf16.xpose.msrb.mxu0 %v1624_v6  ;;  %1851 = vmatpush.bf16.xpose.msra.mxu1 %v1625_v55 }
 0x753   :  { %v1226_v27 = vpop.f32.mrf.mxu2  ;;  %v1244_v31 = vpop.f32.mrf.mxu3 }
 0x755   :  { %1695 = vmatmul.bf16.gmra.mxu0 %v1564_v42  ;;  %1713 = vmatmul.bf16.gmra.mxu1 %v1565_v5 }
 0x756   :  { %v1327_v58 = vpop.f32.mrf.mxu0  ;;  %v1345_v62 = vpop.f32.mrf.mxu1 }
 0x757   :  { %v1328_v0 = vadd.f32 %v1327_v58, %v1090_v10  ;;  %v1346_v1 = vadd.f32 %v1345_v62, %v1091_v30 }
 0x759   :  { %v1504_v61 = vmax.f32 %v1328_v0, 0.0  ;;  %v1505_v19 = vmax.f32 %v1346_v1, 0.0 }
 0x75a   :  { %1659 = vmatmul.bf16.gmra.mxu2 %v1562_v38  ;;  %1677 = vmatmul.bf16.gmra.mxu3 %v1563_v40 }
 0x75b   :  { %v1291_v28 = vpop.f32.mrf.mxu2  ;;  %v1309_v51 = vpop.f32.mrf.mxu3 }
 0x75c   :  { %v1292_v11 = vadd.f32 %v1291_v28, %v1088_v2  ;;  %v1310_v16 = vadd.f32 %v1309_v51, %v1089_v14 }
 0x75e   :  { %v1329_v48 = vpop.f32.mrf.mxu0  ;;  %v1347_v12 = vpop.f32.mrf.mxu1  ;;  %v1502_v25 = vmax.f32 %v1292_v11, 0.0  ;;  %v1503_v36 = vmax.f32 %v1310_v16, 0.0 }
 0x75f   :  { %v1330_v7 = vadd.f32 %v1329_v48, %v1090_v10  ;;  %v1348_v9 = vadd.f32 %v1347_v12, %v1091_v30  ;;  %v1585_v48 = vld [vmem:[%s5846_s14 + $0x38] sm:$0xff] }
 0x760   :  { %v1612_v12 = vunpack.c.l.b16 %v1585_v48 }
 0x761   :  { %v1520_v49 = vmax.f32 %v1330_v7, 0.0  ;;  %v1521_v13 = vmax.f32 %v1348_v9, 0.0  ;;  %v1613_v7 = vunpack.c.h.b16 %v1585_v48 }
 0x762   :  { %v1628_v29 = vpack.c.b16 %v1612_v12, %v1612_v12 }
 0x763   :  { %v1552_v26 = vpack.c.bf16 %v1520_v49, %v1504_v61  ;;  %v1553_v24 = vpack.c.bf16 %v1521_v13, %v1505_v19  ;;  %v1293_v4 = vpop.f32.mrf.mxu2  ;;  %v1311_v15 = vpop.f32.mrf.mxu3  ;;  %v1629_v43 = vpack.c.b16 %v1613_v7, %v1613_v7 }
 0x764   :  { %v1294_v3 = vadd.f32 %v1293_v4, %v1088_v2  ;;  %v1312_v60 = vadd.f32 %v1311_v15, %v1089_v14 }
 0x765   :  { %1762 = vmatmul.bf16.vlgmr.msra.gmra.mxu0 %v1552_v26  ;;  %1780 = vmatmul.bf16.vlgmr.msrb.gmra.mxu1 %v1553_v24  ;;  %v1584_v26 = vld [vmem:[%s5846_s14 + $0x30] sm:$0xff] }
 0x766   :  { %v1518_v21 = vmax.f32 %v1294_v3, 0.0  ;;  %v1519_v56 = vmax.f32 %v1312_v60, 0.0  ;;  %v1332_v37 = vpop.f32.mrf.mxu0  ;;  %v1350_v23 = vpop.f32.mrf.mxu1  ;;  %1905 = vmatpush.bf16.xpose.msra.mxu0 %v1628_v29  ;;  %1923 = vmatpush.bf16.xpose.msrb.mxu1 %v1629_v43  ;;  %v1610_v24 = vunpack.c.l.b16 %v1584_v26  ;;  %v1611_v4 = vunpack.c.h.b16 %v1584_v26 }
 0x767   :  { %v1333_v42 = vadd.f32 %v1332_v37, %v1090_v10  ;;  %v1351_v5 = vadd.f32 %v1350_v23, %v1091_v30  ;;  %v5151_v10 = vld [vmem:[%s5847_s13 + $0x8] sm:$0xff] }
 0x768   :  { %v1550_v8 = vpack.c.bf16 %v1518_v21, %v1502_v25  ;;  %v1551_v39 = vpack.c.bf16 %v1519_v56, %v1503_v36  ;;  %v1092_v49 = vperm.slane %v5151_v10, 0  ;;  %v1093_v13 = vperm.slane %v5151_v10, 1 }
 0x769   :  { %v1536_v58 = vmax.f32 %v1333_v42, 0.0  ;;  %v1537_v62 = vmax.f32 %v1351_v5, 0.0  ;;  %v1626_v56 = vpack.c.b16 %v1610_v24, %v1610_v24  ;;  %v1627_v37 = vpack.c.b16 %v1611_v4, %v1611_v4 }
 0x76a   :  { %1726 = vmatmul.bf16.vlgmr.msrb.gmra.mxu2 %v1550_v8  ;;  %1744 = vmatmul.bf16.vlgmr.msrb.gmra.mxu3 %v1551_v39  ;;  %v1096_v24 = vperm.slane %v5151_v10, 4  ;;  %v1097_v4 = vperm.slane %v5151_v10, 5 }
 0x76b   :  { %v1296_v27 = vpop.f32.mrf.mxu2  ;;  %v1314_v31 = vpop.f32.mrf.mxu3  ;;  %v1568_v35 = vpack.c.bf16 %v1536_v58, %v1536_v58  ;;  %v1569_v53 = vpack.c.bf16 %v1537_v62, %v1537_v62  ;;  %1869 = vmatpush.bf16.xpose.msrb.mxu2 %v1626_v56  ;;  %1887 = vmatpush.bf16.xpose.msrb.mxu3 %v1627_v37 }
 0x76c   :  { %v1297_v38 = vadd.f32 %v1296_v27, %v1088_v2  ;;  %v1315_v40 = vadd.f32 %v1314_v31, %v1089_v14  ;;  %v1094_v2 = vperm.slane %v5151_v10, 2  ;;  %v1095_v14 = vperm.slane %v5151_v10, 3 }
 0x76e   :  { %v1334_v57 = vpop.f32.mrf.mxu0  ;;  %v1352_v34 = vpop.f32.mrf.mxu1  ;;  %v1534_v51 = vmax.f32 %v1297_v38, 0.0  ;;  %v1535_v6 = vmax.f32 %v1315_v40, 0.0  ;;  %v4111_v40 = vld [vmem:[%s5883_s9 + $0x8] sm:$0xff] }
 0x770   :  { %v1566_v0 = vpack.c.bf16 %v1534_v51, %v1534_v51  ;;  %v1567_v1 = vpack.c.bf16 %v1535_v6, %v1535_v6 }
 0x773   :  { %v1298_v32 = vpop.f32.mrf.mxu2  ;;  %v1316_v28 = vpop.f32.mrf.mxu3 }
 0x775   :  { %1767 = vmatmul.bf16.gmra.mxu0 %v1568_v35  ;;  %1785 = vmatmul.bf16.gmra.mxu1 %v1569_v53 }
 0x776   :  { %v1399_v30 = vpop.f32.mrf.mxu0  ;;  %v1417_v55 = vpop.f32.mrf.mxu1 }
 0x777   :  { %v1400_v61 = vadd.f32 %v1399_v30, %v1094_v2  ;;  %v1418_v19 = vadd.f32 %v1417_v55, %v1095_v14 }
 0x779   :  { %v1508_v15 = vmax.f32 %v1400_v61, 0.0  ;;  %v1509_v3 = vmax.f32 %v1418_v19, 0.0 }
 0x77a   :  { %1731 = vmatmul.bf16.gmra.mxu2 %v1566_v0  ;;  %1749 = vmatmul.bf16.gmra.mxu3 %v1567_v1 }
 0x77b   :  { %v1363_v9 = vpop.f32.mrf.mxu2  ;;  %v1381_v54 = vpop.f32.mrf.mxu3 }
 0x77c   :  { %v1364_v36 = vadd.f32 %v1363_v9, %v1092_v49  ;;  %v1382_v21 = vadd.f32 %v1381_v54, %v1093_v13 }
 0x77e   :  { %v1401_v11 = vpop.f32.mrf.mxu0  ;;  %v1419_v16 = vpop.f32.mrf.mxu1  ;;  %v1506_v31 = vmax.f32 %v1364_v36, 0.0  ;;  %v1507_v57 = vmax.f32 %v1382_v21, 0.0 }
 0x77f   :  { %v1402_v17 = vadd.f32 %v1401_v11, %v1094_v2  ;;  %v1420_v59 = vadd.f32 %v1419_v16, %v1095_v14  ;;  %v1098_v16 = vperm.slane %v5151_v10, 6 }
 0x781   :  { %v1524_v60 = vmax.f32 %v1402_v17, 0.0  ;;  %v1525_v25 = vmax.f32 %v1420_v59, 0.0  ;;  %v1099_v17 = vperm.slane %v5151_v10, 7 }
 0x783   :  { %v1556_v23 = vpack.c.bf16 %v1524_v60, %v1508_v15  ;;  %v1557_v8 = vpack.c.bf16 %v1525_v25, %v1509_v3  ;;  %v1365_v39 = vpop.f32.mrf.mxu2  ;;  %v1383_v42 = vpop.f32.mrf.mxu3 }
 0x784   :  { %v1366_v5 = vadd.f32 %v1365_v39, %v1092_v49  ;;  %v1384_v27 = vadd.f32 %v1383_v42, %v1093_v13 }
 0x785   :  { %1834 = vmatmul.bf16.vlgmr.msrb.gmra.mxu0 %v1556_v23  ;;  %1852 = vmatmul.bf16.vlgmr.msra.gmra.mxu1 %v1557_v8 }
 0x786   :  { %v1522_v34 = vmax.f32 %v1366_v5, 0.0  ;;  %v1523_v58 = vmax.f32 %v1384_v27, 0.0  ;;  %v1404_v62 = vpop.f32.mrf.mxu0  ;;  %v1422_v38 = vpop.f32.mrf.mxu1 }
 0x787   :  { %v1405_v32 = vadd.f32 %v1404_v62, %v1094_v2  ;;  %v1423_v28 = vadd.f32 %v1422_v38, %v1095_v14 }
 0x788   :  { %v1554_v35 = vpack.c.bf16 %v1522_v34, %v1506_v31  ;;  %v1555_v53 = vpack.c.bf16 %v1523_v58, %v1507_v57 }
 0x789   :  { %v1540_v0 = vmax.f32 %v1405_v32, 0.0  ;;  %v1541_v1 = vmax.f32 %v1423_v28, 0.0 }
 0x78a   :  { %1798 = vmatmul.bf16.vlgmr.msra.gmra.mxu2 %v1554_v35  ;;  %1816 = vmatmul.bf16.vlgmr.msra.gmra.mxu3 %v1555_v53 }
 0x78b   :  { %v1368_v51 = vpop.f32.mrf.mxu2  ;;  %v1386_v6 = vpop.f32.mrf.mxu3  ;;  %2052 = vmatpush.msra.mxu2 %v4111_v40  ;;  %v1572_v7 = vpack.c.bf16 %v1540_v0, %v1540_v0  ;;  %v1573_v9 = vpack.c.bf16 %v1541_v1, %v1541_v1 }
 0x78c   :  { %v1369_v48 = vadd.f32 %v1368_v51, %v1092_v49  ;;  %v1387_v12 = vadd.f32 %v1386_v6, %v1093_v13 }
 0x78e   :  { %v1406_v30 = vpop.f32.mrf.mxu0  ;;  %v1424_v55 = vpop.f32.mrf.mxu1  ;;  %v1538_v43 = vmax.f32 %v1369_v48, 0.0  ;;  %v1539_v61 = vmax.f32 %v1387_v12, 0.0 }
 0x790   :  { %v1570_v14 = vpack.c.bf16 %v1538_v43, %v1538_v43  ;;  %v1571_v11 = vpack.c.bf16 %v1539_v61, %v1539_v61 }
 0x793   :  { %v1370_v54 = vpop.f32.mrf.mxu2  ;;  %v1388_v29 = vpop.f32.mrf.mxu3 }
 0x795   :  { %1839 = vmatmul.bf16.gmra.mxu0 %v1572_v7  ;;  %1857 = vmatmul.bf16.gmra.mxu1 %v1573_v9 }
 0x796   :  { %v1471_v19 = vpop.f32.mrf.mxu0  ;;  %v1489_v2 = vpop.f32.mrf.mxu1 }
 0x797   :  { %v1472_v59 = vadd.f32 %v1471_v19, %v1098_v16  ;;  %v1490_v26 = vadd.f32 %v1489_v2, %v1099_v17 }
 0x799   :  { %v1512_v36 = vmax.f32 %v1472_v59, 0.0  ;;  %v1513_v21 = vmax.f32 %v1490_v26, 0.0 }
 0x79a   :  { %1803 = vmatmul.bf16.gmra.mxu2 %v1570_v14  ;;  %1821 = vmatmul.bf16.gmra.mxu3 %v1571_v11 }
 0x79b   :  { %v1435_v49 = vpop.f32.mrf.mxu2  ;;  %v1453_v13 = vpop.f32.mrf.mxu3 }
 0x79c   :  { %v1436_v23 = vadd.f32 %v1435_v49, %v1096_v24  ;;  %v1454_v8 = vadd.f32 %v1453_v13, %v1097_v4  ;;  %v4283_v49 = vld [vmem:[%s5848_s15] ss:$0 sm:$0xff] }
 0x79e   :  { %v1473_v15 = vpop.f32.mrf.mxu0  ;;  %v1491_v3 = vpop.f32.mrf.mxu1  ;;  %v1510_v34 = vmax.f32 %v1436_v23, 0.0  ;;  %v1511_v10 = vmax.f32 %v1454_v8, 0.0 }
 0x79f   :  { %v1474_v60 = vadd.f32 %v1473_v15, %v1098_v16  ;;  %v1492_v25 = vadd.f32 %v1491_v3, %v1099_v17 }
 0x7a1   :  { %v1528_v56 = vmax.f32 %v1474_v60, 0.0  ;;  %v1529_v37 = vmax.f32 %v1492_v25, 0.0 }
 0x7a3   :  { %v1560_v39 = vpack.c.bf16 %v1528_v56, %v1512_v36  ;;  %v1561_v42 = vpack.c.bf16 %v1529_v37, %v1513_v21  ;;  %v1437_v5 = vpop.f32.mrf.mxu2  ;;  %v1455_v27 = vpop.f32.mrf.mxu3 }
 0x7a4   :  { %v1438_v31 = vadd.f32 %v1437_v5, %v1096_v24  ;;  %v1456_v57 = vadd.f32 %v1455_v27, %v1097_v4 }
 0x7a5   :  { %1906 = vmatmul.bf16.vlgmr.msra.gmra.mxu0 %v1560_v39  ;;  %1924 = vmatmul.bf16.vlgmr.msrb.gmra.mxu1 %v1561_v42 }
 0x7a6   :  { %v1526_v58 = vmax.f32 %v1438_v31, 0.0  ;;  %v1527_v62 = vmax.f32 %v1456_v57, 0.0  ;;  %v1476_v38 = vpop.f32.mrf.mxu0  ;;  %v1494_v40 = vpop.f32.mrf.mxu1 }
 0x7a7   :  { %v1477_v32 = vadd.f32 %v1476_v38, %v1098_v16  ;;  %v1495_v28 = vadd.f32 %v1494_v40, %v1099_v17 }
 0x7a8   :  { %v1558_v35 = vpack.c.bf16 %v1526_v58, %v1510_v34  ;;  %v1559_v53 = vpack.c.bf16 %v1527_v62, %v1511_v10 }
 0x7a9   :  { %v1544_v0 = vmax.f32 %v1477_v32, 0.0  ;;  %v1545_v1 = vmax.f32 %v1495_v28, 0.0 }
 0x7aa   :  { %1870 = vmatmul.bf16.vlgmr.msrb.gmra.mxu2 %v1558_v35  ;;  %1888 = vmatmul.bf16.vlgmr.msrb.gmra.mxu3 %v1559_v53 }
 0x7ab   :  { %v1440_v51 = vpop.f32.mrf.mxu2  ;;  %v1458_v6 = vpop.f32.mrf.mxu3  ;;  %v1576_v7 = vpack.c.bf16 %v1544_v0, %v1544_v0  ;;  %v1577_v9 = vpack.c.bf16 %v1545_v1, %v1545_v1 }
 0x7ac   :  { %v1441_v48 = vadd.f32 %v1440_v51, %v1096_v24  ;;  %v1459_v12 = vadd.f32 %v1458_v6, %v1097_v4 }
 0x7ae   :  { %v1478_v30 = vpop.f32.mrf.mxu0  ;;  %v1496_v55 = vpop.f32.mrf.mxu1  ;;  %v1542_v43 = vmax.f32 %v1441_v48, 0.0  ;;  %v1543_v61 = vmax.f32 %v1459_v12, 0.0 }
 0x7b0   :  { %v1574_v19 = vpack.c.bf16 %v1542_v43, %v1542_v43  ;;  %v1575_v2 = vpack.c.bf16 %v1543_v61, %v1543_v61 }
 0x7b3   :  { %v1442_v54 = vpop.f32.mrf.mxu2  ;;  %v1460_v29 = vpop.f32.mrf.mxu3 }
 0x7b5   :  { %1911 = vmatmul.bf16.gmra.mxu0 %v1576_v7  ;;  %1929 = vmatmul.bf16.gmra.mxu1 %v1577_v9 }
 0x7ba   :  { %1875 = vmatmul.bf16.gmra.mxu2 %v1574_v19  ;;  %1893 = vmatmul.bf16.gmra.mxu3 %v1575_v2 }
 0x7c2   :  { %v1691_v14 = vpop.f32.mrf.mxu0  ;;  %v1709_v11 = vpop.f32.mrf.mxu1 }
 0x7ca   :  { %v1693_v16 = vpop.f32.mrf.mxu0  ;;  %v1711_v17 = vpop.f32.mrf.mxu1 }
 0x7cd   :  { %v1655_v13 = vpop.f32.mrf.mxu2  ;;  %v1673_v59 = vpop.f32.mrf.mxu3 }
 0x7ce   :  { %v1656_v26 = vadd.f32 %v4283_v49, %v1655_v13 }
 0x7d0   :  { %v1674_v24 = vadd.f32 %v1673_v59, %v1656_v26 }
 0x7d2   :  { %v1692_v4 = vadd.f32 %v1691_v14, %v1674_v24  ;;  %v1696_v15 = vpop.f32.mrf.mxu0  ;;  %v1714_v3 = vpop.f32.mrf.mxu1 }
 0x7d4   :  { %v1710_v60 = vadd.f32 %v1709_v11, %v1692_v4 }
 0x7d5   :  { %v1657_v25 = vpop.f32.mrf.mxu2  ;;  %v1675_v36 = vpop.f32.mrf.mxu3 }
 0x7d6   :  { %v1658_v11 = vadd.f32 %v4283_v49, %v1657_v25 }
 0x7d8   :  { %v1676_v26 = vadd.f32 %v1675_v36, %v1658_v11 }
 0x7da   :  { %v1698_v21 = vpop.f32.mrf.mxu0  ;;  %v1716_v56 = vpop.f32.mrf.mxu1 }
 0x7dd   :  { %v1660_v37 = vpop.f32.mrf.mxu2  ;;  %v1678_v23 = vpop.f32.mrf.mxu3 }
 0x7de   :  { %v1661_v8 = vadd.f32 %v4283_v49, %v1660_v37 }
 0x7e0   :  { %v1679_v39 = vadd.f32 %v1678_v23, %v1661_v8 }
 0x7e2   :  { %v1697_v42 = vadd.f32 %v1696_v15, %v1679_v39  ;;  %v1763_v5 = vpop.f32.mrf.mxu0  ;;  %v1781_v27 = vpop.f32.mrf.mxu1  ;;  %v1694_v15 = vadd.f32 %v1693_v16, %v1676_v26 }
 0x7e4   :  { %v1715_v31 = vadd.f32 %v1714_v3, %v1697_v42  ;;  %v1712_v21 = vadd.f32 %v1711_v17, %v1694_v15 }
 0x7e5   :  { %v1662_v57 = vpop.f32.mrf.mxu2  ;;  %v1680_v34 = vpop.f32.mrf.mxu3 }
 0x7ea   :  { %v1765_v10 = vpop.f32.mrf.mxu0  ;;  %v1783_v58 = vpop.f32.mrf.mxu1 }
 0x7ed   :  { %v1727_v62 = vpop.f32.mrf.mxu2  ;;  %v1745_v38 = vpop.f32.mrf.mxu3 }
 0x7ee   :  { %v1728_v40 = vadd.f32 %v1727_v62, %v1710_v60 }
 0x7f0   :  { %v1746_v35 = vadd.f32 %v1745_v38, %v1728_v40 }
 0x7f2   :  { %v1764_v53 = vadd.f32 %v1763_v5, %v1746_v35  ;;  %v1768_v32 = vpop.f32.mrf.mxu0  ;;  %v1786_v28 = vpop.f32.mrf.mxu1 }
 0x7f4   :  { %v1782_v51 = vadd.f32 %v1781_v27, %v1764_v53 }
 0x7f5   :  { %v1729_v6 = vpop.f32.mrf.mxu2  ;;  %v1747_v30 = vpop.f32.mrf.mxu3 }
 0x7f6   :  { %v1730_v56 = vadd.f32 %v1729_v6, %v1712_v21 }
 0x7f8   :  { %v1748_v42 = vadd.f32 %v1747_v30, %v1730_v56 }
 0x7fa   :  { %v1770_v55 = vpop.f32.mrf.mxu0  ;;  %v1788_v0 = vpop.f32.mrf.mxu1  ;;  %v1766_v27 = vadd.f32 %v1765_v10, %v1748_v42 }
 0x7fc   :  { %v1784_v36 = vadd.f32 %v1783_v58, %v1766_v27 }
 0x7fd   :  { %v1732_v1 = vpop.f32.mrf.mxu2  ;;  %v1750_v48 = vpop.f32.mrf.mxu3 }
 0x7fe   :  { %v1733_v12 = vadd.f32 %v1732_v1, %v1715_v31 }
 0x800   :  { %v1751_v7 = vadd.f32 %v1750_v48, %v1733_v12 }
 0x802   :  { %v1769_v9 = vadd.f32 %v1768_v32, %v1751_v7  ;;  %v1835_v54 = vpop.f32.mrf.mxu0  ;;  %v1853_v29 = vpop.f32.mrf.mxu1 }
 0x804   :  { %v1787_v43 = vadd.f32 %v1786_v28, %v1769_v9 }
 0x805   :  { %v1734_v61 = vpop.f32.mrf.mxu2  ;;  %v1752_v19 = vpop.f32.mrf.mxu3 }
 0x80a   :  { %v1837_v2 = vpop.f32.mrf.mxu0  ;;  %v1855_v14 = vpop.f32.mrf.mxu1 }
 0x80d   :  { %v1799_v13 = vpop.f32.mrf.mxu2  ;;  %v1817_v59 = vpop.f32.mrf.mxu3 }
 0x80e   :  { %v1800_v5 = vadd.f32 %v1799_v13, %v1782_v51 }
 0x810   :  { %v1818_v49 = vadd.f32 %v1817_v59, %v1800_v5 }
 0x812   :  { %v1840_v24 = vpop.f32.mrf.mxu0  ;;  %v1858_v4 = vpop.f32.mrf.mxu1  ;;  %v1836_v62 = vadd.f32 %v1835_v54, %v1818_v49 }
 0x814   :  { %v1854_v17 = vadd.f32 %v1853_v29, %v1836_v62 }
 0x815   :  { %v1801_v3 = vpop.f32.mrf.mxu2  ;;  %v1819_v60 = vpop.f32.mrf.mxu3 }
 0x816   :  { %v1802_v38 = vadd.f32 %v1801_v3, %v1784_v36 }
 0x818   :  { %v1820_v35 = vadd.f32 %v1819_v60, %v1802_v38 }
 0x81a   :  { %v1842_v37 = vpop.f32.mrf.mxu0  ;;  %v1860_v23 = vpop.f32.mrf.mxu1  ;;  %v1838_v6 = vadd.f32 %v1837_v2, %v1820_v35 }
 0x81c   :  { %v1856_v48 = vadd.f32 %v1855_v14, %v1838_v6 }
 0x81d   :  { %v1804_v8 = vpop.f32.mrf.mxu2  ;;  %v1822_v39 = vpop.f32.mrf.mxu3 }
 0x81e   :  { %v1805_v55 = vadd.f32 %v1804_v8, %v1787_v43 }
 0x820   :  { %v1823_v1 = vadd.f32 %v1822_v39, %v1805_v55 }
 0x822   :  { %v1907_v31 = vpop.f32.mrf.mxu0  ;;  %v1925_v57 = vpop.f32.mrf.mxu1  ;;  %v1841_v61 = vadd.f32 %v1840_v24, %v1823_v1 }
 0x824   :  { %v1859_v13 = vadd.f32 %v1858_v4, %v1841_v61  ;;  %v4285_v61 = vld [vmem:[%s5850_s17] ss:$0 sm:$0xff] }
 0x825   :  { %v1806_v25 = vpop.f32.mrf.mxu2  ;;  %v1824_v34 = vpop.f32.mrf.mxu3 }
 0x82a   :  { %v1909_v16 = vpop.f32.mrf.mxu0  ;;  %v1927_v40 = vpop.f32.mrf.mxu1 }
 0x82d   :  { %v1871_v53 = vpop.f32.mrf.mxu2  ;;  %v1889_v32 = vpop.f32.mrf.mxu3 }
 0x82e   :  { %v1872_v28 = vadd.f32 %v1871_v53, %v1854_v17 }
 0x830   :  { %v1890_v30 = vadd.f32 %v1889_v32, %v1872_v28 }
 0x832   :  { %v1908_v51 = vadd.f32 %v1907_v31, %v1890_v30  ;;  %v1912_v10 = vpop.f32.mrf.mxu0  ;;  %v1930_v0 = vpop.f32.mrf.mxu1 }
 0x834   :  { %v1926_v12 = vadd.f32 %v1925_v57, %v1908_v51 }
 0x835   :  { %v1873_v7 = vpop.f32.mrf.mxu2  ;;  %v1891_v58 = vpop.f32.mrf.mxu3 }
 0x836   :  { %v1874_v9 = vadd.f32 %v1873_v7, %v1856_v48  ;;  %v1934_v54 = vadd.f32 %v1926_v12, %v5018_v45 }
 0x838   :  { %v1892_v19 = vadd.f32 %v1891_v58, %v1874_v9  ;;  %v1939_v29 = vsel %vm144_vm2, %v1934_v54, 0.0  ;;  %v4284_v58 = vld [vmem:[%s5849_s16] ss:$0 sm:$0xff] }
 0x839   :  { %1940 = vadd.xlane.f32.xlu1 %v1939_v29 }
 0x83a   :  { %v1910_v11 = vadd.f32 %v1909_v16, %v1892_v19  ;;  %v1914_v2 = vpop.f32.mrf.mxu0  ;;  %v1932_v43 = vpop.f32.mrf.mxu1 }
 0x83c   :  { %v1928_v59 = vadd.f32 %v1927_v40, %v1910_v11 }
 0x83d   :  { %v1876_v26 = vpop.f32.mrf.mxu2  ;;  %v1894_v15 = vpop.f32.mrf.mxu3 }
 0x83e   :  { %v1877_v3 = vadd.f32 %v1876_v26, %v1859_v13  ;;  %v1935_v14 = vadd.f32 %v1928_v59, %v5020_v50 }
 0x840   :  { %v1895_v60 = vadd.f32 %v1894_v15, %v1877_v3  ;;  %v1942_v21 = vsel %vm144_vm2, %v1935_v14, 0.0 }
 0x841   :  { %1943 = vadd.xlane.f32.xlu0 %v1942_v21 }
 0x842   :  { %v1913_v45 = vadd.f32 %v1912_v10, %v1895_v60 }
 0x844   :  { %v1931_v24 = vadd.f32 %v1930_v0, %v1913_v45 }
 0x845   :  { %v1878_v56 = vpop.f32.mrf.mxu2  ;;  %v1896_v37 = vpop.f32.mrf.mxu3 }
 0x846   :  { %v1936_v23 = vadd.f32 %v1931_v24, %v5035_v52 }
 0x848   :  { %v1945_v8 = vsel %vm990_vm15, %v1936_v23, 0.0 }
 0x849   :  { %1946 = vadd.xlane.f32.xlu2 %v1945_v8 }
 0x8ac   :  { %v1941_v4 = vpop.xlane.xlu1 %1940 }
 0x8ad   :  { %v1948_v39 = vmul.f32 %v1941_v4, %v4967_v33 }
 0x8af   :  { %v1951_v42 = vsub.f32 %v1934_v54, %v1948_v39  ;;  %v4286_v39 = vld [vmem:[%s5886_s7 + $0x1] ss:$0 sm:$0xff] }
 0x8b1   :  { %v1954_v5 = vmul.f32 %v1951_v42, %v1951_v42 }
 0x8b3   :  { %v1957_v50 = vsel %vm144_vm2, %v1954_v5, 0.0 }
 0x8b4   :  { %v1944_v27 = vpop.xlane.xlu0 %1943  ;;  %1958 = vadd.xlane.f32.xlu1 %v1957_v50 }
 0x8b5   :  { %v1949_v31 = vmul.f32 %v1944_v27, %v4967_v33 }
 0x8b7   :  { %v1952_v57 = vsub.f32 %v1935_v14, %v1949_v31 }
 0x8b9   :  { %v1955_v49 = vmul.f32 %v1952_v57, %v1952_v57 }
 0x8bb   :  { %v1960_v25 = vsel %vm144_vm2, %v1955_v49, 0.0 }
 0x8bc   :  { %v1947_v34 = vpop.xlane.xlu2 %1946  ;;  %1961 = vadd.xlane.f32.xlu0 %v1960_v25 }
 0x8bd   :  { %v1950_v52 = vmul.f32 %v1947_v34, %v4967_v33 }
 0x8bf   :  { %v1953_v36 = vsub.f32 %v1936_v23, %v1950_v52 }
 0x8c1   :  { %v1956_v62 = vmul.f32 %v1953_v36, %v1953_v36 }
 0x8c3   :  { %v1963_v38 = vsel %vm990_vm15, %v1956_v62, 0.0 }
 0x8c4   :  { %1964 = vadd.xlane.f32.xlu2 %v1963_v38 }
 0x927   :  { %v1959_v16 = vpop.xlane.xlu1 %1958 }
 0x928   :  { %v1966_v40 = vmul.f32 %v1959_v16, %v4967_v33 }
 0x92a   :  { %v1969_v35 = vadd.f32 1e-05, %v1966_v40 }
 0x92c   :  { %4352 = vrsqrt.f32 %v1969_v35  ;;  %vm1978_vm8 = vweird.f32 %v1969_v35 }
 0x92f   :  { %v1962_v17 = vpop.xlane.xlu0 %1961 }
 0x930   :  { %v1967_v53 = vmul.f32 %v1962_v17, %v4967_v33 }
 0x932   :  { %v4353_v32 = vpop.eup %4352  ;;  %v1970_v28 = vadd.f32 1e-05, %v1967_v53 }
 0x933   :  { %v1973_v6 = vmul.f32 %v4353_v32, %v1969_v35  ;;  %vm1979_vm7 = vweird.f32 %v4353_v32  ;;  %v5257_v35 = vld [vmem:[%s5888_s29 + $0x8] sm:$0xff] }
 0x934   :  { %4354 = vrsqrt.f32 %v1970_v28  ;;  %vm1980_vm9 = vmor %vm1978_vm8, %vm1979_vm7  ;;  %vm1988_vm11 = vweird.f32 %v1970_v28  ;;  %v5261_v17 = vperm.slane %v5257_v35, 2 }
 0x935   :  { %v1974_v55 = vmul.f32 %v4353_v32, %v1973_v6 }
 0x937   :  { %v1975_v30 = vmul.f32 0.5, %v1974_v55  ;;  %v1965_v51 = vpop.xlane.xlu2 %1964 }
 0x938   :  { %v1968_v10 = vmul.f32 %v1965_v51, %v4967_v33 }
 0x939   :  { %v1976_v0 = vsub.f32 1.5, %v1975_v30 }
 0x93a   :  { %v4355_v1 = vpop.eup %4354  ;;  %v1971_v48 = vadd.f32 1e-05, %v1968_v10 }
 0x93b   :  { %v1977_v12 = vmul.f32 %v4353_v32, %v1976_v0  ;;  %v1983_v7 = vmul.f32 %v4355_v1, %v1970_v28  ;;  %vm1989_vm10 = vweird.f32 %v4355_v1  ;;  %v5281_v0 = vld [vmem:[%s5887_s2] sm:$0xff] }
 0x93c   :  { %4356 = vrsqrt.f32 %v1971_v48  ;;  %vm1990_vm12 = vmor %vm1988_vm11, %vm1989_vm10  ;;  %vm1998_vm14 = vweird.f32 %v1971_v48 }
 0x93d   :  { %v1981_v9 = vsel %vm1980_vm9, %v4353_v32, %v1977_v12  ;;  %v1984_v54 = vmul.f32 %v4355_v1, %v1983_v7  ;;  %v5265_v32 = vperm.slane %v5257_v35, 3  ;;  %v5288_v7 = vld [vmem:[%s5887_s2 + $0x8] sm:$0xff] }
 0x93e   :  { %v2002_v19 = vmul.f32 %v1981_v9, %v1951_v42 }
 0x93f   :  { %v1985_v29 = vmul.f32 0.5, %v1984_v54 }
 0x940   :  { %v2008_v11 = vmul.f32 %v4284_v58, %v2002_v19 }
 0x941   :  { %v1986_v2 = vsub.f32 1.5, %v1985_v29 }
 0x942   :  { %v4357_v43 = vpop.eup %4356  ;;  %v5194_v13 = vadd.f32 %v4285_v61, %v2008_v11 }
 0x943   :  { %v1987_v59 = vmul.f32 %v4355_v1, %v1986_v2  ;;  %v1993_v26 = vmul.f32 %v4357_v43, %v1971_v48  ;;  %vm1999_vm13 = vweird.f32 %v4357_v43 }
 0x944   :  { %4115 = vmatmul.msk.f32.vlgmr.msra.gmra.mxu2 %vm144_vm2, %v5194_v13  ;;  %vm2000_vm1 = vmor %vm1998_vm14, %vm1999_vm13 }
 0x945   :  { %v1991_v15 = vsel %vm1990_vm12, %v4355_v1, %v1987_v59  ;;  %v1994_v3 = vmul.f32 %v4357_v43, %v1993_v26 }
 0x946   :  { %v2003_v14 = vmul.f32 %v1991_v15, %v1952_v57 }
 0x947   :  { %v1995_v60 = vmul.f32 0.5, %v1994_v3 }
 0x948   :  { %v2009_v21 = vmul.f32 %v4284_v58, %v2003_v14 }
 0x949   :  { %v1996_v45 = vsub.f32 1.5, %v1995_v60 }
 0x94a   :  { %v5198_v24 = vadd.f32 %v4285_v61, %v2009_v21 }
 0x94b   :  { %v1997_v56 = vmul.f32 %v4357_v43, %v1996_v45 }
 0x94c   :  { %4116 = vmatmul.msk.f32.gmra.mxu2 %vm144_vm2, %v5198_v24 }
 0x94d   :  { %v2001_v37 = vsel %vm2000_vm1, %v4357_v43, %v1997_v56 }
 0x94e   :  { %v2004_v23 = vmul.f32 %v2001_v37, %v1953_v36 }
 0x950   :  { %v2010_v8 = vmul.f32 %v4284_v58, %v2004_v23 }
 0x952   :  { %v5202_v4 = vadd.f32 %v4285_v61, %v2010_v8  ;;  %v5295_v61 = vld [vmem:[%s5887_s2 + $0x10] sm:$0x3f]  ;;  %s5890_s2 = smov 122  }
 0x954   :  { %4117 = vmatmul.msk.f32.gmra.mxu2 %vm144_vm2, %v5202_v4 }
 0x9c7   :  { %v2054_v42 = vpop.f32.mrf.mxu2 }
 0x9c8   :  { %v5209_v5 = vadd.f32 %v4286_v39, %v2054_v42 }
 0x9ca   :  { %2229 = vrot.lane.b32.xlu2 %v5209_v5, %s4426_s25  ;;  %v5220_v49 = vmul.f32 0.70710677, %v5209_v5 }
 0x9cf   :  { %v2057_v50 = vpop.f32.mrf.mxu2 }
 0x9d0   :  { %v5213_v27 = vadd.f32 %v4286_v39, %v2057_v50 }
 0x9d2   :  { %2231 = vrot.lane.b32.xlu0 %v5213_v27, %s4426_s25  ;;  %v5232_v34 = vmul.f32 0.70710677, %v5213_v27 }
 0x9d7   :  { %v2060_v31 = vpop.f32.mrf.mxu2 }
 0x9d8   :  { %v5217_v57 = vadd.f32 %v4286_v39, %v2060_v31 }
 0x9da   :  { %2233 = vrot.lane.b32.xlu1 %v5217_v57, %s4426_s25  ;;  %2223 = vrot.lane.b32.xlu0 %v5220_v49, %s4428_s6  ;;  %v5227_v25 = vmul.f32 0.70710677, %v5217_v57 }
 0x9dc   :  { %2227 = vrot.lane.b32.xlu2 %v5227_v25, %s4428_s6 }
 0x9e2   :  { %2225 = vrot.lane.b32.xlu1 %v5232_v34, %s4428_s6  ;;  %2069 = vrot.lane.b32.xlu0 %v5209_v5, %s4429_s0 }
 0x9e4   :  { %2071 = vrot.lane.b32.xlu2 %v5213_v27, %s4429_s0 }
 0x9ea   :  { %2073 = vrot.lane.b32.xlu1 %v5217_v57, %s4429_s0 }
 0x9ec   :  { %2354 = vperm.xlu2 %4256, %v5217_v57  }
 0x9f2   :  { %2370 = vperm.xlu1 %4257, %v5217_v57  }
 0x9f4   :  { %4259 = vset.pattern.permute.xlu2 %v4425_v18 }
 0x9f5   :  { %2366 = vperm.xlu2 %4259, %v5213_v27  }
 0x9fa   :  { %4260 = vset.pattern.permute.xlu1 %v4427_v22 }
 0x9fd   :  { %2362 = vperm.xlu2 %4259, %v5209_v5  }
 0xa05   :  { %4262 = vset.pattern.permute.xlu2 %v4435_v46 }
 0xa24   :  { %v2230_v52 = vpop.permute.xlu2 %2229 }
 0xa36   :  { %v2228_v38 = vpop.permute.xlu2 %2227 }
 0xa3e   :  { %v2072_v40 = vpop.permute.xlu2 %2071 }
 0xa44   :  { %v2232_v62 = vpop.permute.xlu0 %2231 }
 0xa46   :  { %v2355_v53 = vpop.permute.xlu2 %2354 }
 0xa47   :  { %v2360_v55 = vmul.f32 %v5261_v17, %v2355_v53 }
 0xa4c   :  { %v2234_v36 = vpop.permute.xlu1 %2233  ;;  %v2224_v18 = vpop.permute.xlu0 %2223 }
 0xa4d   :  { %4124 = vmatpush.xpose.msk.msrb.mxu0 %vm192_vm3, %v2234_v36 }
 0xa4f   :  { %v2367_v59 = vpop.permute.xlu2 %2366 }
 0xa50   :  { %v2375_v31 = vmul.f32 %v5265_v32, %v2367_v59 }
 0xa51   :  { %4125 = vmatpush.xpose.msk.msrb.mxu0 %vm192_vm3, %v2232_v62 }
 0xa54   :  { %v2226_v16 = vpop.permute.xlu1 %2225  ;;  %v2070_v28 = vpop.permute.xlu0 %2069 }
 0xa55   :  { %4126 = vmatpush.xpose.msk.msrb.mxu0 %vm192_vm3, %v2230_v52 }
 0xa57   :  { %v2363_v14 = vpop.permute.xlu2 %2362 }
 0xa58   :  { %4127 = vmatmul.msk.f32.vlgmr.msrb.gmra.mxu0 %vm192_vm3, %v2224_v18 }
 0xa5c   :  { %v2074_v22 = vpop.permute.xlu1 %2073 }
 0xa5d   :  { %4118 = vmatpush.xpose.msk.msra.mxu3 %vm192_vm3, %v2074_v22  ;;  %v2374_v22 = vmul.f32 %v5265_v32, %v2363_v14 }
 0xa60   :  { %4128 = vmatmul.msk.f32.gmra.mxu0 %vm192_vm3, %v2226_v16 }
 0xa61   :  { %4119 = vmatpush.xpose.msk.msra.mxu3 %vm192_vm3, %v2072_v40 }
 0xa64   :  { %v2371_v6 = vpop.permute.xlu1 %2370 }
 0xa65   :  { %v2376_v30 = vmul.f32 %v5265_v32, %v2371_v6  ;;  %4120 = vmatpush.xpose.msk.msra.mxu3 %vm192_vm3, %v2070_v28 }
 0xa67   :  { %v2379_v51 = vadd.f32 %v2376_v30, %v2360_v55 }
 0xa68   :  { %4121 = vmatmul.msk.f32.vlgmr.msra.gmra.mxu3 %vm192_vm3, %v5220_v49  ;;  %4129 = vmatmul.msk.f32.gmra.mxu0 %vm192_vm3, %v2228_v38 }
 0xa69   :  { %4130 = vmatpush.msk.msra.mxu1 %vm509_vm6, %v2379_v51 }
 0xa70   :  { %4122 = vmatmul.msk.f32.gmra.mxu3 %vm192_vm3, %v5232_v34 }
 0xa78   :  { %4123 = vmatmul.msk.f32.gmra.mxu3 %vm192_vm3, %v5227_v25 }
 0xad5   :  { %v2264_v10 = vpop.f32.mrf.mxu0 }
 0xad6   :  { %v2265_v1 = vadd.f32 %v5281_v0, %v2264_v10 }
 0xad8   :  { %v2273_v48 = vsel %vm234_vm4, %v2265_v1, -inf }
 0xad9   :  { %2274 = vmax.xlane.f32.xlu0 %v2273_v48 }
 0xadd   :  { %v2267_v12 = vpop.f32.mrf.mxu0 }
 0xade   :  { %v2268_v58 = vadd.f32 %v5288_v7, %v2267_v12 }
 0xae0   :  { %v2276_v9 = vsel %vm234_vm4, %v2268_v58, -inf }
 0xae1   :  { %2277 = vmax.xlane.f32.xlu1 %v2276_v9 }
 0xae5   :  { %v2270_v54 = vpop.f32.mrf.mxu0 }
 0xae6   :  { %v2271_v19 = vadd.f32 %v5295_v61, %v2270_v54 }
 0xae8   :  { %v2279_v29 = vsel %vm241_vm5, %v2271_v19, -inf }
 0xae9   :  { %2280 = vmax.xlane.f32.xlu2 %v2279_v29 }
 0xaeb   :  { %v2107_v11 = vpop.f32.mrf.mxu3 }
 0xaec   :  { %v2108_v2 = vadd.f32 %v5281_v0, %v2107_v11 }
 0xaed   :  { %2350 = vperm.xlu0 %4258, %v5213_v27  }
 0xaee   :  { %v2116_v43 = vsel %vm234_vm4, %v2108_v2, -inf }
 0xaf5   :  { %4263 = vset.pattern.permute.xlu0 %v4434_v44 }
 0xafa   :  { %2346 = vperm.xlu1 %4260, %v5209_v5  }
 0xb01   :  { %2664 = vrot.lane.b32.xlu2 %v5217_v57, %s4431_s26 }
 0xb02   :  { %4261 = vset.pattern.permute.xlu1 %v4434_v44 }
 0xb09   :  { %2662 = vrot.lane.b32.xlu2 %v5213_v27, %s4431_s26 }
 0xb11   :  { %2660 = vrot.lane.b32.xlu2 %v5209_v5, %s4431_s26  ;;  %s5891_s26 = smov 116  }
 0xb19   :  { %2654 = vrot.lane.b32.xlu2 %v5220_v49, %s5890_s2 }
 0xb21   :  { %2656 = vrot.lane.b32.xlu2 %v5232_v34, %s5890_s2 }
 0xb4a   :  { %2117 = vmax.xlane.f32.xlu2 %v2116_v43 }
 0xb4c   :  { %v2275_v26 = vpop.xlane.xlu0 %2274 }
 0xb4d   :  { %v2282_v15 = vsub.f32 %v2265_v1, %v2275_v26 }
 0xb4f   :  { %v2285_v3 = vmul.f32 1.442695, %v2282_v15 }
 0xb51   :  { %4358 = vpow2.f32 %v2285_v3 }
 0xb54   :  { %v2278_v60 = vpop.xlane.xlu1 %2277 }
 0xb55   :  { %v2283_v21 = vsub.f32 %v2268_v58, %v2278_v60 }
 0xb57   :  { %v5315_v45 = vpop.eup %4358  ;;  %v2287_v56 = vmul.f32 1.442695, %v2283_v21 }
 0xb58   :  { %v2291_v37 = vsel %vm234_vm4, %v5315_v45, 0.0 }
 0xb59   :  { %4360 = vpow2.f32 %v2287_v56  ;;  %2292 = vadd.xlane.f32.xlu0 %v2291_v37 }
 0xb5c   :  { %v2281_v23 = vpop.xlane.xlu2 %2280 }
 0xb5d   :  { %v2284_v8 = vsub.f32 %v2271_v19, %v2281_v23 }
 0xb5f   :  { %v5319_v39 = vpop.eup %4360  ;;  %v2289_v42 = vmul.f32 1.442695, %v2284_v8  ;;  %v2351_v50 = vpop.permute.xlu0 %2350 }
 0xb60   :  { %v2359_v52 = vmul.f32 %v5261_v17, %v2351_v50  ;;  %v2294_v36 = vsel %vm234_vm4, %v5319_v39, 0.0 }
 0xb61   :  { %4362 = vpow2.f32 %v2289_v42  ;;  %2295 = vadd.xlane.f32.xlu0 %v2294_v36 }
 0xb62   :  { %v2378_v62 = vadd.f32 %v2375_v31, %v2359_v52 }
 0xb64   :  { %2406 = vmatpush.msra.mxu1 %v2378_v62  ;;  %v2665_v38 = vpop.permute.xlu2 %2664 }
 0xb67   :  { %v5325_v16 = vpop.eup %4362 }
 0xb68   :  { %v2297_v18 = vsel %vm241_vm5, %v5325_v16, 0.0 }
 0xb69   :  { %2298 = vadd.xlane.f32.xlu1 %v2297_v18 }
 0xb6c   :  { %v2347_v40 = vpop.permute.xlu1 %2346  ;;  %v2663_v28 = vpop.permute.xlu2 %2662 }
 0xb6d   :  { %v2358_v53 = vmul.f32 %v5261_v17, %v2347_v40  ;;  %v2110_v17 = vpop.f32.mrf.mxu3 }
 0xb6f   :  { %v2377_v6 = vadd.f32 %v2374_v22, %v2358_v53 }
 0xb71   :  { %2407 = vmatpush.msra.mxu1 %v2377_v6 }
 0xb73   :  { %4148 = vmatpush.xpose.msk.msrb.mxu1 %vm192_vm3, %v2665_v38 }
 0xb74   :  { %v2661_v55 = vpop.permute.xlu2 %2660 }
 0xb75   :  { %2466 = vrot.lane.b32.xlu0 %v5217_v57, %s5891_s26  ;;  %v2113_v32 = vpop.f32.mrf.mxu3 }
 0xb76   :  { %v5349_v30 = vadd.f32 %v5295_v61, %v2113_v32 }
 0xb77   :  { %4149 = vmatpush.xpose.msk.msrb.mxu1 %vm192_vm3, %v2663_v28 }
 0xb78   :  { %v2122_v10 = vsel %vm241_vm5, %v5349_v30, -inf }
 0xb7b   :  { %4150 = vmatpush.xpose.msk.msrb.mxu1 %vm192_vm3, %v2661_v55 }
 0xb7c   :  { %v5351_v51 = vpop.permute.xlu2 %2654 }
 0xb7d   :  { %2464 = vrot.lane.b32.xlu0 %v5213_v27, %s5891_s26 }
 0xb82   :  { %2460 = vrot.lane.b32.xlu1 %v5227_v25, %s5892_s8 }
 0xb84   :  { %v5355_v1 = vpop.permute.xlu2 %2656 }
 0xb85   :  { %2462 = vrot.lane.b32.xlu0 %v5209_v5, %s5891_s26 }
 0xb8d   :  { %2456 = vrot.lane.b32.xlu0 %v5220_v49, %s5892_s8 }
 0xb95   :  { %2458 = vrot.lane.b32.xlu0 %v5232_v34, %s5892_s8  ;;  %v5358_v34 = vadd.f32 %v5288_v7, %v2110_v17 }
 0xb9d   :  { %2658 = vrot.lane.b32.xlu0 %v5227_v25, %s5890_s2  ;;  %v2119_v25 = vsel %vm234_vm4, %v5358_v34, -inf }
 0xbac   :  { %2123 = vmax.xlane.f32.xlu1 %v2122_v10 }
 0xbbd   :  { %v2118_v49 = vpop.xlane.xlu2 %2117 }
 0xbbe   :  { %v2125_v48 = vsub.f32 %v2108_v2, %v2118_v49 }
 0xbc0   :  { %v2128_v12 = vmul.f32 1.442695, %v2125_v48 }
 0xbc2   :  { %4364 = vpow2.f32 %v2128_v12 }
 0xbc7   :  { %2120 = vmax.xlane.f32.xlu0 %v2119_v25 }
 0xbc8   :  { %v5362_v58 = vpop.eup %4364 }
 0xbc9   :  { %v2134_v9 = vsel %vm234_vm4, %v5362_v58, 0.0 }
 0xbca   :  { %2135 = vadd.xlane.f32.xlu1 %v2134_v9 }
 0xbcc   :  { %v2293_v54 = vpop.xlane.xlu0 %2292 }
 0xbcd   :  { %4366 = vrcp.f32 %v2293_v54  ;;  %v2311_v43 = vand.u32 2147483648, %v2293_v54  ;;  %v2309_v26 = vand.u32 2147483647, %v2293_v54  ;;  %vm2305_vm8 = vweird.f32 %v2293_v54 }
 0xbcf   :  { %v2312_v14 = vor.u32 1.1754944e-38, %v2311_v43  ;;  %vm2310_vm10 = vcmp.eq.f32.partialorder %v2309_v26, 8.507059e+37 }
 0xbd3   :  { %v4367_v19 = vpop.eup %4366 }
 0xbd4   :  { %v2301_v29 = vmul.f32 %v4367_v19, %v2293_v54  ;;  %v2296_v11 = vpop.xlane.xlu0 %2295  ;;  %vm2306_vm7 = vweird.f32 %v4367_v19 }
 0xbd5   :  { %4368 = vrcp.f32 %v2296_v11  ;;  %vm2307_vm9 = vmor %vm2305_vm8, %vm2306_vm7  ;;  %v2326_v42 = vand.u32 2147483648, %v2296_v11  ;;  %v2324_v31 = vand.u32 2147483647, %v2296_v11  ;;  %vm2320_vm12 = vweird.f32 %v2296_v11 }
 0xbd6   :  { %v2302_v2 = vsub.f32 1.0, %v2301_v29 }
 0xbd7   :  { %v2327_v62 = vor.u32 1.1754944e-38, %v2326_v42  ;;  %vm2325_vm14 = vcmp.eq.f32.partialorder %v2324_v31, 8.507059e+37 }
 0xbd8   :  { %v2303_v59 = vmul.f32 %v4367_v19, %v2302_v2 }
 0xbda   :  { %v2304_v15 = vadd.f32 %v4367_v19, %v2303_v59 }
 0xbdb   :  { %v4369_v3 = vpop.eup %4368 }
 0xbdc   :  { %v2308_v60 = vsel %vm2307_vm9, %v4367_v19, %v2304_v15  ;;  %v2316_v21 = vmul.f32 %v4369_v3, %v2296_v11  ;;  %v2299_v56 = vpop.xlane.xlu1 %2298  ;;  %vm2321_vm11 = vweird.f32 %v4369_v3 }
 0xbdd   :  { %v2313_v37 = vsel %vm2310_vm10, %v2312_v14, %v2308_v60  ;;  %4370 = vrcp.f32 %v2299_v56  ;;  %vm2322_vm13 = vmor %vm2320_vm12, %vm2321_vm11  ;;  %v2341_v53 = vand.u32 2147483648, %v2299_v56  ;;  %v2339_v55 = vand.u32 2147483647, %v2299_v56 }
 0xbde   :  { %v2314_v23 = vmul.f32 %v5315_v45, %v2313_v37  ;;  %v2317_v8 = vsub.f32 1.0, %v2316_v21  ;;  %vm2335_vm7 = vweird.f32 %v2299_v56 }
 0xbdf   :  { %v2342_v32 = vor.u32 1.1754944e-38, %v2341_v53  ;;  %vm2340_vm9 = vcmp.eq.f32.partialorder %v2339_v55, 8.507059e+37 }
 0xbe0   :  { %v2318_v50 = vmul.f32 %v4369_v3, %v2317_v8  ;;  %4131 = vmatmul.msk.f32.vlgmr.msra.gmra.mxu1 %vm234_vm4, %v2314_v23 }
 0xbe2   :  { %v2319_v52 = vadd.f32 %v4369_v3, %v2318_v50 }
 0xbe3   :  { %v4371_v36 = vpop.eup %4370  ;;  %2197 = vperm.xlu1 %4261, %v5217_v57  }
 0xbe4   :  { %v2331_v38 = vmul.f32 %v4371_v36, %v2299_v56  ;;  %v2323_v18 = vsel %vm2322_vm13, %v4369_v3, %v2319_v52  ;;  %vm2336_vm1 = vweird.f32 %v4371_v36 }
 0xbe5   :  { %v2328_v40 = vsel %vm2325_vm14, %v2327_v62, %v2323_v18  ;;  %vm2337_vm8 = vmor %vm2335_vm7, %vm2336_vm1 }
 0xbe6   :  { %v2332_v22 = vsub.f32 1.0, %v2331_v38  ;;  %v2329_v45 = vmul.f32 %v5319_v39, %v2328_v40 }
 0xbe7   :  { %v2467_v28 = vpop.permute.xlu0 %2466 }
 0xbe8   :  { %v2333_v6 = vmul.f32 %v4371_v36, %v2332_v22  ;;  %4132 = vmatmul.msk.f32.gmra.mxu1 %vm234_vm4, %v2329_v45  ;;  %4138 = vmatpush.xpose.msk.msrb.mxu3 %vm192_vm3, %v2467_v28 }
 0xbea   :  { %v2334_v17 = vadd.f32 %v4371_v36, %v2333_v6 }
 0xbeb   :  { %4264 = vset.pattern.permute.xlu1 %v4435_v46 }
 0xbec   :  { %2209 = vperm.xlu1 %4264, %v5213_v27   ;;  %v2338_v10 = vsel %vm2337_vm8, %v4371_v36, %v2334_v17 }
 0xbed   :  { %v2343_v39 = vsel %vm2340_vm9, %v2342_v32, %v2338_v10 }
 0xbee   :  { %v2344_v49 = vmul.f32 %v5325_v16, %v2343_v39 }
 0xbef   :  { %v2465_v48 = vpop.permute.xlu0 %2464 }
 0xbf0   :  { %4133 = vmatmul.msk.f32.gmra.mxu1 %vm234_vm4, %v2344_v49  ;;  %4139 = vmatpush.xpose.msk.msrb.mxu3 %vm192_vm3, %v2465_v48 }
 0xbf4   :  { %2205 = vperm.xlu1 %4264, %v5209_v5  }
 0xbf7   :  { %v2463_v12 = vpop.permute.xlu0 %2462 }
 0xbf8   :  { %4140 = vmatpush.xpose.msk.msrb.mxu3 %vm192_vm3, %v2463_v12  ;;  %4151 = vmatmul.msk.f32.vlgmr.msrb.gmra.mxu1 %vm192_vm3, %v5351_v51  ;;  %v2461_v51 = vpop.permute.xlu1 %2460  ;;  %v2200_v12 = vperm.slane %v5257_v35, 0 }
 0xbfc   :  { %4266 = vset.pattern.permute.xlu1 %v4439_v41 }
 0xbfd   :  { %2785 = vperm.xlu1 %4266, %v5217_v57  }
 0xbff   :  { %v2457_v46 = vpop.permute.xlu0 %2456 }
 0xc00   :  { %4141 = vmatmul.msk.f32.vlgmr.msrb.gmra.mxu3 %vm192_vm3, %v2457_v46  ;;  %4152 = vmatmul.msk.f32.gmra.mxu1 %vm192_vm3, %v5355_v1 }
 0xc05   :  { %4269 = vset.pattern.permute.xlu1 %v4438_v47 }
 0xc06   :  { %2797 = vperm.xlu1 %4269, %v5213_v27  }
 0xc07   :  { %v2459_v16 = vpop.permute.xlu0 %2458 }
 0xc08   :  { %4142 = vmatmul.msk.f32.gmra.mxu3 %vm192_vm3, %v2459_v16 }
 0xc0e   :  { %4271 = vset.pattern.permute.xlu1 %v4437_v20 }
 0xc0f   :  { %2603 = vperm.xlu1 %4271, %v5217_v57   ;;  %v2659_v25 = vpop.permute.xlu0 %2658 }
 0xc10   :  { %4143 = vmatmul.msk.f32.gmra.mxu3 %vm192_vm3, %v2461_v51  ;;  %4153 = vmatmul.msk.f32.gmra.mxu1 %vm192_vm3, %v2659_v25  ;;  %v2216_v25 = vperm.slane %v5257_v35, 1 }
 0xc17   :  { %4273 = vset.pattern.permute.xlu1 %v4438_v47 }
 0xc18   :  { %2793 = vperm.xlu1 %4273, %v5209_v5  }
 0xc1f   :  { %v2124_v21 = vpop.xlane.xlu1 %2123 }
 0xc20   :  { %4275 = vset.pattern.permute.xlu1 %v4437_v20  ;;  %v2127_v37 = vsub.f32 %v5349_v30, %v2124_v21 }
 0xc22   :  { %v2132_v23 = vmul.f32 1.442695, %v2127_v37 }
 0xc3a   :  { %v2121_v1 = vpop.xlane.xlu0 %2120 }
 0xc3b   :  { %v2126_v9 = vsub.f32 %v5358_v34, %v2121_v1 }
 0xc3d   :  { %v2130_v54 = vmul.f32 1.442695, %v2126_v9  ;;  %v2136_v36 = vpop.xlane.xlu1 %2135 }
 0xc3e   :  { %vm2148_vm10 = vweird.f32 %v2136_v36 }
 0xc3f   :  { %4372 = vpow2.f32 %v2130_v54 }
 0xc40   :  { %4374 = vpow2.f32 %v2132_v23 }
 0xc41   :  { %4376 = vrcp.f32 %v2136_v36 }
 0xc45   :  { %v5397_v19 = vpop.eup %4372 }
 0xc46   :  { %v2137_v29 = vsel %vm234_vm4, %v5397_v19, 0.0 }
 0xc47   :  { %2138 = vadd.xlane.f32.xlu0 %v2137_v29 }
 0xc55   :  { %v2198_v18 = vpop.permute.xlu1 %2197 }
 0xc56   :  { %v2203_v54 = vmul.f32 %v2200_v12, %v2198_v18 }
 0xc5b   :  { %2193 = vperm.xlu0 %4263, %v5213_v27  }
 0xc5d   :  { %v5418_v60 = vpop.f32.mrf.mxu1 }
 0xc5e   :  { %v2210_v39 = vpop.permute.xlu1 %2209 }
 0xc63   :  { %4268 = vset.pattern.permute.xlu0 %v4439_v41 }
 0xc65   :  { %v5420_v56 = vpop.f32.mrf.mxu1 }
 0xc6d   :  { %v5423_v8 = vpop.f32.mrf.mxu1 }
 0xc75   :  { %v2695_v50 = vpop.f32.mrf.mxu1 }
 0xc76   :  { %v5430_v31 = vadd.f32 %v5281_v0, %v2695_v50 }
 0xc78   :  { %v2704_v52 = vsel %vm234_vm4, %v5430_v31, -inf }
 0xc7d   :  { %v2698_v46 = vpop.f32.mrf.mxu1 }
 0xc7e   :  { %v5455_v1 = vadd.f32 %v5288_v7, %v2698_v46 }
 0xc83   :  { %v2497_v11 = vpop.f32.mrf.mxu3 }
 0xc84   :  { %v2498_v2 = vadd.f32 %v5281_v0, %v2497_v11 }
 0xc86   :  { %v2506_v43 = vsel %vm234_vm4, %v2498_v2, -inf }
 0xc87   :  { %2507 = vmax.xlane.f32.xlu2 %v2506_v43 }
 0xc8b   :  { %v2500_v59 = vpop.f32.mrf.mxu3 }
 0xc8c   :  { %v2501_v34 = vadd.f32 %v5288_v7, %v2500_v59  ;;  %v2154_v59 = vand.u32 2147483648, %v2136_v36  ;;  %v2707_v7 = vsel %vm234_vm4, %v5455_v1, -inf }
 0xc8e   :  { %v2509_v26 = vsel %vm234_vm4, %v2501_v34, -inf }
 0xc8f   :  { %2510 = vmax.xlane.f32.xlu2 %v2509_v26 }
 0xc93   :  { %v2503_v15 = vpop.f32.mrf.mxu3 }
 0xc94   :  { %v5408_v3 = vadd.f32 %v5295_v61, %v2503_v15  ;;  %v2152_v15 = vand.u32 2147483647, %v2136_v36 }
 0xc96   :  { %v2512_v14 = vsel %vm241_vm5, %v5408_v3, -inf  ;;  %vm2153_vm12 = vcmp.eq.f32.partialorder %v2152_v15, 8.507059e+37 }
 0xc97   :  { %2513 = vmax.xlane.f32.xlu2 %v2512_v14  ;;  %v2206_v14 = vpop.permute.xlu1 %2205 }
 0xcaf   :  { %2213 = vperm.xlu2 %4262, %v5217_v57  }
 0xcb7   :  { %4265 = vset.pattern.permute.xlu2 %v4434_v44  ;;  %v5425_v44 = vpop.eup %4374 }
 0xcb8   :  { %2189 = vperm.xlu2 %4265, %v5209_v5   ;;  %v2140_v42 = vsel %vm241_vm5, %v5425_v44, 0.0  ;;  %v4377_v53 = vpop.eup %4376 }
 0xcb9   :  { %v2144_v55 = vmul.f32 %v4377_v53, %v2136_v36  ;;  %vm2149_vm3 = vweird.f32 %v4377_v53 }
 0xcba   :  { %v5434_v22 = vpop.xlane.xlu0 %2138  ;;  %vm2150_vm11 = vmor %vm2148_vm10, %vm2149_vm3 }
 0xcbb   :  { %v2145_v10 = vsub.f32 1.0, %v2144_v55  ;;  %v2169_v18 = vand.u32 2147483648, %v5434_v22  ;;  %vm2163_vm14 = vweird.f32 %v5434_v22 }
 0xcbd   :  { %v2146_v16 = vmul.f32 %v4377_v53, %v2145_v10  ;;  %v2170_v55 = vor.u32 1.1754944e-38, %v2169_v18 }
 0xcc0   :  { %4267 = vset.pattern.permute.xlu2 %v4438_v47 }
 0xcc1   :  { %2801 = vperm.xlu2 %4267, %v5217_v57  }
 0xcc9   :  { %4270 = vset.pattern.permute.xlu2 %v4436_v63 }
 0xcea   :  { %2141 = vadd.xlane.f32.xlu2 %v2140_v42  ;;  %v2155_v42 = vor.u32 1.1754944e-38, %v2154_v59 }
 0xcf2   :  { %2705 = vmax.xlane.f32.xlu2 %v2704_v52 }
 0xcfa   :  { %v2508_v30 = vpop.xlane.xlu2 %2507 }
 0xcfb   :  { %v2515_v62 = vsub.f32 %v2498_v2, %v2508_v30  ;;  %v2147_v2 = vadd.f32 %v4377_v53, %v2146_v16  ;;  %v2217_v30 = vmul.f32 %v2216_v25, %v2206_v14 }
 0xcfd   :  { %v2518_v38 = vmul.f32 1.442695, %v2515_v62  ;;  %v2151_v37 = vsel %vm2150_vm11, %v4377_v53, %v2147_v2 }
 0xcfe   :  { %v2156_v36 = vsel %vm2153_vm12, %v2155_v42, %v2151_v37 }
 0xcff   :  { %4378 = vpow2.f32 %v2518_v38 }
 0xd00   :  { %4380 = vrcp.f32 %v5434_v22 }
 0xd02   :  { %v2511_v40 = vpop.xlane.xlu2 %2510 }
 0xd03   :  { %v2516_v45 = vsub.f32 %v2501_v34, %v2511_v40  ;;  %v2218_v34 = vmul.f32 %v2216_v25, %v2210_v39 }
 0xd05   :  { %v5436_v28 = vpop.eup %4378  ;;  %v2520_v0 = vmul.f32 1.442695, %v2516_v45  ;;  %v2157_v45 = vmul.f32 %v5362_v58, %v2156_v36  ;;  %v5482_v58 = vperm.slane %v5257_v35, 7 }
 0xd06   :  { %v2524_v6 = vsel %vm234_vm4, %v5436_v28, 0.0  ;;  %v5444_v32 = vpop.eup %4380 }
 0xd07   :  { %4382 = vpow2.f32 %v2520_v0  ;;  %2525 = vadd.xlane.f32.xlu0 %v2524_v6  ;;  %v2159_v51 = vmul.f32 %v5444_v32, %v5434_v22  ;;  %vm2164_vm13 = vweird.f32 %v5444_v32  ;;  %v2786_v0 = vpop.permute.xlu1 %2785 }
 0xd08   :  { %vm2165_vm1 = vmor %vm2163_vm14, %vm2164_vm13 }
 0xd09   :  { %v2160_v43 = vsub.f32 1.0, %v2159_v51 }
 0xd0a   :  { %2587 = vperm.xlu2 %4270, %v5217_v57   ;;  %v5442_v17 = vpop.xlane.xlu2 %2513  ;;  %v2194_v57 = vpop.permute.xlu0 %2193 }
 0xd0b   :  { %v2202_v29 = vmul.f32 %v2200_v12, %v2194_v57  ;;  %v2161_v23 = vmul.f32 %v5444_v32, %v2160_v43 }
 0xd0d   :  { %v5446_v49 = vpop.eup %4382  ;;  %v2221_v21 = vadd.f32 %v2218_v34, %v2202_v29  ;;  %v2162_v38 = vadd.f32 %v5444_v32, %v2161_v23 }
 0xd0e   :  { %v2527_v48 = vsel %vm234_vm4, %v5446_v49, 0.0 }
 0xd0f   :  { %2528 = vadd.xlane.f32.xlu0 %v2527_v48  ;;  %v2166_v6 = vsel %vm2165_vm1, %v5444_v32, %v2162_v38  ;;  %v2798_v16 = vpop.permute.xlu1 %2797 }
 0xd12   :  { %4272 = vset.pattern.permute.xlu2 %v4439_v41  ;;  %v2214_v9 = vpop.permute.xlu2 %2213  ;;  %v2701_v41 = vpop.f32.mrf.mxu1 }
 0xd13   :  { %v2219_v11 = vmul.f32 %v2216_v25, %v2214_v9  ;;  %2777 = vperm.xlu2 %4272, %v5209_v5   ;;  %v5464_v50 = vadd.f32 %v5295_v61, %v2701_v41  ;;  %v2167_v61 = vand.u32 2147483647, %v5434_v22 }
 0xd15   :  { %v2222_v26 = vadd.f32 %v2219_v11, %v2203_v54  ;;  %v2710_v53 = vsel %vm241_vm5, %v5464_v50, -inf  ;;  %vm2168_vm7 = vcmp.eq.f32.partialorder %v2167_v61, 8.507059e+37 }
 0xd16   :  { %v2171_v48 = vsel %vm2168_vm7, %v2170_v55, %v2166_v6 }
 0xd17   :  { %4134 = vmatpush.msk.msrb.mxu2 %vm509_vm6, %v2222_v26  ;;  %2708 = vmax.xlane.f32.xlu0 %v2707_v7  ;;  %v2172_v46 = vmul.f32 %v5397_v19, %v2171_v48  ;;  %v2604_v43 = vpop.permute.xlu1 %2603 }
 0xd19   :  { %2444 = vmatpush.msrb.mxu2 %v2221_v21 }
 0xd1a   :  { %v2190_v52 = vpop.permute.xlu2 %2189 }
 0xd1b   :  { %v2201_v62 = vmul.f32 %v2200_v12, %v2190_v52  ;;  %4274 = vset.pattern.permute.xlu2 %v4436_v63  ;;  %v5477_v63 = vperm.slane %v5257_v35, 6 }
 0xd1c   :  { %2583 = vperm.xlu2 %4274, %v5213_v27  }
 0xd1d   :  { %v2220_v40 = vadd.f32 %v2217_v30, %v2201_v62  ;;  %v2791_v10 = vmul.f32 %v5477_v63, %v2786_v0 }
 0xd1f   :  { %2711 = vmax.xlane.f32.xlu0 %v2710_v53  ;;  %2445 = vmatpush.msrb.mxu2 %v2220_v40  ;;  %v2806_v53 = vmul.f32 %v5482_v58, %v2798_v16 }
 0xd20   :  { %4135 = vmatmul.msk.f32.vlgmr.msrb.gmra.mxu2 %vm234_vm4, %v2157_v45  ;;  %v2794_v45 = vpop.permute.xlu1 %2793 }
 0xd21   :  { %v2805_v6 = vmul.f32 %v5482_v58, %v2794_v45 }
 0xd22   :  { %v2802_v22 = vpop.permute.xlu2 %2801 }
 0xd23   :  { %v2807_v39 = vmul.f32 %v5482_v58, %v2802_v22 }
 0xd25   :  { %v2810_v12 = vadd.f32 %v2807_v39, %v2791_v10  ;;  %v2517_v39 = vsub.f32 %v5408_v3, %v5442_v17 }
 0xd27   :  { %4154 = vmatpush.msk.msra.mxu2 %vm509_vm6, %v2810_v12 }
 0xd28   :  { %4136 = vmatmul.msk.f32.gmra.mxu2 %vm234_vm4, %v2172_v46 }
 0xd33   :  { %2781 = vperm.xlu0 %4268, %v5213_v27  }
 0xd3b   :  { %4276 = vset.pattern.permute.xlu0 %v4437_v20  ;;  %v5495_v20 = vperm.slane %v5257_v35, 5 }
 0xd3c   :  { %2595 = vperm.xlu0 %4276, %v5209_v5  }
 0xd3d   :  { %v2609_v15 = vmul.f32 %v5495_v20, %v2604_v43 }
 0xd44   :  { %4277 = vset.pattern.permute.xlu0 %v4438_v47  ;;  %v5498_v47 = vperm.slane %v5257_v35, 4 }
 0xd5d   :  { %v2142_v32 = vpop.xlane.xlu2 %2141 }
 0xd5e   :  { %4384 = vrcp.f32 %v2142_v32  ;;  %v2184_v54 = vand.u32 2147483648, %v2142_v32  ;;  %v2182_v2 = vand.u32 2147483647, %v2142_v32  ;;  %vm2178_vm9 = vweird.f32 %v2142_v32 }
 0xd60   :  { %v2185_v34 = vor.u32 1.1754944e-38, %v2184_v54  ;;  %vm2183_vm10 = vcmp.eq.f32.partialorder %v2182_v2, 8.507059e+37 }
 0xd64   :  { %v4385_v51 = vpop.eup %4384 }
 0xd65   :  { %v2174_v57 = vmul.f32 %v4385_v51, %v2142_v32  ;;  %v2706_v25 = vpop.xlane.xlu2 %2705  ;;  %vm2179_vm8 = vweird.f32 %v4385_v51 }
 0xd66   :  { %v2713_v19 = vsub.f32 %v5430_v31, %v2706_v25  ;;  %vm2180_vm3 = vmor %vm2178_vm9, %vm2179_vm8 }
 0xd67   :  { %v2175_v9 = vsub.f32 1.0, %v2174_v57 }
 0xd68   :  { %v2716_v29 = vmul.f32 1.442695, %v2713_v19 }
 0xd69   :  { %v2176_v11 = vmul.f32 %v4385_v51, %v2175_v9 }
 0xd6a   :  { %4386 = vpow2.f32 %v2716_v29 }
 0xd6b   :  { %v2177_v59 = vadd.f32 %v4385_v51, %v2176_v11 }
 0xd6d   :  { %v2588_v31 = vpop.permute.xlu2 %2587  ;;  %v2181_v26 = vsel %vm2180_vm3, %v4385_v51, %v2177_v59 }
 0xd6e   :  { %v2593_v14 = vmul.f32 %v5498_v47, %v2588_v31  ;;  %v2186_v7 = vsel %vm2183_vm10, %v2185_v34, %v2181_v26 }
 0xd6f   :  { %v2187_v41 = vmul.f32 %v5425_v44, %v2186_v7 }
 0xd70   :  { %v4387_v21 = vpop.eup %4386  ;;  %v2612_v37 = vadd.f32 %v2609_v15, %v2593_v14 }
 0xd71   :  { %4137 = vmatmul.msk.f32.gmra.mxu2 %vm234_vm4, %v2187_v41  ;;  %v2722_v35 = vsel %vm234_vm4, %v4387_v21, 0.0 }
 0xd72   :  { %2723 = vadd.xlane.f32.xlu1 %v2722_v35  ;;  %4144 = vmatpush.msk.msra.mxu0 %vm509_vm6, %v2612_v37 }
 0xd75   :  { %v2778_v18 = vpop.permute.xlu2 %2777 }
 0xd7a   :  { %v5506_v23 = vpop.xlane.xlu0 %2525 }
 0xd7b   :  { %v2544_v37 = vand.u32 2147483648, %v5506_v23  ;;  %vm2538_vm1 = vweird.f32 %v5506_v23  ;;  %v2542_v35 = vand.u32 2147483647, %v5506_v23 }
 0xd7d   :  { %v2584_v54 = vpop.permute.xlu2 %2583  ;;  %vm2543_vm8 = vcmp.eq.f32.partialorder %v2542_v35, 8.507059e+37 }
 0xd7e   :  { %v2592_v2 = vmul.f32 %v5498_v47, %v2584_v54 }
 0xd82   :  { %v5508_v42 = vpop.xlane.xlu0 %2528 }
 0xd83   :  { %vm2553_vm9 = vweird.f32 %v5508_v42 }
 0xd8a   :  { %v2709_v52 = vpop.xlane.xlu0 %2708 }
 0xd8b   :  { %v2714_v36 = vsub.f32 %v5455_v1, %v2709_v52  ;;  %2599 = vperm.xlu1 %4275, %v5213_v27   ;;  %v2789_v1 = vmul.f32 %v5477_v63, %v2778_v18 }
 0xd8d   :  { %v2718_v30 = vmul.f32 1.442695, %v2714_v36  ;;  %v2808_v22 = vadd.f32 %v2805_v6, %v2789_v1 }
 0xd8f   :  { %4388 = vpow2.f32 %v2718_v30 }
 0xd92   :  { %v2712_v38 = vpop.xlane.xlu0 %2711 }
 0xd93   :  { %v2715_v40 = vsub.f32 %v5464_v50, %v2712_v38  ;;  %v2545_v38 = vor.u32 1.1754944e-38, %v2544_v37 }
 0xd95   :  { %v5512_v44 = vpop.eup %4388  ;;  %v2720_v0 = vmul.f32 1.442695, %v2715_v40 }
 0xd96   :  { %v2725_v62 = vsel %vm234_vm4, %v5512_v44, 0.0 }
 0xd97   :  { %2726 = vadd.xlane.f32.xlu2 %v2725_v62  ;;  %4390 = vpow2.f32 %v2720_v0  ;;  %v2559_v0 = vand.u32 2147483648, %v5508_v42 }
 0xd9d   :  { %v5522_v10 = vpop.eup %4390 }
 0xd9e   :  { %v2728_v50 = vsel %vm241_vm5, %v5522_v10, 0.0 }
 0xda5   :  { %v2782_v61 = vpop.permute.xlu0 %2781 }
 0xda6   :  { %v2790_v27 = vmul.f32 %v5477_v63, %v2782_v61  ;;  %v2522_v63 = vmul.f32 1.442695, %v2517_v39 }
 0xda8   :  { %v2809_v55 = vadd.f32 %v2806_v53, %v2790_v27  ;;  %4392 = vpow2.f32 %v2522_v63  ;;  %v2560_v63 = vor.u32 1.1754944e-38, %v2559_v0 }
 0xdaa   :  { %2837 = vmatpush.msra.mxu2 %v2809_v55 }
 0xdac   :  { %2838 = vmatpush.msra.mxu2 %v2808_v22 }
 0xdae   :  { %v5528_v48 = vpop.eup %4392  ;;  %v2596_v30 = vpop.permute.xlu0 %2595 }
 0xdaf   :  { %2579 = vperm.xlu2 %4274, %v5209_v5   ;;  %v2530_v58 = vsel %vm241_vm5, %v5528_v48, 0.0  ;;  %v2607_v61 = vmul.f32 %v5495_v20, %v2596_v30  ;;  %v4287_v30 = vld [vmem:[%s5889_s28 + $0x1] ss:$0 sm:$0xff] }
 0xdb5   :  { %2729 = vadd.xlane.f32.xlu1 %v2728_v50 }
 0xdd8   :  { %2531 = vadd.xlane.f32.xlu2 %v2530_v58 }
 0xde5   :  { %v2724_v12 = vpop.xlane.xlu1 %2723 }
 0xde6   :  { %4394 = vrcp.f32 %v2724_v12  ;;  %v2742_v16 = vand.u32 2147483648, %v2724_v12  ;;  %v2740_v57 = vand.u32 2147483647, %v2724_v12  ;;  %vm2736_vm12 = vweird.f32 %v2724_v12 }
 0xde7   :  { %4396 = vrcp.f32 %v5506_v23 }
 0xde8   :  { %v2743_v3 = vor.u32 1.1754944e-38, %v2742_v16  ;;  %vm2741_vm14 = vcmp.eq.f32.partialorder %v2740_v57, 8.507059e+37  ;;  %4398 = vrcp.f32 %v5508_v42 }
 0xdec   :  { %v4395_v5 = vpop.eup %4394 }
 0xded   :  { %v2732_v46 = vmul.f32 %v4395_v5, %v2724_v12  ;;  %vm2737_vm11 = vweird.f32 %v4395_v5  ;;  %v4397_v29 = vpop.eup %4396 }
 0xdee   :  { %vm2738_vm13 = vmor %vm2736_vm12, %vm2737_vm11  ;;  %v2534_v59 = vmul.f32 %v4397_v29, %v5506_v23  ;;  %v4399_v26 = vpop.eup %4398  ;;  %vm2539_vm5 = vweird.f32 %v4397_v29  ;;  %v2557_v23 = vand.u32 2147483647, %v5508_v42 }
 0xdef   :  { %v2733_v32 = vsub.f32 1.0, %v2732_v46  ;;  %v2549_v14 = vmul.f32 %v4399_v26, %v5508_v42  ;;  %vm2540_vm7 = vmor %vm2538_vm1, %vm2539_vm5  ;;  %vm2554_vm3 = vweird.f32 %v4399_v26 }
 0xdf0   :  { %v2535_v31 = vsub.f32 1.0, %v2534_v59  ;;  %vm2555_vm11 = vmor %vm2553_vm9, %vm2554_vm3 }
 0xdf1   :  { %v2734_v51 = vmul.f32 %v4395_v5, %v2733_v32 }
 0xdf2   :  { %v2536_v15 = vmul.f32 %v4397_v29, %v2535_v31 }
 0xdf3   :  { %v2735_v25 = vadd.f32 %v4395_v5, %v2734_v51 }
 0xdf4   :  { %v2537_v41 = vadd.f32 %v4397_v29, %v2536_v15 }
 0xdf5   :  { %v2739_v17 = vsel %vm2738_vm13, %v4395_v5, %v2735_v25 }
 0xdf6   :  { %v2744_v19 = vsel %vm2741_vm14, %v2743_v3, %v2739_v17  ;;  %v2541_v52 = vsel %vm2540_vm7, %v4397_v29, %v2537_v41  ;;  %vm2558_vm14 = vcmp.eq.f32.partialorder %v2557_v23, 8.507059e+37  ;;  %v2447_v41 = vpop.f32.mrf.mxu2 }
 0xdf7   :  { %v2745_v9 = vmul.f32 %v4387_v21, %v2744_v19  ;;  %v2550_v21 = vsub.f32 1.0, %v2549_v14  ;;  %v2546_v45 = vsel %vm2543_vm8, %v2545_v38, %v2541_v52  ;;  %v2448_v35 = vadd.f32 %v2447_v41, %v5418_v60 }
 0xdf8   :  { %v2547_v22 = vmul.f32 %v5436_v28, %v2546_v45 }
 0xdf9   :  { %4155 = vmatmul.msk.f32.vlgmr.msra.gmra.mxu2 %vm234_vm4, %v2745_v9  ;;  %v2551_v36 = vmul.f32 %v4399_v26, %v2550_v21 }
 0xdfb   :  { %v2552_v1 = vadd.f32 %v4399_v26, %v2551_v36 }
 0xdfd   :  { %v2600_v11 = vpop.permute.xlu1 %2599 }
 0xdfe   :  { %v2608_v43 = vmul.f32 %v5495_v20, %v2600_v11  ;;  %v2450_v21 = vpop.f32.mrf.mxu2 }
 0xe00   :  { %v2611_v34 = vadd.f32 %v2608_v43, %v2592_v2 }
 0xe02   :  { %2639 = vmatpush.msra.mxu0 %v2611_v34 }
 0xe06   :  { %v2453_v37 = vpop.f32.mrf.mxu2 }
 0xe0a   :  { %v2727_v7 = vpop.xlane.xlu2 %2726 }
 0xe0b   :  { %4400 = vrcp.f32 %v2727_v7  ;;  %v2757_v6 = vand.u32 2147483648, %v2727_v7  ;;  %v2755_v39 = vand.u32 2147483647, %v2727_v7  ;;  %vm2751_vm12 = vweird.f32 %v2727_v7 }
 0xe0d   :  { %v2758_v58 = vor.u32 1.1754944e-38, %v2757_v6  ;;  %vm2756_vm5 = vcmp.eq.f32.partialorder %v2755_v39, 8.507059e+37  ;;  %v2454_v6 = vadd.f32 %v2453_v37, %v5423_v8 }
 0xe11   :  { %v4401_v62 = vpop.eup %4400 }
 0xe12   :  { %v2747_v18 = vmul.f32 %v4401_v62, %v2727_v7  ;;  %v2580_v40 = vpop.permute.xlu2 %2579  ;;  %vm2752_vm10 = vweird.f32 %v4401_v62 }
 0xe13   :  { %v2591_v53 = vmul.f32 %v5498_v47, %v2580_v40  ;;  %v2556_v47 = vsel %vm2555_vm11, %v4399_v26, %v2552_v1  ;;  %vm2753_vm13 = vmor %vm2751_vm12, %vm2752_vm10 }
 0xe14   :  { %v2748_v27 = vsub.f32 1.0, %v2747_v18  ;;  %v2561_v5 = vsel %vm2558_vm14, %v2560_v63, %v2556_v47 }
 0xe15   :  { %v2610_v55 = vadd.f32 %v2607_v61, %v2591_v53  ;;  %v2562_v46 = vmul.f32 %v5446_v49, %v2561_v5 }
 0xe16   :  { %v2749_v50 = vmul.f32 %v4401_v62, %v2748_v27 }
 0xe17   :  { %2640 = vmatpush.msra.mxu0 %v2610_v55 }
 0xe18   :  { %v2750_v20 = vadd.f32 %v4401_v62, %v2749_v50  ;;  %4145 = vmatmul.msk.f32.vlgmr.msra.gmra.mxu0 %vm234_vm4, %v2547_v22 }
 0xe1a   :  { %v2754_v42 = vsel %vm2753_vm13, %v4401_v62, %v2750_v20 }
 0xe1b   :  { %v2759_v12 = vsel %vm2756_vm5, %v2758_v58, %v2754_v42 }
 0xe1c   :  { %v2760_v28 = vmul.f32 %v5512_v44, %v2759_v12 }
 0xe1e   :  { %4156 = vmatmul.msk.f32.gmra.mxu2 %vm234_vm4, %v2760_v28 }
 0xe20   :  { %4146 = vmatmul.msk.f32.gmra.mxu0 %vm234_vm4, %v2562_v46 }
 0xe28   :  { %v2730_v32 = vpop.xlane.xlu1 %2729 }
 0xe29   :  { %4402 = vrcp.f32 %v2730_v32  ;;  %v2772_v25 = vand.u32 2147483648, %v2730_v32  ;;  %v2770_v17 = vand.u32 2147483647, %v2730_v32  ;;  %vm2766_vm7 = vweird.f32 %v2730_v32 }
 0xe2b   :  { %v2773_v9 = vor.u32 1.1754944e-38, %v2772_v25  ;;  %vm2771_vm9 = vcmp.eq.f32.partialorder %v2770_v17, 8.507059e+37  ;;  %v4160_v17 = vld [vmem:[%s5845_s12 + $0x40] sm:$0xff] }
 0xe2f   :  { %v4403_v16 = vpop.eup %4402 }
 0xe30   :  { %v2762_v51 = vmul.f32 %v4403_v16, %v2730_v32  ;;  %vm2767_vm1 = vweird.f32 %v4403_v16 }
 0xe31   :  { %vm2768_vm8 = vmor %vm2766_vm7, %vm2767_vm1 }
 0xe32   :  { %v2763_v57 = vsub.f32 1.0, %v2762_v51 }
 0xe34   :  { %v2764_v3 = vmul.f32 %v4403_v16, %v2763_v57 }
 0xe36   :  { %v2765_v19 = vadd.f32 %v4403_v16, %v2764_v3 }
 0xe38   :  { %v2769_v44 = vsel %vm2768_vm8, %v4403_v16, %v2765_v19  ;;  %v4161_v19 = vld [vmem:[%s5845_s12 + $0x48] sm:$0xff] }
 0xe39   :  { %v2774_v54 = vsel %vm2771_vm9, %v2773_v9, %v2769_v44  ;;  %v2999_v9 = vunpack.c.l.b16 %v4160_v17  ;;  %v3000_v44 = vunpack.c.h.b16 %v4160_v17 }
 0xe3a   :  { %v2775_v49 = vmul.f32 %v5522_v10, %v2774_v54  ;;  %v3001_v54 = vunpack.c.l.b16 %v4161_v19 }
 0xe3c   :  { %4157 = vmatmul.msk.f32.gmra.mxu2 %vm234_vm4, %v2775_v49  ;;  %v3002_v49 = vunpack.c.h.b16 %v4161_v19 }
 0xe4b   :  { %v2532_v29 = vpop.xlane.xlu2 %2531 }
 0xe4c   :  { %4404 = vrcp.f32 %v2532_v29  ;;  %v2574_v59 = vand.u32 2147483648, %v2532_v29  ;;  %v2572_v31 = vand.u32 2147483647, %v2532_v29  ;;  %vm2568_vm10 = vweird.f32 %v2532_v29 }
 0xe4e   :  { %v2575_v15 = vor.u32 1.1754944e-38, %v2574_v59  ;;  %vm2573_vm12 = vcmp.eq.f32.partialorder %v2572_v31, 8.507059e+37  ;;  %v3018_v59 = vpack.c.b16 %v3002_v49, %v3002_v49 }
 0xe52   :  { %v4405_v11 = vpop.eup %4404 }
 0xe53   :  { %v2564_v2 = vmul.f32 %v4405_v11, %v2532_v29  ;;  %vm2569_vm3 = vweird.f32 %v4405_v11 }
 0xe54   :  { %vm2570_vm11 = vmor %vm2568_vm10, %vm2569_vm3 }
 0xe55   :  { %v2565_v43 = vsub.f32 1.0, %v2564_v2  ;;  %v3016_v2 = vpack.c.b16 %v3000_v44, %v3000_v44 }
 0xe57   :  { %v2566_v34 = vmul.f32 %v4405_v11, %v2565_v43  ;;  %v3017_v43 = vpack.c.b16 %v3001_v54, %v3001_v54  ;;  %v3041_v31 = vsel %vm98_vm0, %v3016_v2, 0 }
 0xe58   :  { %3110 = vmatpush.bf16.msrb.mxu0 %v3041_v31 }
 0xe59   :  { %v2567_v26 = vadd.f32 %v4405_v11, %v2566_v34 }
 0xe5b   :  { %v2571_v14 = vsel %vm2570_vm11, %v4405_v11, %v2567_v26  ;;  %v3015_v11 = vpack.c.b16 %v2999_v9, %v2999_v9  ;;  %v3044_v26 = vsel %vm98_vm0, %v3017_v43, 0 }
 0xe5c   :  { %v2576_v7 = vsel %vm2573_vm12, %v2575_v15, %v2571_v14  ;;  %v3047_v15 = vsel %vm98_vm0, %v3018_v59, 0  ;;  %3128 = vmatpush.bf16.msra.mxu1 %v3044_v26 }
 0xe5d   :  { %v2577_v10 = vmul.f32 %v5528_v48, %v2576_v7  ;;  %v2451_v48 = vadd.f32 %v2450_v21, %v5420_v56  ;;  %v3038_v34 = vsel %vm98_vm0, %v3015_v11, 0  ;;  %3146 = vmatpush.bf16.msrb.mxu2 %v3047_v15  ;;  %v4165_v11 = vld [vmem:[%s5845_s12 + $0x68] sm:$0xff] }
 0xe5e   :  { %3092 = vmatpush.bf16.msra.mxu3 %v3038_v34  ;;  %v3009_v59 = vunpack.c.l.b16 %v4165_v11  ;;  %v3010_v34 = vunpack.c.h.b16 %v4165_v11 }
 0xe5f   :  { %4147 = vmatmul.msk.f32.gmra.mxu0 %vm234_vm4, %v2577_v10 }
 0xe60   :  { %v3025_v15 = vpack.c.b16 %v3009_v59, %v3009_v59 }
 0xe7c   :  { %v2840_v62 = vpop.f32.mrf.mxu2 }
 0xe95   :  { %v2642_v52 = vpop.f32.mrf.mxu0 }
 0xe96   :  { %v2651_v36 = vadd.f32 %v2642_v52, %v2448_v35 }
 0xe98   :  { %v2849_v38 = vadd.f32 %v2840_v62, %v2651_v36 }
 0xe9a   :  { %v2855_v18 = vadd.f32 %v4287_v30, %v2849_v38 }
 0xe9c   :  { %v2858_v40 = vadd.f32 %v2855_v18, %v5194_v13 }
 0xe9d   :  { %v2645_v45 = vpop.f32.mrf.mxu0 }
 0xe9e   :  { %v2865_v61 = vsel %vm144_vm2, %v2858_v40, 0.0  ;;  %v2652_v53 = vadd.f32 %v2645_v45, %v2451_v48  ;;  %v4288_v48 = vld [vmem:[%s5843_s10 + $0x1] ss:$0 sm:$0xff] }
 0xe9f   :  { %2866 = vadd.xlane.f32.xlu0 %v2865_v61 }
 0xea1   :  { %v2843_v1 = vpop.f32.mrf.mxu2 }
 0xea2   :  { %v2850_v60 = vadd.f32 %v2843_v1, %v2652_v53 }
 0xea4   :  { %v2856_v27 = vadd.f32 %v4287_v30, %v2850_v60  ;;  %v4289_v60 = vld [vmem:[%s5844_s11 + $0x1] ss:$0 sm:$0xff] }
 0xea6   :  { %v2859_v23 = vadd.f32 %v2856_v27, %v5198_v24 }
 0xea8   :  { %v2868_v0 = vsel %vm144_vm2, %v2859_v23, 0.0 }
 0xea9   :  { %2869 = vadd.xlane.f32.xlu2 %v2868_v0 }
 0xebf   :  { %v2846_v13 = vpop.f32.mrf.mxu2 }
 0xedc   :  { %v2648_v55 = vpop.f32.mrf.mxu0 }
 0xedd   :  { %v2653_v22 = vadd.f32 %v2648_v55, %v2454_v6 }
 0xedf   :  { %v2851_v50 = vadd.f32 %v2846_v13, %v2653_v22 }
 0xee1   :  { %v2857_v39 = vadd.f32 %v4287_v30, %v2851_v50  ;;  %v4162_v50 = vld [vmem:[%s5845_s12 + $0x50] sm:$0xff] }
 0xee3   :  { %v2860_v56 = vadd.f32 %v2857_v39, %v5202_v4  ;;  %v4163_v39 = vld [vmem:[%s5845_s12 + $0x58] sm:$0xff] }
 0xee5   :  { %v2871_v20 = vsel %vm990_vm15, %v2860_v56, 0.0 }
 0xee6   :  { %2872 = vadd.xlane.f32.xlu1 %v2871_v20  ;;  %v3003_v20 = vunpack.c.l.b16 %v4162_v50 }
 0xf12   :  { %v2867_v47 = vpop.xlane.xlu0 %2866 }
 0xf13   :  { %v2874_v63 = vmul.f32 %v2867_v47, %v4967_v33  ;;  %v3004_v47 = vunpack.c.h.b16 %v4162_v50 }
 0xf15   :  { %v2877_v58 = vsub.f32 %v2858_v40, %v2874_v63  ;;  %v3005_v63 = vunpack.c.l.b16 %v4163_v39 }
 0xf17   :  { %v2880_v24 = vmul.f32 %v2877_v58, %v2877_v58 }
 0xf19   :  { %v2883_v42 = vsel %vm144_vm2, %v2880_v24, 0.0 }
 0xf1a   :  { %2884 = vadd.xlane.f32.xlu2 %v2883_v42  ;;  %v3019_v42 = vpack.c.b16 %v3003_v20, %v3003_v20 }
 0xf1c   :  { %v2870_v12 = vpop.xlane.xlu2 %2869 }
 0xf1d   :  { %v2875_v8 = vmul.f32 %v2870_v12, %v4967_v33  ;;  %v3020_v12 = vpack.c.b16 %v3004_v47, %v3004_v47 }
 0xf1f   :  { %v2878_v5 = vsub.f32 %v2859_v23, %v2875_v8  ;;  %v3021_v8 = vpack.c.b16 %v3005_v63, %v3005_v63 }
 0xf21   :  { %v2881_v28 = vmul.f32 %v2878_v5, %v2878_v5 }
 0xf23   :  { %v2886_v46 = vsel %vm144_vm2, %v2881_v28, 0.0  ;;  %v3050_v28 = vsel %vm98_vm0, %v3019_v42, 0 }
 0xf24   :  { %2887 = vadd.xlane.f32.xlu1 %v2886_v46  ;;  %v3053_v46 = vsel %vm98_vm0, %v3020_v12, 0  ;;  %3164 = vmatpush.bf16.msrb.mxu3 %v3050_v28  ;;  %v5712_v12 = vld [vmem:[%s5847_s13 + $0x10] sm:$0xff] }
 0xf25   :  { %3182 = vmatpush.bf16.msra.mxu0 %v3053_v46  ;;  %v2959_v28 = vperm.slane %v5712_v12, 0 }
 0xf59   :  { %v2873_v4 = vpop.xlane.xlu1 %2872 }
 0xf5a   :  { %v2876_v32 = vmul.f32 %v2873_v4, %v4967_v33  ;;  %v3056_v4 = vsel %vm98_vm0, %v3021_v8, 0 }
 0xf5b   :  { %3200 = vmatpush.bf16.msrb.mxu1 %v3056_v4 }
 0xf5c   :  { %v5574_v16 = vsub.f32 %v2860_v56, %v2876_v32 }
 0xf5e   :  { %v2882_v51 = vmul.f32 %v5574_v16, %v5574_v16 }
 0xf60   :  { %v2889_v57 = vsel %vm990_vm15, %v2882_v51, 0.0 }
 0xf61   :  { %2890 = vadd.xlane.f32.xlu0 %v2889_v57 }
 0xf8d   :  { %v2885_v25 = vpop.xlane.xlu2 %2884 }
 0xf8e   :  { %v2892_v3 = vmul.f32 %v2885_v25, %v4967_v33 }
 0xf90   :  { %v2895_v29 = vadd.f32 1e-05, %v2892_v3 }
 0xf92   :  { %4406 = vrsqrt.f32 %v2895_v29  ;;  %vm2904_vm14 = vweird.f32 %v2895_v29 }
 0xf97   :  { %v2888_v14 = vpop.xlane.xlu1 %2887 }
 0xf98   :  { %v4407_v7 = vpop.eup %4406  ;;  %v2893_v10 = vmul.f32 %v2888_v14, %v4967_v33  ;;  %v3026_v14 = vpack.c.b16 %v3010_v34, %v3010_v34 }
 0xf99   :  { %v2899_v41 = vmul.f32 %v4407_v7, %v2895_v29  ;;  %vm2905_vm13 = vweird.f32 %v4407_v7 }
 0xf9a   :  { %v2896_v21 = vadd.f32 1e-05, %v2893_v10  ;;  %vm2906_vm5 = vmor %vm2904_vm14, %vm2905_vm13 }
 0xf9b   :  { %v2900_v37 = vmul.f32 %v4407_v7, %v2899_v41  ;;  %v3068_v41 = vsel %vm98_vm0, %v3025_v15, 0 }
 0xf9c   :  { %4408 = vrsqrt.f32 %v2896_v21  ;;  %vm2914_vm7 = vweird.f32 %v2896_v21 }
 0xf9d   :  { %v2901_v35 = vmul.f32 0.5, %v2900_v37  ;;  %v4166_v37 = vld [vmem:[%s5845_s12 + $0x70] sm:$0xff] }
 0xf9f   :  { %v2902_v52 = vsub.f32 1.5, %v2901_v35  ;;  %v4167_v35 = vld [vmem:[%s5845_s12 + $0x78] sm:$0xff] }
 0xfa1   :  { %v2903_v30 = vmul.f32 %v4407_v7, %v2902_v52  ;;  %v3011_v52 = vunpack.c.l.b16 %v4166_v37 }
 0xfa2   :  { %v4409_v36 = vpop.eup %4408 }
 0xfa3   :  { %v2909_v62 = vmul.f32 %v4409_v36, %v2896_v21  ;;  %v2907_v18 = vsel %vm2906_vm5, %v4407_v7, %v2903_v30  ;;  %vm2915_vm1 = vweird.f32 %v4409_v36  ;;  %v3071_v21 = vsel %vm98_vm0, %v3026_v14, 0 }
 0xfa4   :  { %v2928_v61 = vmul.f32 %v2907_v18, %v2877_v58  ;;  %vm2916_vm8 = vmor %vm2914_vm7, %vm2915_vm1  ;;  %v3006_v58 = vunpack.c.h.b16 %v4163_v39  ;;  %v3013_v30 = vunpack.c.l.b16 %v4167_v35 }
 0xfa5   :  { %v2910_v38 = vmul.f32 %v4409_v36, %v2909_v62  ;;  %v3014_v62 = vunpack.c.h.b16 %v4167_v35 }
 0xfa6   :  { %v2934_v27 = vmul.f32 %v4288_v48, %v2928_v61 }
 0xfa7   :  { %v2911_v40 = vmul.f32 0.5, %v2910_v38  ;;  %v3027_v38 = vpack.c.b16 %v3011_v52, %v3011_v52 }
 0xfa8   :  { %v5597_v6 = vadd.f32 %v4289_v60, %v2934_v27  ;;  %v4203_v27 = vld [vmem:[%s5846_s14 + $0x48] sm:$0xff] }
 0xfa9   :  { %v2912_v45 = vsub.f32 1.5, %v2911_v40  ;;  %v3029_v40 = vpack.c.b16 %v3013_v30, %v3013_v30  ;;  %v3478_v50 = vunpack.c.h.b16 %v4203_v27 }
 0xfab   :  { %v2913_v53 = vmul.f32 %v4409_v36, %v2912_v45  ;;  %v3030_v45 = vpack.c.b16 %v3014_v62, %v3014_v62  ;;  %v3494_v47 = vpack.c.b16 %v3478_v50, %v3478_v50 }
 0xfad   :  { %v2917_v1 = vsel %vm2916_vm8, %v4409_v36, %v2913_v53  ;;  %v3012_v36 = vunpack.c.h.b16 %v4166_v37  ;;  %v3080_v53 = vsel %vm98_vm0, %v3029_v40, 0 }
 0xfae   :  { %v2929_v23 = vmul.f32 %v2917_v1, %v2878_v5  ;;  %v3022_v5 = vpack.c.b16 %v3006_v58, %v3006_v58  ;;  %v3083_v1 = vsel %vm98_vm0, %v3030_v45, 0 }
 0xfaf   :  { %v3028_v18 = vpack.c.b16 %v3012_v36, %v3012_v36 }
 0xfb0   :  { %v2935_v0 = vmul.f32 %v4288_v48, %v2929_v23  ;;  %v3059_v32 = vsel %vm98_vm0, %v3022_v5, 0  ;;  %v2960_v5 = vperm.slane %v5712_v12, 1 }
 0xfb1   :  { %3218 = vmatpush.bf16.msra.mxu2 %v3059_v32  ;;  %v3077_v61 = vsel %vm98_vm0, %v3028_v18, 0  ;;  %v2961_v32 = vperm.slane %v5712_v12, 2 }
 0xfb2   :  { %v5599_v55 = vadd.f32 %v4289_v60, %v2935_v0 }
 0xfb4   :  { %v5603_v22 = vpack.c.bf16 %v5599_v55, %v5597_v6 }
 0xfb6   :  { %4170 = vmatmul.msk.bf16.vlgmr.msra.gmra.mxu3 %vm144_vm2, %v5603_v22  ;;  %4172 = vmatmul.msk.bf16.vlgmr.msrb.gmra.mxu0 %vm144_vm2, %v5603_v22 }
 0xfb7   :  { %4174 = vmatmul.msk.bf16.vlgmr.msra.gmra.mxu1 %vm144_vm2, %v5603_v22  ;;  %4176 = vmatmul.msk.bf16.vlgmr.msrb.gmra.mxu2 %vm144_vm2, %v5603_v22 }
 0xfb8   :  { %3272 = vmatpush.bf16.msra.mxu1 %v3068_v41  ;;  %3290 = vmatpush.bf16.msrb.mxu2 %v3071_v21  ;;  %v4205_v41 = vld [vmem:[%s5846_s14 + $0x58] sm:$0xff] }
 0xfb9   :  { %v3481_v37 = vunpack.c.l.b16 %v4205_v41  ;;  %v3482_v30 = vunpack.c.h.b16 %v4205_v41 }
 0xfbb   :  { %v3497_v52 = vpack.c.b16 %v3481_v37, %v3481_v37 }
 0xfd4   :  { %v2891_v13 = vpop.xlane.xlu0 %2890 }
 0xfd5   :  { %v2894_v56 = vmul.f32 %v2891_v13, %v4967_v33  ;;  %v3477_v13 = vunpack.c.l.b16 %v4203_v27 }
 0xfd7   :  { %v2897_v24 = vadd.f32 1e-05, %v2894_v56  ;;  %v3493_v20 = vpack.c.b16 %v3477_v13, %v3477_v13 }
 0xfd9   :  { %4410 = vrsqrt.f32 %v2897_v24  ;;  %vm2924_vm3 = vweird.f32 %v2897_v24 }
 0xfdf   :  { %v4411_v51 = vpop.eup %4410 }
 0xfe0   :  { %v2919_v57 = vmul.f32 %v4411_v51, %v2897_v24  ;;  %vm2925_vm9 = vweird.f32 %v4411_v51 }
 0xfe1   :  { %vm2926_vm10 = vmor %vm2924_vm3, %vm2925_vm9  ;;  %vm4026_vm9 = vcmask 1024  }
 0xfe2   :  { %v2920_v25 = vmul.f32 %v4411_v51, %v2919_v57 }
 0xfe4   :  { %v2921_v3 = vmul.f32 0.5, %v2920_v25 }
 0xfe6   :  { %v2922_v17 = vsub.f32 1.5, %v2921_v3 }
 0xfe8   :  { %v2923_v19 = vmul.f32 %v4411_v51, %v2922_v17 }
 0xfea   :  { %v2927_v9 = vsel %vm2926_vm10, %v4411_v51, %v2923_v19  ;;  %v2962_v51 = vperm.slane %v5712_v12, 3 }
 0xfeb   :  { %v2930_v44 = vmul.f32 %v2927_v9, %v5574_v16  ;;  %v4164_v16 = vld [vmem:[%s5845_s12 + $0x60] sm:$0xff] }
 0xfec   :  { %v3007_v2 = vunpack.c.l.b16 %v4164_v16  ;;  %v3008_v43 = vunpack.c.h.b16 %v4164_v16 }
 0xfed   :  { %v2936_v54 = vmul.f32 %v4288_v48, %v2930_v44  ;;  %v3074_v48 = vsel %vm98_vm0, %v3027_v38, 0  ;;  %v3498_v38 = vpack.c.b16 %v3482_v30, %v3482_v30 }
 0xfee   :  { %v3023_v31 = vpack.c.b16 %v3007_v2, %v3007_v2  ;;  %v3024_v26 = vpack.c.b16 %v3008_v43, %v3008_v43 }
 0xfef   :  { %v5625_v49 = vadd.f32 %v4289_v60, %v2936_v54  ;;  %v4202_v60 = vld [vmem:[%s5846_s14 + $0x40] sm:$0xff] }
 0xff0   :  { %v3062_v7 = vsel %vm98_vm0, %v3023_v31, 0  ;;  %v3065_v10 = vsel %vm98_vm0, %v3024_v26, 0  ;;  %v3475_v23 = vunpack.c.l.b16 %v4202_v60  ;;  %v3476_v0 = vunpack.c.h.b16 %v4202_v60 }
 0xff1   :  { %v5629_v29 = vpack.c.bf16 %v5625_v49, %v5625_v49  ;;  %3236 = vmatpush.bf16.msra.mxu3 %v3062_v7  ;;  %3254 = vmatpush.bf16.msrb.mxu0 %v3065_v10  ;;  %v4204_v10 = vld [vmem:[%s5846_s14 + $0x50] sm:$0xff] }
 0xff2   :  { %v3491_v39 = vpack.c.b16 %v3475_v23, %v3475_v23  ;;  %v3492_v56 = vpack.c.b16 %v3476_v0, %v3476_v0  ;;  %v3480_v21 = vunpack.c.h.b16 %v4204_v10  ;;  %v3479_v36 = vunpack.c.l.b16 %v4204_v10 }
 0xff3   :  { %4171 = vmatmul.msk.bf16.gmra.mxu3 %vm144_vm2, %v5629_v29  ;;  %4173 = vmatmul.msk.bf16.gmra.mxu0 %vm144_vm2, %v5629_v29 }
 0xff4   :  { %4175 = vmatmul.msk.bf16.gmra.mxu1 %vm144_vm2, %v5629_v29  ;;  %4177 = vmatmul.msk.bf16.gmra.mxu2 %vm144_vm2, %v5629_v29  ;;  %v3496_v35 = vpack.c.b16 %v3480_v21, %v3480_v21  ;;  %v3495_v62 = vpack.c.b16 %v3479_v36, %v3479_v36 }
0x1003   :  { %4178 = vmatmul.msk.bf16.vlgmr.msrb.gmra.mxu3 %vm144_vm2, %v5603_v22  ;;  %4180 = vmatmul.msk.bf16.vlgmr.msra.gmra.mxu0 %vm144_vm2, %v5603_v22 }
0x1004   :  { %4182 = vmatmul.msk.bf16.vlgmr.msrb.gmra.mxu1 %vm144_vm2, %v5603_v22  ;;  %4184 = vmatmul.msk.bf16.vlgmr.msra.gmra.mxu2 %vm144_vm2, %v5603_v22 }
0x1005   :  { %3308 = vmatpush.bf16.msrb.mxu3 %v3074_v48  ;;  %3326 = vmatpush.bf16.msra.mxu0 %v3077_v61 }
0x1006   :  { %3344 = vmatpush.bf16.msrb.mxu1 %v3080_v53  ;;  %3362 = vmatpush.bf16.msra.mxu2 %v3083_v1 }
0x1013   :  { %4179 = vmatmul.msk.bf16.gmra.mxu3 %vm144_vm2, %v5629_v29  ;;  %4181 = vmatmul.msk.bf16.gmra.mxu0 %vm144_vm2, %v5629_v29 }
0x1014   :  { %4183 = vmatmul.msk.bf16.gmra.mxu1 %vm144_vm2, %v5629_v29  ;;  %4185 = vmatmul.msk.bf16.gmra.mxu2 %vm144_vm2, %v5629_v29 }
0x1023   :  { %4186 = vmatmul.msk.bf16.vlgmr.msra.gmra.mxu3 %vm144_vm2, %v5603_v22  ;;  %4188 = vmatmul.msk.bf16.vlgmr.msrb.gmra.mxu0 %vm144_vm2, %v5603_v22 }
0x1024   :  { %4190 = vmatmul.msk.bf16.vlgmr.msra.gmra.mxu1 %vm144_vm2, %v5603_v22  ;;  %4192 = vmatmul.msk.bf16.vlgmr.msrb.gmra.mxu2 %vm144_vm2, %v5603_v22 }
0x1025   :  { %3530 = vmatpush.bf16.xpose.msra.mxu3 %v3491_v39  ;;  %3548 = vmatpush.bf16.xpose.msrb.mxu0 %v3492_v56 }
0x1026   :  { %3566 = vmatpush.bf16.xpose.msra.mxu1 %v3493_v20  ;;  %3584 = vmatpush.bf16.xpose.msrb.mxu2 %v3494_v47 }
0x1033   :  { %4187 = vmatmul.msk.bf16.gmra.mxu3 %vm144_vm2, %v5629_v29  ;;  %4189 = vmatmul.msk.bf16.gmra.mxu0 %vm144_vm2, %v5629_v29  ;;  %v3112_v63 = vpop.f32.mrf.mxu0 }
0x1034   :  { %4191 = vmatmul.msk.bf16.gmra.mxu1 %vm144_vm2, %v5629_v29  ;;  %4193 = vmatmul.msk.bf16.gmra.mxu2 %vm144_vm2, %v5629_v29  ;;  %v3130_v24 = vpop.f32.mrf.mxu1  ;;  %v3113_v19 = vadd.f32 %v3112_v63, %v2960_v5 }
0x1035   :  { %v3131_v44 = vadd.f32 %v3130_v24, %v2961_v32 }
0x1036   :  { %v3374_v43 = vmax.f32 %v3113_v19, 0.0 }
0x1037   :  { %v3375_v34 = vmax.f32 %v3131_v44, 0.0  ;;  %v2963_v44 = vperm.slane %v5712_v12, 4 }
0x1039   :  { %v3094_v58 = vpop.f32.mrf.mxu3 }
0x103a   :  { %v3148_v42 = vpop.f32.mrf.mxu2  ;;  %v3095_v9 = vadd.f32 %v3094_v58, %v2959_v28 }
0x103b   :  { %v3149_v54 = vadd.f32 %v3148_v42, %v2962_v51 }
0x103c   :  { %v3132_v46 = vpop.f32.mrf.mxu1  ;;  %v3373_v59 = vmax.f32 %v3095_v9, 0.0 }
0x103d   :  { %v3133_v3 = vadd.f32 %v3132_v46, %v2961_v32  ;;  %v3376_v31 = vmax.f32 %v3149_v54, 0.0  ;;  %v4207_v46 = vld [vmem:[%s5846_s14 + $0x68] sm:$0xff] }
0x103f   :  { %v3391_v11 = vmax.f32 %v3133_v3, 0.0 }
0x1041   :  { %v3096_v8 = vpop.f32.mrf.mxu3  ;;  %v3423_v14 = vpack.c.bf16 %v3391_v11, %v3375_v34  ;;  %v3486_v34 = vunpack.c.h.b16 %v4207_v46 }
0x1042   :  { %v3150_v4 = vpop.f32.mrf.mxu2  ;;  %v3097_v25 = vadd.f32 %v3096_v8, %v2959_v28  ;;  %v2964_v8 = vperm.slane %v5712_v12, 5 }
0x1043   :  { %4194 = vmatmul.msk.bf16.vlgmr.msrb.gmra.mxu3 %vm144_vm2, %v5603_v22  ;;  %4196 = vmatmul.msk.bf16.vlgmr.msra.gmra.mxu0 %vm144_vm2, %v5603_v22  ;;  %v3151_v17 = vadd.f32 %v3150_v4, %v2962_v51  ;;  %v3502_v10 = vpack.c.b16 %v3486_v34, %v3486_v34 }
0x1044   :  { %4198 = vmatmul.msk.bf16.vlgmr.msrb.gmra.mxu1 %vm144_vm2, %v5603_v22  ;;  %4200 = vmatmul.msk.bf16.vlgmr.msra.gmra.mxu2 %vm144_vm2, %v5603_v22  ;;  %v3114_v22 = vpop.f32.mrf.mxu0  ;;  %v3389_v16 = vmax.f32 %v3097_v25, 0.0 }
0x1045   :  { %v3115_v57 = vadd.f32 %v3114_v22, %v2960_v5  ;;  %v3392_v2 = vmax.f32 %v3151_v17, 0.0  ;;  %3620 = vmatpush.bf16.xpose.msra.mxu0 %v3496_v35  ;;  %3638 = vmatpush.bf16.xpose.msrb.mxu1 %v3497_v52 }
0x1046   :  { %v3421_v15 = vpack.c.bf16 %v3389_v16, %v3373_v59  ;;  %3602 = vmatpush.bf16.xpose.msrb.mxu3 %v3495_v62  ;;  %3656 = vmatpush.bf16.xpose.msra.mxu2 %v3498_v38  ;;  %v2966_v16 = vperm.slane %v5712_v12, 7 }
0x1047   :  { %v3424_v7 = vpack.c.bf16 %v3392_v2, %v3376_v31 }
0x1053   :  { %4195 = vmatmul.msk.bf16.gmra.mxu3 %vm144_vm2, %v5629_v29  ;;  %4197 = vmatmul.msk.bf16.gmra.mxu0 %vm144_vm2, %v5629_v29 }
0x1054   :  { %4199 = vmatmul.msk.bf16.gmra.mxu1 %vm144_vm2, %v5629_v29  ;;  %4201 = vmatmul.msk.bf16.gmra.mxu2 %vm144_vm2, %v5629_v29  ;;  %v3390_v29 = vmax.f32 %v3115_v57, 0.0 }
0x1056   :  { %v3422_v26 = vpack.c.bf16 %v3390_v29, %v3374_v43 }
0x1063   :  { %3531 = vmatmul.bf16.vlgmr.msra.gmra.mxu3 %v3421_v15  ;;  %3549 = vmatmul.bf16.vlgmr.msrb.gmra.mxu0 %v3422_v26 }
0x1064   :  { %3567 = vmatmul.bf16.vlgmr.msra.gmra.mxu1 %v3423_v14  ;;  %3585 = vmatmul.bf16.vlgmr.msrb.gmra.mxu2 %v3424_v7 }
0x1065   :  { %3728 = vmatpush.bf16.xpose.msrb.mxu2 %v3502_v10 }
0x1070   :  { %v3117_v18 = vpop.f32.mrf.mxu0 }
0x1071   :  { %v3118_v40 = vadd.f32 %v3117_v18, %v2960_v5  ;;  %v3135_v45 = vpop.f32.mrf.mxu1  ;;  %v2965_v5 = vperm.slane %v5712_v12, 6 }
0x1072   :  { %v3136_v48 = vadd.f32 %v3135_v45, %v2961_v32  ;;  %v3485_v32 = vunpack.c.l.b16 %v4207_v46 }
0x1073   :  { %v3406_v61 = vmax.f32 %v3118_v40, 0.0 }
0x1074   :  { %v3407_v53 = vmax.f32 %v3136_v48, 0.0  ;;  %v3501_v17 = vpack.c.b16 %v3485_v32, %v3485_v32  ;;  %v4208_v32 = vld [vmem:[%s5846_s14 + $0x70] sm:$0xff] }
0x1075   :  { %v3438_v1 = vpack.c.bf16 %v3406_v61, %v3406_v61 }
0x1076   :  { %v3439_v60 = vpack.c.bf16 %v3407_v53, %v3407_v53  ;;  %v3099_v27 = vpop.f32.mrf.mxu3  ;;  %3710 = vmatpush.bf16.xpose.msra.mxu1 %v3501_v17 }
0x1077   :  { %v3100_v23 = vadd.f32 %v3099_v27, %v2959_v28  ;;  %v3153_v0 = vpop.f32.mrf.mxu2  ;;  %3554 = vmatmul.bf16.gmra.mxu0 %v3438_v1  ;;  %v4206_v28 = vld [vmem:[%s5846_s14 + $0x60] sm:$0xff] }
0x1078   :  { %v3154_v13 = vadd.f32 %v3153_v0, %v2962_v51  ;;  %3572 = vmatmul.bf16.gmra.mxu1 %v3439_v60  ;;  %v3119_v50 = vpop.f32.mrf.mxu0  ;;  %v3484_v4 = vunpack.c.h.b16 %v4206_v28  ;;  %v3483_v59 = vunpack.c.l.b16 %v4206_v28 }
0x1079   :  { %v3405_v39 = vmax.f32 %v3100_v23, 0.0  ;;  %v3137_v56 = vpop.f32.mrf.mxu1 }
0x107a   :  { %v3408_v20 = vmax.f32 %v3154_v13, 0.0  ;;  %v3500_v3 = vpack.c.b16 %v3484_v4, %v3484_v4  ;;  %v3499_v7 = vpack.c.b16 %v3483_v59, %v3483_v59 }
0x107b   :  { %v3437_v47 = vpack.c.bf16 %v3405_v39, %v3405_v39 }
0x107c   :  { %v3440_v63 = vpack.c.bf16 %v3408_v20, %v3408_v20  ;;  %3692 = vmatpush.bf16.xpose.msrb.mxu0 %v3500_v3  ;;  %3674 = vmatpush.bf16.xpose.msra.mxu3 %v3499_v7 }
0x107d   :  { %3536 = vmatmul.bf16.gmra.mxu3 %v3437_v47 }
0x107e   :  { %3590 = vmatmul.bf16.gmra.mxu2 %v3440_v63  ;;  %v3101_v58 = vpop.f32.mrf.mxu3 }
0x107f   :  { %v3155_v24 = vpop.f32.mrf.mxu2 }
0x1080   :  { %v3184_v42 = vpop.f32.mrf.mxu0 }
0x1081   :  { %v3202_v22 = vpop.f32.mrf.mxu1  ;;  %v3185_v57 = vadd.f32 %v3184_v42, %v2964_v8  ;;  %v5741_v42 = vld [vmem:[%s5847_s13 + $0x18] sm:$0xff] }
0x1082   :  { %v3203_v19 = vadd.f32 %v3202_v22, %v2965_v5  ;;  %v2968_v28 = vperm.slane %v5741_v42, 1  ;;  %v2969_v4 = vperm.slane %v5741_v42, 2 }
0x1083   :  { %v3378_v2 = vmax.f32 %v3185_v57, 0.0  ;;  %v3488_v57 = vunpack.c.h.b16 %v4208_v32 }
0x1084   :  { %v3379_v31 = vmax.f32 %v3203_v19, 0.0 }
0x1086   :  { %v3166_v51 = vpop.f32.mrf.mxu3 }
0x1087   :  { %v3220_v25 = vpop.f32.mrf.mxu2  ;;  %v3167_v15 = vadd.f32 %v3166_v51, %v2963_v44  ;;  %v4209_v51 = vld [vmem:[%s5846_s14 + $0x78] sm:$0xff] }
0x1088   :  { %v3186_v9 = vpop.f32.mrf.mxu0  ;;  %v3221_v41 = vadd.f32 %v3220_v25, %v2966_v16  ;;  %v3489_v25 = vunpack.c.l.b16 %v4209_v51 }
0x1089   :  { %v3187_v54 = vadd.f32 %v3186_v9, %v2964_v8  ;;  %v3204_v29 = vpop.f32.mrf.mxu1  ;;  %v3377_v30 = vmax.f32 %v3167_v15, 0.0  ;;  %v3504_v9 = vpack.c.b16 %v3488_v57, %v3488_v57  ;;  %v3490_v15 = vunpack.c.h.b16 %v4209_v51 }
0x108a   :  { %v3205_v11 = vadd.f32 %v3204_v29, %v2965_v5  ;;  %v3380_v18 = vmax.f32 %v3221_v41, 0.0  ;;  %v2973_v57 = vperm.slane %v5741_v42, 6 }
0x108b   :  { %v3394_v43 = vmax.f32 %v3187_v54, 0.0 }
0x108c   :  { %v3395_v26 = vmax.f32 %v3205_v11, 0.0 }
0x108d   :  { %v3426_v14 = vpack.c.bf16 %v3394_v43, %v3378_v2  ;;  %v2970_v43 = vperm.slane %v5741_v42, 3 }
0x108e   :  { %v3427_v21 = vpack.c.bf16 %v3395_v26, %v3379_v31  ;;  %v3168_v37 = vpop.f32.mrf.mxu3  ;;  %v3487_v26 = vunpack.c.l.b16 %v4208_v32  ;;  %v2972_v32 = vperm.slane %v5741_v42, 5 }
0x108f   :  { %v3169_v35 = vadd.f32 %v3168_v37, %v2963_v44  ;;  %v3222_v52 = vpop.f32.mrf.mxu2  ;;  %3621 = vmatmul.bf16.vlgmr.msra.gmra.mxu0 %v3426_v14  ;;  %v3506_v37 = vpack.c.b16 %v3490_v15, %v3490_v15 }
0x1090   :  { %v3223_v36 = vadd.f32 %v3222_v52, %v2966_v16  ;;  %3639 = vmatmul.bf16.vlgmr.msrb.gmra.mxu1 %v3427_v21  ;;  %v3189_v12 = vpop.f32.mrf.mxu0  ;;  %3764 = vmatpush.bf16.xpose.msra.mxu0 %v3504_v9  ;;  %v3503_v21 = vpack.c.b16 %v3487_v26, %v3487_v26 }
0x1091   :  { %v3393_v62 = vmax.f32 %v3169_v35, 0.0  ;;  %v3207_v38 = vpop.f32.mrf.mxu1  ;;  %v3190_v61 = vadd.f32 %v3189_v12, %v2964_v8 }
0x1092   :  { %v3396_v40 = vmax.f32 %v3223_v36, 0.0  ;;  %v3208_v53 = vadd.f32 %v3207_v38, %v2965_v5 }
0x1093   :  { %v3425_v45 = vpack.c.bf16 %v3393_v62, %v3377_v30  ;;  %v3410_v23 = vmax.f32 %v3190_v61, 0.0 }
0x1094   :  { %v3428_v48 = vpack.c.bf16 %v3396_v40, %v3380_v18  ;;  %v3411_v13 = vmax.f32 %v3208_v53, 0.0 }
0x1095   :  { %3603 = vmatmul.bf16.vlgmr.msrb.gmra.mxu3 %v3425_v45  ;;  %v3442_v56 = vpack.c.bf16 %v3410_v23, %v3410_v23 }
0x1096   :  { %3657 = vmatmul.bf16.vlgmr.msra.gmra.mxu2 %v3428_v48  ;;  %v3171_v1 = vpop.f32.mrf.mxu3  ;;  %v3443_v20 = vpack.c.bf16 %v3411_v13, %v3411_v13  ;;  %3746 = vmatpush.bf16.xpose.msrb.mxu3 %v3503_v21 }
0x1097   :  { %v3225_v60 = vpop.f32.mrf.mxu2  ;;  %v3172_v50 = vadd.f32 %v3171_v1, %v2963_v44  ;;  %v3505_v44 = vpack.c.b16 %v3489_v25, %v3489_v25  ;;  %3800 = vmatpush.bf16.xpose.msra.mxu2 %v3506_v37 }
0x1098   :  { %v3191_v27 = vpop.f32.mrf.mxu0  ;;  %v3226_v39 = vadd.f32 %v3225_v60, %v2966_v16  ;;  %v2967_v16 = vperm.slane %v5741_v42, 0 }
0x1099   :  { %v3209_v0 = vpop.f32.mrf.mxu1  ;;  %v3409_v63 = vmax.f32 %v3172_v50, 0.0  ;;  %3782 = vmatpush.bf16.xpose.msrb.mxu1 %v3505_v44  ;;  %v2971_v44 = vperm.slane %v5741_v42, 4 }
0x109a   :  { %v3412_v24 = vmax.f32 %v3226_v39, 0.0 }
0x109b   :  { %v3441_v5 = vpack.c.bf16 %v3409_v63, %v3409_v63 }
0x109c   :  { %v3444_v46 = vpack.c.bf16 %v3412_v24, %v3412_v24 }
0x109e   :  { %v3173_v47 = vpop.f32.mrf.mxu3 }
0x109f   :  { %v3227_v58 = vpop.f32.mrf.mxu2  ;;  %3626 = vmatmul.bf16.gmra.mxu0 %v3442_v56 }
0x10a0   :  { %3644 = vmatmul.bf16.gmra.mxu1 %v3443_v20  ;;  %v3256_v22 = vpop.f32.mrf.mxu0 }
0x10a1   :  { %v3274_v8 = vpop.f32.mrf.mxu1  ;;  %v3257_v17 = vadd.f32 %v3256_v22, %v2968_v28 }
0x10a2   :  { %v3275_v54 = vadd.f32 %v3274_v8, %v2969_v4 }
0x10a3   :  { %v3382_v34 = vmax.f32 %v3257_v17, 0.0 }
0x10a4   :  { %v3383_v14 = vmax.f32 %v3275_v54, 0.0 }
0x10a5   :  { %3608 = vmatmul.bf16.gmra.mxu3 %v3441_v5 }
0x10a6   :  { %3662 = vmatmul.bf16.gmra.mxu2 %v3444_v46  ;;  %v3238_v3 = vpop.f32.mrf.mxu3 }
0x10a7   :  { %v3292_v19 = vpop.f32.mrf.mxu2  ;;  %v3239_v10 = vadd.f32 %v3238_v3, %v2967_v16 }
0x10a8   :  { %v3258_v29 = vpop.f32.mrf.mxu0  ;;  %v3293_v35 = vadd.f32 %v3292_v19, %v2970_v43 }
0x10a9   :  { %v3259_v11 = vadd.f32 %v3258_v29, %v2968_v28  ;;  %v3276_v2 = vpop.f32.mrf.mxu1  ;;  %v3381_v18 = vmax.f32 %v3239_v10, 0.0 }
0x10aa   :  { %v3277_v59 = vadd.f32 %v3276_v2, %v2969_v4  ;;  %v3384_v48 = vmax.f32 %v3293_v35, 0.0 }
0x10ab   :  { %v3398_v31 = vmax.f32 %v3259_v11, 0.0 }
0x10ac   :  { %v3399_v7 = vmax.f32 %v3277_v59, 0.0 }
0x10ad   :  { %v3430_v41 = vpack.c.bf16 %v3398_v31, %v3382_v34 }
0x10ae   :  { %v3431_v52 = vpack.c.bf16 %v3399_v7, %v3383_v14  ;;  %v3240_v36 = vpop.f32.mrf.mxu3 }
0x10af   :  { %v3241_v12 = vadd.f32 %v3240_v36, %v2967_v16  ;;  %v3294_v30 = vpop.f32.mrf.mxu2  ;;  %3693 = vmatmul.bf16.vlgmr.msrb.gmra.mxu0 %v3430_v41 }
0x10b0   :  { %v3295_v62 = vadd.f32 %v3294_v30, %v2970_v43  ;;  %3711 = vmatmul.bf16.vlgmr.msra.gmra.mxu1 %v3431_v52  ;;  %v3261_v38 = vpop.f32.mrf.mxu0 }
0x10b1   :  { %v3397_v40 = vmax.f32 %v3241_v12, 0.0  ;;  %v3279_v45 = vpop.f32.mrf.mxu1  ;;  %v3262_v60 = vadd.f32 %v3261_v38, %v2968_v28 }
0x10b2   :  { %v3400_v61 = vmax.f32 %v3295_v62, 0.0  ;;  %v3280_v27 = vadd.f32 %v3279_v45, %v2969_v4 }
0x10b3   :  { %v3429_v53 = vpack.c.bf16 %v3397_v40, %v3381_v18  ;;  %v3414_v50 = vmax.f32 %v3262_v60, 0.0 }
0x10b4   :  { %v3432_v1 = vpack.c.bf16 %v3400_v61, %v3384_v48  ;;  %v3415_v56 = vmax.f32 %v3280_v27, 0.0 }
0x10b5   :  { %3675 = vmatmul.bf16.vlgmr.msra.gmra.mxu3 %v3429_v53  ;;  %v3446_v63 = vpack.c.bf16 %v3414_v50, %v3414_v50 }
0x10b6   :  { %3729 = vmatmul.bf16.vlgmr.msrb.gmra.mxu2 %v3432_v1  ;;  %v3243_v23 = vpop.f32.mrf.mxu3  ;;  %v3447_v58 = vpack.c.bf16 %v3415_v56, %v3415_v56 }
0x10b7   :  { %v3297_v0 = vpop.f32.mrf.mxu2  ;;  %v3244_v20 = vadd.f32 %v3243_v23, %v2967_v16  ;;  %v2974_v16 = vperm.slane %v5741_v42, 7 }
0x10b8   :  { %v3263_v13 = vpop.f32.mrf.mxu0  ;;  %v3298_v47 = vadd.f32 %v3297_v0, %v2970_v43 }
0x10b9   :  { %v3281_v39 = vpop.f32.mrf.mxu1  ;;  %v3413_v22 = vmax.f32 %v3244_v20, 0.0 }
0x10ba   :  { %v3416_v5 = vmax.f32 %v3298_v47, 0.0 }
0x10bb   :  { %v3445_v4 = vpack.c.bf16 %v3413_v22, %v3413_v22 }
0x10bc   :  { %v3448_v51 = vpack.c.bf16 %v3416_v5, %v3416_v5 }
0x10be   :  { %v3245_v24 = vpop.f32.mrf.mxu3 }
0x10bf   :  { %v3299_v8 = vpop.f32.mrf.mxu2  ;;  %3698 = vmatmul.bf16.gmra.mxu0 %v3446_v63 }
0x10c0   :  { %3716 = vmatmul.bf16.gmra.mxu1 %v3447_v58  ;;  %v3328_v28 = vpop.f32.mrf.mxu0  ;;  %v4290_v58 = vld [vmem:[%s5848_s15 + $0x1] ss:$0 sm:$0xff] }
0x10c1   :  { %v3346_v46 = vpop.f32.mrf.mxu1  ;;  %v3329_v3 = vadd.f32 %v3328_v28, %v2972_v32 }
0x10c2   :  { %v3347_v19 = vadd.f32 %v3346_v46, %v2973_v57 }
0x10c3   :  { %v3386_v2 = vmax.f32 %v3329_v3, 0.0 }
0x10c4   :  { %v3387_v59 = vmax.f32 %v3347_v19, 0.0 }
0x10c5   :  { %3680 = vmatmul.bf16.gmra.mxu3 %v3445_v4 }
0x10c6   :  { %3734 = vmatmul.bf16.gmra.mxu2 %v3448_v51  ;;  %v3310_v25 = vpop.f32.mrf.mxu3 }
0x10c7   :  { %v3364_v17 = vpop.f32.mrf.mxu2  ;;  %v3311_v31 = vadd.f32 %v3310_v25, %v2971_v44 }
0x10c8   :  { %v3330_v9 = vpop.f32.mrf.mxu0  ;;  %v3365_v15 = vadd.f32 %v3364_v17, %v2974_v16 }
0x10c9   :  { %v3331_v54 = vadd.f32 %v3330_v9, %v2972_v32  ;;  %v3348_v29 = vpop.f32.mrf.mxu1  ;;  %v3385_v35 = vmax.f32 %v3311_v31, 0.0 }
0x10ca   :  { %v3349_v11 = vadd.f32 %v3348_v29, %v2973_v57  ;;  %v3388_v42 = vmax.f32 %v3365_v15, 0.0 }
0x10cb   :  { %v3402_v43 = vmax.f32 %v3331_v54, 0.0 }
0x10cc   :  { %v3403_v34 = vmax.f32 %v3349_v11, 0.0 }
0x10cd   :  { %v3434_v26 = vpack.c.bf16 %v3402_v43, %v3386_v2 }
0x10ce   :  { %v3435_v14 = vpack.c.bf16 %v3403_v34, %v3387_v59  ;;  %v3312_v7 = vpop.f32.mrf.mxu3 }
0x10cf   :  { %v3313_v10 = vadd.f32 %v3312_v7, %v2971_v44  ;;  %v3366_v41 = vpop.f32.mrf.mxu2  ;;  %3765 = vmatmul.bf16.vlgmr.msra.gmra.mxu0 %v3434_v26 }
0x10d0   :  { %v3367_v21 = vadd.f32 %v3366_v41, %v2974_v16  ;;  %3783 = vmatmul.bf16.vlgmr.msrb.gmra.mxu1 %v3435_v14  ;;  %v3333_v37 = vpop.f32.mrf.mxu0 }
0x10d1   :  { %v3401_v52 = vmax.f32 %v3313_v10, 0.0  ;;  %v3351_v36 = vpop.f32.mrf.mxu1  ;;  %v3334_v38 = vadd.f32 %v3333_v37, %v2972_v32 }
0x10d2   :  { %v3404_v12 = vmax.f32 %v3367_v21, 0.0  ;;  %v3352_v18 = vadd.f32 %v3351_v36, %v2973_v57 }
0x10d3   :  { %v3433_v30 = vpack.c.bf16 %v3401_v52, %v3385_v35  ;;  %v3418_v61 = vmax.f32 %v3334_v38, 0.0 }
0x10d4   :  { %v3436_v62 = vpack.c.bf16 %v3404_v12, %v3388_v42  ;;  %v3419_v1 = vmax.f32 %v3352_v18, 0.0 }
0x10d5   :  { %3747 = vmatmul.bf16.vlgmr.msrb.gmra.mxu3 %v3433_v30  ;;  %v3450_v23 = vpack.c.bf16 %v3418_v61, %v3418_v61 }
0x10d6   :  { %3801 = vmatmul.bf16.vlgmr.msra.gmra.mxu2 %v3436_v62  ;;  %v3315_v40 = vpop.f32.mrf.mxu3  ;;  %v3451_v0 = vpack.c.bf16 %v3419_v1, %v3419_v1 }
0x10d7   :  { %v3369_v45 = vpop.f32.mrf.mxu2  ;;  %v3316_v60 = vadd.f32 %v3315_v40, %v2971_v44 }
0x10d8   :  { %v3335_v48 = vpop.f32.mrf.mxu0  ;;  %v3370_v27 = vadd.f32 %v3369_v45, %v2974_v16 }
0x10d9   :  { %v3353_v53 = vpop.f32.mrf.mxu1  ;;  %v3417_v50 = vmax.f32 %v3316_v60, 0.0 }
0x10da   :  { %v3420_v56 = vmax.f32 %v3370_v27, 0.0 }
0x10db   :  { %v3449_v47 = vpack.c.bf16 %v3417_v50, %v3417_v50 }
0x10dc   :  { %v3452_v24 = vpack.c.bf16 %v3420_v56, %v3420_v56 }
0x10de   :  { %v3317_v13 = vpop.f32.mrf.mxu3 }
0x10df   :  { %v3371_v39 = vpop.f32.mrf.mxu2  ;;  %3770 = vmatmul.bf16.gmra.mxu0 %v3450_v23 }
0x10e0   :  { %3788 = vmatmul.bf16.gmra.mxu1 %v3451_v0  ;;  %v3550_v20 = vpop.f32.mrf.mxu0 }
0x10e1   :  { %v3568_v63 = vpop.f32.mrf.mxu1 }
0x10e5   :  { %3752 = vmatmul.bf16.gmra.mxu3 %v3449_v47 }
0x10e6   :  { %3806 = vmatmul.bf16.gmra.mxu2 %v3452_v24  ;;  %v3532_v22 = vpop.f32.mrf.mxu3 }
0x10e7   :  { %v3533_v8 = vadd.f32 %v4290_v58, %v3532_v22  ;;  %v3586_v28 = vpop.f32.mrf.mxu2 }
0x10e8   :  { %v3552_v4 = vpop.f32.mrf.mxu0 }
0x10e9   :  { %v3551_v5 = vadd.f32 %v3550_v20, %v3533_v8  ;;  %v3570_v51 = vpop.f32.mrf.mxu1 }
0x10eb   :  { %v3569_v46 = vadd.f32 %v3568_v63, %v3551_v5 }
0x10ed   :  { %v3587_v32 = vadd.f32 %v3586_v28, %v3569_v46 }
0x10ee   :  { %v3534_v57 = vpop.f32.mrf.mxu3 }
0x10ef   :  { %v3535_v25 = vadd.f32 %v4290_v58, %v3534_v57  ;;  %v3588_v19 = vpop.f32.mrf.mxu2 }
0x10f1   :  { %v3553_v3 = vadd.f32 %v3552_v4, %v3535_v25 }
0x10f3   :  { %v3571_v17 = vadd.f32 %v3570_v51, %v3553_v3 }
0x10f4   :  { %v3555_v9 = vpop.f32.mrf.mxu0 }
0x10f5   :  { %v3589_v44 = vadd.f32 %v3588_v19, %v3571_v17  ;;  %v3573_v54 = vpop.f32.mrf.mxu1 }
0x10fc   :  { %v3557_v29 = vpop.f32.mrf.mxu0 }
0x10fd   :  { %v3575_v16 = vpop.f32.mrf.mxu1 }
0x1100   :  { %v3537_v11 = vpop.f32.mrf.mxu3 }
0x1101   :  { %v3538_v2 = vadd.f32 %v4290_v58, %v3537_v11  ;;  %v3591_v43 = vpop.f32.mrf.mxu2 }
0x1103   :  { %v3556_v59 = vadd.f32 %v3555_v9, %v3538_v2 }
0x1105   :  { %v3574_v34 = vadd.f32 %v3573_v54, %v3556_v59 }
0x1107   :  { %v3592_v31 = vadd.f32 %v3591_v43, %v3574_v34 }
0x1108   :  { %v3539_v26 = vpop.f32.mrf.mxu3 }
0x1109   :  { %v3593_v15 = vpop.f32.mrf.mxu2 }
0x110c   :  { %v3622_v14 = vpop.f32.mrf.mxu0 }
0x110d   :  { %v3640_v7 = vpop.f32.mrf.mxu1 }
0x1114   :  { %v3624_v10 = vpop.f32.mrf.mxu0 }
0x1115   :  { %v3642_v41 = vpop.f32.mrf.mxu1 }
0x1118   :  { %v3604_v21 = vpop.f32.mrf.mxu3 }
0x1119   :  { %v3658_v37 = vpop.f32.mrf.mxu2  ;;  %v3605_v23 = vadd.f32 %v3604_v21, %v3587_v32 }
0x111b   :  { %v3623_v50 = vadd.f32 %v3622_v14, %v3605_v23 }
0x111c   :  { %v3627_v35 = vpop.f32.mrf.mxu0 }
0x111d   :  { %v3645_v52 = vpop.f32.mrf.mxu1  ;;  %v3641_v20 = vadd.f32 %v3640_v7, %v3623_v50 }
0x111f   :  { %v3659_v24 = vadd.f32 %v3658_v37, %v3641_v20 }
0x1120   :  { %v3606_v36 = vpop.f32.mrf.mxu3 }
0x1121   :  { %v3660_v42 = vpop.f32.mrf.mxu2  ;;  %v3607_v47 = vadd.f32 %v3606_v36, %v3589_v44 }
0x1123   :  { %v3625_v22 = vadd.f32 %v3624_v10, %v3607_v47 }
0x1124   :  { %v3629_v12 = vpop.f32.mrf.mxu0 }
0x1125   :  { %v3647_v30 = vpop.f32.mrf.mxu1  ;;  %v3643_v46 = vadd.f32 %v3642_v41, %v3625_v22 }
0x1127   :  { %v3661_v32 = vadd.f32 %v3660_v42, %v3643_v46 }
0x1128   :  { %v3609_v62 = vpop.f32.mrf.mxu3 }
0x1129   :  { %v3663_v38 = vpop.f32.mrf.mxu2  ;;  %v3610_v4 = vadd.f32 %v3609_v62, %v3592_v31 }
0x112b   :  { %v3628_v3 = vadd.f32 %v3627_v35, %v3610_v4 }
0x112c   :  { %v3694_v18 = vpop.f32.mrf.mxu0 }
0x112d   :  { %v3712_v40 = vpop.f32.mrf.mxu1  ;;  %v3646_v29 = vadd.f32 %v3645_v52, %v3628_v3 }
0x112f   :  { %v3664_v43 = vadd.f32 %v3663_v38, %v3646_v29 }
0x1130   :  { %v3611_v45 = vpop.f32.mrf.mxu3 }
0x1131   :  { %v3665_v48 = vpop.f32.mrf.mxu2 }
0x1134   :  { %v3696_v61 = vpop.f32.mrf.mxu0 }
0x1135   :  { %v3714_v53 = vpop.f32.mrf.mxu1 }
0x1138   :  { %v3676_v1 = vpop.f32.mrf.mxu3 }
0x1139   :  { %v3730_v60 = vpop.f32.mrf.mxu2  ;;  %v3677_v5 = vadd.f32 %v3676_v1, %v3659_v24 }
0x113b   :  { %v3695_v57 = vadd.f32 %v3694_v18, %v3677_v5 }
0x113c   :  { %v3699_v27 = vpop.f32.mrf.mxu0 }
0x113d   :  { %v3717_v0 = vpop.f32.mrf.mxu1  ;;  %v3713_v19 = vadd.f32 %v3712_v40, %v3695_v57 }
0x113f   :  { %v3731_v16 = vadd.f32 %v3730_v60, %v3713_v19 }
0x1140   :  { %v3678_v13 = vpop.f32.mrf.mxu3 }
0x1141   :  { %v3732_v39 = vpop.f32.mrf.mxu2  ;;  %v3679_v9 = vadd.f32 %v3678_v13, %v3661_v32 }
0x1143   :  { %v3697_v11 = vadd.f32 %v3696_v61, %v3679_v9 }
0x1144   :  { %v3701_v56 = vpop.f32.mrf.mxu0 }
0x1145   :  { %v3719_v63 = vpop.f32.mrf.mxu1  ;;  %v3715_v26 = vadd.f32 %v3714_v53, %v3697_v11 }
0x1147   :  { %v3733_v41 = vadd.f32 %v3732_v39, %v3715_v26 }
0x1148   :  { %v3681_v58 = vpop.f32.mrf.mxu3 }
0x1149   :  { %v3735_v8 = vpop.f32.mrf.mxu2  ;;  %v3682_v15 = vadd.f32 %v3681_v58, %v3664_v43 }
0x114b   :  { %v3700_v21 = vadd.f32 %v3699_v27, %v3682_v15 }
0x114c   :  { %v3766_v28 = vpop.f32.mrf.mxu0 }
0x114d   :  { %v3784_v51 = vpop.f32.mrf.mxu1  ;;  %v3718_v12 = vadd.f32 %v3717_v0, %v3700_v21 }
0x114f   :  { %v3736_v45 = vadd.f32 %v3735_v8, %v3718_v12 }
0x1150   :  { %v3683_v25 = vpop.f32.mrf.mxu3 }
0x1151   :  { %v3737_v17 = vpop.f32.mrf.mxu2 }
0x1154   :  { %v3768_v54 = vpop.f32.mrf.mxu0 }
0x1155   :  { %v3786_v44 = vpop.f32.mrf.mxu1 }
0x1158   :  { %v3748_v2 = vpop.f32.mrf.mxu3 }
0x1159   :  { %v3749_v59 = vadd.f32 %v3748_v2, %v3731_v16  ;;  %v3802_v34 = vpop.f32.mrf.mxu2 }
0x115b   :  { %v3767_v31 = vadd.f32 %v3766_v28, %v3749_v59 }
0x115c   :  { %v3771_v14 = vpop.f32.mrf.mxu0 }
0x115d   :  { %v3785_v7 = vadd.f32 %v3784_v51, %v3767_v31  ;;  %v3789_v10 = vpop.f32.mrf.mxu1  ;;  %v4291_v31 = vld [vmem:[%s5849_s16 + $0x1] ss:$0 sm:$0xff] }
0x115f   :  { %v3803_v37 = vadd.f32 %v3802_v34, %v3785_v7 }
0x1160   :  { %v3750_v35 = vpop.f32.mrf.mxu3 }
0x1161   :  { %v3751_v36 = vadd.f32 %v3750_v35, %v3733_v41  ;;  %v3804_v42 = vpop.f32.mrf.mxu2  ;;  %v3811_v52 = vadd.f32 %v3803_v37, %v5597_v6 }
0x1163   :  { %v3769_v30 = vadd.f32 %v3768_v54, %v3751_v36  ;;  %v3818_v62 = vsel %vm144_vm2, %v3811_v52, 0.0 }
0x1164   :  { %v3773_v38 = vpop.f32.mrf.mxu0  ;;  %3819 = vadd.xlane.f32.xlu0 %v3818_v62 }
0x1165   :  { %v3787_v18 = vadd.f32 %v3786_v44, %v3769_v30  ;;  %v3791_v40 = vpop.f32.mrf.mxu1 }
0x1167   :  { %v3805_v48 = vadd.f32 %v3804_v42, %v3787_v18 }
0x1168   :  { %v3753_v61 = vpop.f32.mrf.mxu3 }
0x1169   :  { %v3812_v53 = vadd.f32 %v3805_v48, %v5599_v55  ;;  %v3754_v1 = vadd.f32 %v3753_v61, %v3736_v45  ;;  %v3807_v60 = vpop.f32.mrf.mxu2 }
0x116b   :  { %v3772_v27 = vadd.f32 %v3771_v14, %v3754_v1  ;;  %v3821_v23 = vsel %vm144_vm2, %v3812_v53, 0.0 }
0x116c   :  { %3822 = vadd.xlane.f32.xlu1 %v3821_v23 }
0x116d   :  { %v3790_v6 = vadd.f32 %v3789_v10, %v3772_v27 }
0x116f   :  { %v3808_v0 = vadd.f32 %v3807_v60, %v3790_v6 }
0x1170   :  { %v3755_v13 = vpop.f32.mrf.mxu3 }
0x1171   :  { %v3813_v50 = vadd.f32 %v3808_v0, %v5625_v49  ;;  %v3809_v39 = vpop.f32.mrf.mxu2  ;;  %v3908_v0 = vld [vmem:[%s5852_s18 + $0x10] sm:$0x3f]  ;;  %v3907_v13 = vld [vmem:[%s5852_s18 + $0x8] sm:$0xff] }
0x1173   :  { %v3824_v56 = vsel %vm990_vm15, %v3813_v50, 0.0 }
0x1174   :  { %3825 = vadd.xlane.f32.xlu2 %v3824_v56 }
0x11d7   :  { %v3820_v20 = vpop.xlane.xlu0 %3819 }
0x11d8   :  { %v3827_v47 = vmul.f32 %v3820_v20, %v4967_v33  ;;  %v3906_v20 = vld [vmem:[%s5852_s18] sm:$0xff] }
0x11da   :  { %v3830_v63 = vsub.f32 %v3811_v52, %v3827_v47 }
0x11dc   :  { %v3833_v55 = vmul.f32 %v3830_v63, %v3830_v63 }
0x11de   :  { %v3836_v58 = vsel %vm144_vm2, %v3833_v55, 0.0 }
0x11df   :  { %v3823_v24 = vpop.xlane.xlu1 %3822  ;;  %3837 = vadd.xlane.f32.xlu0 %v3836_v58  ;;  %v3905_v58 = vld [vmem:[%s5853_s3] sm:$0x3] }
0x11e0   :  { %v3828_v22 = vmul.f32 %v3823_v24, %v4967_v33  ;;  %v3946_v24 = vld [vmem:[%s5854_s20 + $0x18] sm:$0xff] }
0x11e2   :  { %v3831_v8 = vsub.f32 %v3812_v53, %v3828_v22  ;;  %v3945_v22 = vld [vmem:[%s5854_s20 + $0x10] sm:$0xff] }
0x11e4   :  { %v3834_v5 = vmul.f32 %v3831_v8, %v3831_v8 }
0x11e6   :  { %v3839_v28 = vsel %vm144_vm2, %v3834_v5, 0.0  ;;  %v3943_v5 = vld [vmem:[%s5854_s20] sm:$0xff] }
0x11e7   :  { %v3826_v49 = vpop.xlane.xlu2 %3825  ;;  %3840 = vadd.xlane.f32.xlu1 %v3839_v28  ;;  %v3979_v28 = vld [vmem:[%s5856_s22 + $0x18] sm:$0xff] }
0x11e8   :  { %v3829_v46 = vmul.f32 %v3826_v49, %v4967_v33  ;;  %v3978_v49 = vld [vmem:[%s5856_s22 + $0x10] sm:$0xff]  ;;  %3999 = vmatpush.msrb.mxu0 %v3979_v28 }
0x11ea   :  { %v3832_v4 = vsub.f32 %v3813_v50, %v3829_v46  ;;  %4000 = vmatpush.msrb.mxu0 %v3978_v49  ;;  %v4293_v46 = vld [vmem:[%s5851_s19] ss:$0 sm:$0xff] }
0x11ec   :  { %v3835_v51 = vmul.f32 %v3832_v4, %v3832_v4 }
0x11ee   :  { %v3842_v57 = vsel %vm990_vm15, %v3835_v51, 0.0 }
0x11ef   :  { %3843 = vadd.xlane.f32.xlu2 %v3842_v57 }
0x1252   :  { %v3838_v25 = vpop.xlane.xlu0 %3837 }
0x1253   :  { %v3845_v32 = vmul.f32 %v3838_v25, %v4967_v33  ;;  %v3977_v25 = vld [vmem:[%s5856_s22 + $0x8] sm:$0xff] }
0x1254   :  { %4001 = vmatpush.msrb.mxu0 %v3977_v25 }
0x1255   :  { %v3848_v3 = vadd.f32 1e-05, %v3845_v32  ;;  %v3976_v32 = vld [vmem:[%s5856_s22] sm:$0xff] }
0x1256   :  { %4002 = vmatpush.msrb.mxu0 %v3976_v32 }
0x1257   :  { %4412 = vrsqrt.f32 %v3848_v3  ;;  %vm3857_vm11 = vweird.f32 %v3848_v3 }
0x125a   :  { %v3841_v17 = vpop.xlane.xlu1 %3840 }
0x125b   :  { %v3846_v19 = vmul.f32 %v3841_v17, %v4967_v33  ;;  %v4294_v17 = vld [vmem:[%s5855_s21] ss:$0 sm:$0xff] }
0x125d   :  { %v4413_v9 = vpop.eup %4412  ;;  %v3849_v54 = vadd.f32 1e-05, %v3846_v19 }
0x125e   :  { %v3852_v29 = vmul.f32 %v4413_v9, %v3848_v3  ;;  %vm3858_vm0 = vweird.f32 %v4413_v9  ;;  %v29_v3 = vstv %s5857_s23 }
0x125f   :  { %4414 = vrsqrt.f32 %v3849_v54  ;;  %vm3859_vm12 = vmor %vm3857_vm11, %vm3858_vm0  ;;  %vm3867_vm14 = vweird.f32 %v3849_v54  ;;  %30 = vst [vmem:[#allocation2] sm:$0x1] %v29_v3 }
0x1260   :  { %v3853_v44 = vmul.f32 %v4413_v9, %v3852_v29 }
0x1262   :  { %v3854_v16 = vmul.f32 0.5, %v3853_v44  ;;  %v3844_v11 = vpop.xlane.xlu2 %3843 }
0x1263   :  { %v3847_v2 = vmul.f32 %v3844_v11, %v4967_v33  ;;  %v4292_v33 = vld [vmem:[%s5850_s17 + $0x1] ss:$0 sm:$0xff] }
0x1264   :  { %v3855_v43 = vsub.f32 1.5, %v3854_v16 }
0x1265   :  { %v4415_v59 = vpop.eup %4414  ;;  %v3850_v34 = vadd.f32 1e-05, %v3847_v2 }
0x1266   :  { %v3856_v26 = vmul.f32 %v4413_v9, %v3855_v43  ;;  %v3862_v15 = vmul.f32 %v4415_v59, %v3849_v54  ;;  %vm3868_vm13 = vweird.f32 %v4415_v59  ;;  %v4295_v29 = vld [vmem:[#allocation2] ss:$0 sm:$0xff] }
0x1267   :  { %4416 = vrsqrt.f32 %v3850_v34  ;;  %vm3869_vm5 = vmor %vm3867_vm14, %vm3868_vm13  ;;  %vm3877_vm7 = vweird.f32 %v3850_v34 }
0x1268   :  { %v3863_v14 = vmul.f32 %v4415_v59, %v3862_v15  ;;  %v3860_v7 = vsel %vm3859_vm12, %v4413_v9, %v3856_v26 }
0x1269   :  { %v3881_v10 = vmul.f32 %v3860_v7, %v3830_v63 }
0x126a   :  { %v3864_v41 = vmul.f32 0.5, %v3863_v14 }
0x126b   :  { %v3887_v21 = vmul.f32 %v4291_v31, %v3881_v10 }
0x126c   :  { %v3865_v37 = vsub.f32 1.5, %v3864_v41 }
0x126d   :  { %v4417_v35 = vpop.eup %4416  ;;  %v3893_v36 = vadd.f32 %v4292_v33, %v3887_v21 }
0x126e   :  { %v3866_v42 = vmul.f32 %v4415_v59, %v3865_v37  ;;  %v3872_v52 = vmul.f32 %v4417_v35, %v3850_v34  ;;  %vm3878_vm1 = vweird.f32 %v4417_v35 }
0x126f   :  { %v3896_v12 = vsel %vm144_vm2, %v3893_v36, 0.0  ;;  %vm3879_vm8 = vmor %vm3877_vm7, %vm3878_vm1 }
0x1270   :  { %v3873_v30 = vmul.f32 %v4417_v35, %v3872_v52  ;;  %3897 = vadd.xlane.f32.xlu0 %v3896_v12  ;;  %v3870_v62 = vsel %vm3869_vm5, %v4415_v59, %v3866_v42 }
0x1271   :  { %v3882_v38 = vmul.f32 %v3870_v62, %v3831_v8  ;;  %v3944_v8 = vld [vmem:[%s5854_s20 + $0x8] sm:$0xff] }
0x1272   :  { %v3874_v18 = vmul.f32 0.5, %v3873_v30 }
0x1273   :  { %v3888_v40 = vmul.f32 %v4291_v31, %v3882_v38 }
0x1274   :  { %v3875_v45 = vsub.f32 1.5, %v3874_v18 }
0x1275   :  { %v3894_v48 = vadd.f32 %v4292_v33, %v3888_v40 }
0x1276   :  { %v3876_v61 = vmul.f32 %v4417_v35, %v3875_v45 }
0x1277   :  { %v3899_v53 = vsel %vm144_vm2, %v3894_v48, 0.0  ;;  %vm3951_vm2 = vcmask 261120  }
0x1278   :  { %3900 = vadd.xlane.f32.xlu1 %v3899_v53  ;;  %v3880_v1 = vsel %vm3879_vm8, %v4417_v35, %v3876_v61 }
0x1279   :  { %v3883_v60 = vmul.f32 %v3880_v1, %v3832_v4 }
0x127b   :  { %v3889_v27 = vmul.f32 %v4291_v31, %v3883_v60 }
0x127d   :  { %v3895_v23 = vadd.f32 %v4292_v33, %v3889_v27 }
0x127f   :  { %v3902_v6 = vsel %vm990_vm15, %v3895_v23, 0.0 }
0x1280   :  { %3903 = vadd.xlane.f32.xlu2 %v3902_v6 }
0x12e3   :  { %v3898_v47 = vpop.xlane.xlu0 %3897 }
0x12e4   :  { %v3909_v55 = vmul.f32 %v3906_v20, %v3898_v47 }
0x12eb   :  { %v3901_v50 = vpop.xlane.xlu1 %3900 }
0x12ec   :  { %v3910_v63 = vmul.f32 %v3907_v13, %v3901_v50 }
0x12f3   :  { %v3904_v39 = vpop.xlane.xlu2 %3903 }
0x12f4   :  { %v3911_v56 = vmul.f32 %v3908_v0, %v3904_v39 }
0x12f6   :  { %4213 = vmatpush.msk.msra.mxu3 %vm509_vm6, %v3911_v56 }
0x12f8   :  { %3936 = vmatpush.msra.mxu3 %v3910_v63 }
0x12fa   :  { %3937 = vmatpush.msra.mxu3 %v3909_v55 }
0x12fb   :  { %4214 = vmatmul.msk.f32.vlgmr.msra.gmra.mxu3 %vm234_vm4, %v3905_v58 }
0x12fc   :  { %3967 = vmatpush.msrb.mxu3 %v3946_v24 }
0x12fe   :  { %3968 = vmatpush.msrb.mxu3 %v3945_v22 }
0x1300   :  { %3969 = vmatpush.msrb.mxu3 %v3944_v8 }
0x1302   :  { %3970 = vmatpush.msrb.mxu3 %v3943_v5 }
0x137e   :  { %v3939_v4 = vpop.f32.mrf.mxu3 }
0x137f   :  { %v3940_v51 = vadd.f32 %v4293_v46, %v3939_v4 }
0x1381   :  { %v3942_v57 = vmax.f32 %v3940_v51, 0.0 }
0x1383   :  { %4215 = vmatmul.msk.f32.vlgmr.msrb.gmra.mxu3 %vm3951_vm2, %v3942_v57 }
0x1406   :  { %v3972_v19 = vpop.f32.mrf.mxu3 }
0x1407   :  { %v3973_v9 = vadd.f32 %v4294_v17, %v3972_v19 }
0x1409   :  { %v3975_v54 = vmax.f32 %v3973_v9, 0.0 }
0x140b   :  { %4216 = vmatmul.msk.f32.vlgmr.msrb.gmra.mxu0 %vm3951_vm2, %v3975_v54 }
0x1488   :  { %v4004_v44 = vpop.f32.mrf.mxu0 }
0x1489   :  { %v4005_v16 = vadd.f32 %v4295_v29, %v4004_v44 }
0x148b   :  { %v4007_v11 = vsub.f32 0.0, %v4005_v16 }
0x148d   :  { %v4008_v2 = vmul.f32 1.442695, %v4007_v11 }
0x148f   :  { %4418 = vpow2.f32 %v4008_v2 }
0x1495   :  { %v4419_v43 = vpop.eup %4418 }
0x1496   :  { %v4010_v59 = vadd.f32 1.0, %v4419_v43 }
0x1498   :  { %4420 = vrcp.f32 %v4010_v59  ;;  %v4022_v31 = vand.u32 2147483648, %v4010_v59  ;;  %v4020_v7 = vand.u32 2147483647, %v4010_v59  ;;  %vm4016_vm6 = vweird.f32 %v4010_v59 }
0x149a   :  { %v4023_v33 = vor.u32 1.1754944e-38, %v4022_v31  ;;  %vm4021_vm3 = vcmp.eq.f32.partialorder %v4020_v7, 8.507059e+37 }
0x149e   :  { %v4421_v34 = vpop.eup %4420 }
0x149f   :  { %v4012_v26 = vmul.f32 %v4421_v34, %v4010_v59  ;;  %vm4017_vm4 = vweird.f32 %v4421_v34 }
0x14a0   :  { %vm4018_vm15 = vmor %vm4016_vm6, %vm4017_vm4 }
0x14a1   :  { %v4013_v15 = vsub.f32 1.0, %v4012_v26 }
0x14a3   :  { %v4014_v14 = vmul.f32 %v4421_v34, %v4013_v15 }
0x14a5   :  { %v4015_v10 = vadd.f32 %v4421_v34, %v4014_v14 }
0x14a7   :  { %v4019_v41 = vsel %vm4018_vm15, %v4421_v34, %v4015_v10 }
0x14a8   :  { %v4024_v21 = vsel %vm4021_vm3, %v4023_v33, %v4019_v41 }
0x14a9   :  { %4027 = vst.msk [vmem:[%s5858_s24] sm:$0x3] %vm4026_vm9, %v4024_v21 }

</bundles_post_ra>
